<compile_context>
chip_gen: v7x
topology: tpu7x:2x2x1
jax: 0.10.0
libtpu: 0.0.40
codegen_flags: <defaults>
</compile_context>

<pallas_src>
import functools
import math
import warnings

import jax
import jax.numpy as jnp
import numpy as np
from jax.experimental import pallas as pl
from jax.experimental.pallas import tpu as pltpu

BN_EPS = 1e-5
SQRT_HALF = math.sqrt(0.5)


def _gbn(h, gamma, beta, n_vb, vbs):
    """Ghost BatchNorm (training stats, biased var) on the full [rows, 2d] tensor.

    h: [rows, 2d] f32 with rows = n_vb * vbs.  gamma/beta: [1, 2d] f32.
    BN folded into a single per-virtual-batch scale/shift.
    """
    two_d = h.shape[-1]
    hr = h.reshape(n_vb, vbs, two_d)
    mean = jnp.mean(hr, axis=1, keepdims=True)                    # [n_vb, 1, 2d]
    var = jnp.mean(jnp.square(hr - mean), axis=1, keepdims=True)  # biased (BN train mode)
    scale = gamma * jax.lax.rsqrt(var + BN_EPS)                   # [n_vb, 1, 2d]
    shift = beta - mean * scale
    return (hr * scale + shift).reshape(n_vb * vbs, two_d)


def feat_transformer_kernel(x_ref, w0_ref, wr_ref, gamma_ref, beta_ref, o_ref,
                            *, n_vb, vbs, d_out):
    # Cast activations to bf16 in-kernel (VPU); works for f32 or bf16 input.
    x = x_ref[...].astype(jnp.bfloat16)
    gammas = gamma_ref[...]    # [4, 2d] f32
    betas = beta_ref[...]      # [4, 2d] f32

    def glu_layer(v_bf16, w, l):
        # One fused value+gate matmul: [rows, in] x [in, 2d], f32 accumulation.
        h = jnp.dot(v_bf16, w, preferred_element_type=jnp.float32)
        # Combined GBN over the full 2d features (per-feature, so semantics unchanged).
        h = _gbn(h, gammas[l:l + 1], betas[l:l + 1], n_vb, vbs)
        hv = h[:, :d_out]          # value half (slice starts at lane 0 - cheap)
        hg = h[:, d_out:]          # gate half (lane shift handled on the idle XLU slot)
        # GLU: value * sigmoid(gate); sigmoid via tanh = one EUP push, no divide.
        return hv * (0.5 * (jnp.tanh(0.5 * hg) + 1.0))

    # shared GLU_Block (first=True): layer 0 then residual layer 1
    h = glu_layer(x, w0_ref[...], 0)
    # residual layers: shared layer 1, then the two step-dependent layers (first=False)
    for l in range(1, 4):
        h = (h + glu_layer(h.astype(jnp.bfloat16), wr_ref[l - 1], l)) * SQRT_HALF

    o_ref[...] = h.astype(o_ref.dtype)


def _tpu_generation():
    """Returns (per-step VMEM budget in bytes, number of TensorCores sharing the grid)."""
    try:
        kind = jax.devices()[0].device_kind.lower()
    except Exception:
        kind = ""
    if "v5" in kind:
        return 16 << 20, 1
    if "v6" in kind:
        return 48 << 20, 1
    if "v7" in kind:
        return 24 << 20, 2
    return 24 << 20, 2   # unknown chip: conservative budget, assume grid may be core-split


def _bytes_per_row(feat, d):
    """Rough per-row VMEM bytes for one grid step (double-buffered I/O + f32 temps)."""
    return (2 * feat * 4          # double-buffered input tile (f32)
            + feat * 2            # in-kernel bf16 copy of the input tile
            + 2 * d * 4           # double-buffered output tile (f32)
            + 10 * (2 * d) * 4    # live f32 intermediates (h, GBN temps, GLU halves)
            + 2 * d * 2)          # bf16 residual copy between layers


def _choose_vb_per_block(n_vb_total, vbs, bytes_per_row, budget_bytes, num_tc,
                         max_rows=4096):
    """Largest divisor of n_vb_total whose row tile fits the VMEM budget.

    Single-TC chips may take the whole batch in one step (min grid = 1); on two-TC
    chips an even grid is preferred so both TensorCores get equal work.
    """
    divisors = [dv for dv in range(1, n_vb_total + 1) if n_vb_total % dv == 0]
    rows_of = lambda dv: dv * vbs
    fits = lambda dv: rows_of(dv) * bytes_per_row <= budget_bytes and rows_of(dv) <= max_rows
    aligned = lambda dv: rows_of(dv) % 8 == 0

    cand = [dv for dv in divisors if fits(dv) and aligned(dv)]
    if not cand:
        cand = [dv for dv in divisors if aligned(dv)]
        return min(cand) if cand else 1
    if num_tc >= 2:
        even = [dv for dv in cand if (n_vb_total // dv) % 2 == 0]
        if even:
            return max(even)
    return max(cand)


def feat_transformer(x, layers, *, output_dim, virtual_batch_size,
                     vb_per_block=None, out_dtype=jnp.float32):
    """layers: list of 4 tuples (W [in, 2*out], gamma [2*out], beta [2*out]), f32."""
    B, F = x.shape
    assert B % virtual_batch_size == 0, "batch must be a multiple of the virtual batch"
    n_vb_total = B // virtual_batch_size
    d = output_dim

    budget_bytes, num_tc = _tpu_generation()
    bpr = _bytes_per_row(F, d)
    if vb_per_block is None:
        vb_per_block = _choose_vb_per_block(n_vb_total, virtual_batch_size,
                                            bpr, budget_bytes, num_tc)
    assert n_vb_total % vb_per_block == 0
    rows = vb_per_block * virtual_batch_size
    assert rows % 8 == 0, (
        f"row tile {rows} must be a multiple of 8 (sublane tiling); use a "
        f"virtual_batch_size that is a multiple of 8 or pick vb_per_block accordingly")
    if virtual_batch_size % 8 != 0:
        warnings.warn("virtual_batch_size is not a multiple of 8; the GBN reshape will "
                      "force hidden relayouts", RuntimeWarning)
    if vb_per_block == 1 and n_vb_total > 1:
        warnings.warn("vb_per_block degraded to 1 (tiny-M regime); consider a batch with "
                      "a more composite number of virtual batches", RuntimeWarning)
    grid = (n_vb_total // vb_per_block,)

    (w0, g0, b0), (w1, g1, b1), (w2, g2, b2), (w3, g3, b3) = layers
    # Weights in bf16 for the MXU; value/gate halves stay fused (one N=2d matmul/layer).
    w0b = w0.astype(jnp.bfloat16)                               # [F, 2d]
    wr = jnp.stack([w1, w2, w3]).astype(jnp.bfloat16)           # [3, d, 2d]
    gammas = jnp.stack([g0, g1, g2, g3]).astype(jnp.float32)    # [4, 2d]
    betas = jnp.stack([b0, b1, b2, b3]).astype(jnp.float32)     # [4, 2d]

    weight_bytes = (w0b.size + wr.size) * 2 + (gammas.size + betas.size) * 4
    vmem_limit = int(min(64 << 20, max(32 << 20, 2 * (rows * bpr + 2 * weight_bytes))))

    kernel = functools.partial(feat_transformer_kernel,
                               n_vb=vb_per_block, vbs=virtual_batch_size, d_out=d)

    return pl.pallas_call(
        kernel,
        out_shape=jax.ShapeDtypeStruct((B, d), out_dtype),
        grid=grid,
        in_specs=[
            pl.BlockSpec((rows, F), lambda i: (i, 0)),
            pl.BlockSpec(w0b.shape, lambda i: (0, 0)),
            pl.BlockSpec(wr.shape, lambda i: (0, 0, 0)),
            pl.BlockSpec(gammas.shape, lambda i: (0, 0)),
            pl.BlockSpec(betas.shape, lambda i: (0, 0)),
        ],
        out_specs=pl.BlockSpec((rows, d), lambda i: (i, 0)),
        compiler_params=pltpu.CompilerParams(
            dimension_semantics=("parallel",),
            vmem_limit_bytes=vmem_limit),
    )(x, w0b, wr, gammas, betas)


def init_params(key, input_dim, output_dim, n_shared=2, n_step_dependent=2):
    """xavier_normal_-style init matching initialize_glu's gain (bias-free Linear)."""
    in_dims = ([input_dim] + [output_dim] * (n_shared - 1)      # shared block
               + [output_dim] * n_step_dependent)               # step-dependent block
    layers = []
    for in_dim in in_dims:
        key, sub = jax.random.split(key)
        fan_in, fan_out = in_dim, 2 * output_dim
        gain = math.sqrt((in_dim + 2 * output_dim) / math.sqrt(in_dim))
        std = gain * math.sqrt(2.0 / (fan_in + fan_out))
        w = jax.random.normal(sub, (in_dim, 2 * output_dim), jnp.float32) * std
        gamma = jnp.ones((2 * output_dim,), jnp.float32)   # BatchNorm1d default weight
        beta = jnp.zeros((2 * output_dim,), jnp.float32)   # BatchNorm1d default bias
        layers.append((w, gamma, beta))
    return layers


def feat_transformer_reference(x, layers, *, output_dim, virtual_batch_size):
    """Pure-JAX reference (same bf16-matmul precision as the kernel)."""
    def gbn(h, gamma, beta):
        hr = h.reshape(h.shape[0] // virtual_batch_size, virtual_batch_size, -1)
        m = hr.mean(axis=1, keepdims=True)
        v = ((hr - m) ** 2).mean(axis=1, keepdims=True)
        return ((hr - m) / jnp.sqrt(v + BN_EPS) * gamma + beta).reshape(h.shape)

    def glu_layer(v, w, gamma, beta):
        h = jnp.dot(v.astype(jnp.bfloat16), w.astype(jnp.bfloat16),
                    preferred_element_type=jnp.float32)
        h = gbn(h, gamma, beta)
        dd = h.shape[-1] // 2
        return h[:, :dd] * jax.nn.sigmoid(h[:, dd:])

    (w0, g0, b0), (w1, g1, b1), (w2, g2, b2), (w3, g3, b3) = layers
    v = glu_layer(x, w0, g0, b0)
    v = (v + glu_layer(v, w1, g1, b1)) * SQRT_HALF
    v = (v + glu_layer(v, w2, g2, b2)) * SQRT_HALF
    v = (v + glu_layer(v, w3, g3, b3)) * SQRT_HALF
    return v


if __name__ == "__main__":
    B = 256                # batch (32 virtual batches)
    INPUT_DIM = 32         # continuous + embedded categorical feature dim
    OUTPUT_DIM = 16        # step dim (TabNet n_d + n_a)
    VBS = 8                # virtual batch size (ghost batch norm)

    key = jax.random.PRNGKey(0)
    kx, kp = jax.random.split(key)
    x = jax.random.normal(kx, (B, INPUT_DIM), jnp.float32)
    layers = init_params(kp, INPUT_DIM, OUTPUT_DIM, n_shared=2, n_step_dependent=2)

    out = feat_transformer(x, layers, output_dim=OUTPUT_DIM, virtual_batch_size=VBS)
    out = jax.block_until_ready(out)

    ref = feat_transformer_reference(x, layers, output_dim=OUTPUT_DIM,
                                     virtual_batch_size=VBS)
    # Both sides use bf16 matmul inputs with f32 accumulation; tolerance covers the
    # small f32 epilogue differences (folded vs unfolded BN, tanh-form sigmoid).
    np.testing.assert_allclose(np.asarray(out), np.asarray(ref), rtol=1e-2, atol=1e-2)

    print("KERNEL_OK")
</pallas_src>

<mosaic_0001>
module attributes {stable_mosaic.version = 11 : i64} {
  func.func @feat_transformer_kernel(%arg0: i32, %arg1: memref<128x32xf32, #tpu.memory_space<vmem>>, %arg2: memref<32x32xbf16, #tpu.memory_space<vmem>>, %arg3: memref<3x16x32xbf16, #tpu.memory_space<vmem>>, %arg4: memref<4x32xf32, #tpu.memory_space<vmem>>, %arg5: memref<4x32xf32, #tpu.memory_space<vmem>>, %arg6: memref<128x16xf32, #tpu.memory_space<vmem>>) attributes {dimension_semantics = [#tpu.dimension_semantics<parallel>], iteration_bounds = array<i64: 2>, scalar_prefetch = 0 : i64, scratch_operands = 0 : i64, tpu.core_type = #tpu.core_type<tc>, window_params = [{transform_indices = @transform_0, window_bounds = array<i64: 128, 32>}, {pipeline_mode = #tpu.pipeline_mode<synchronous>, transform_indices = @transform_1, window_bounds = array<i64: 32, 32>}, {pipeline_mode = #tpu.pipeline_mode<synchronous>, transform_indices = @transform_2, window_bounds = array<i64: 3, 16, 32>}, {pipeline_mode = #tpu.pipeline_mode<synchronous>, transform_indices = @transform_3, window_bounds = array<i64: 4, 32>}, {pipeline_mode = #tpu.pipeline_mode<synchronous>, transform_indices = @transform_4, window_bounds = array<i64: 4, 32>}, {transform_indices = @transform_5, window_bounds = array<i64: 128, 16>}]} {
    %c0 = arith.constant 0 : index
    %c0_0 = arith.constant 0 : index
    %0 = vector.load %arg1[%c0, %c0_0] : memref<128x32xf32, #tpu.memory_space<vmem>>, vector<128x32xf32>
    %1 = arith.truncf %0 : vector<128x32xf32> to vector<128x32xbf16>
    %c0_1 = arith.constant 0 : index
    %c0_2 = arith.constant 0 : index
    %2 = vector.load %arg4[%c0_1, %c0_2] : memref<4x32xf32, #tpu.memory_space<vmem>>, vector<4x32xf32>
    %c0_3 = arith.constant 0 : index
    %c0_4 = arith.constant 0 : index
    %3 = vector.load %arg5[%c0_3, %c0_4] : memref<4x32xf32, #tpu.memory_space<vmem>>, vector<4x32xf32>
    %c0_5 = arith.constant 0 : index
    %c0_6 = arith.constant 0 : index
    %4 = vector.load %arg2[%c0_5, %c0_6] : memref<32x32xbf16, #tpu.memory_space<vmem>>, vector<32x32xbf16>
    %cst = arith.constant dense<0.000000e+00> : vector<128x32xf32>
    %5 = tpu.matmul %1, %4, %cst {dimension_numbers = #tpu.dot_dimension_numbers<[1], [0], [0], [1], [0, 0, 1, 1], [], []>} : vector<128x32xbf16>, vector<32x32xbf16>, vector<128x32xf32> -> vector<128x32xf32>
    %6 = vector.extract_strided_slice %2 {offsets = [0, 0], sizes = [1, 32], strides = [1, 1]} : vector<4x32xf32> to vector<1x32xf32>
    %7 = vector.extract_strided_slice %3 {offsets = [0, 0], sizes = [1, 32], strides = [1, 1]} : vector<4x32xf32> to vector<1x32xf32>
    %8 = vector.shape_cast %5 : vector<128x32xf32> to vector<16x8x32xf32>
    %cst_7 = arith.constant dense<0.000000e+00> : vector<16x32xf32>
    %9 = vector.multi_reduction <add>, %8, %cst_7 [1] : vector<16x8x32xf32> to vector<16x32xf32>
    %10 = vector.shape_cast %9 : vector<16x32xf32> to vector<16x1x32xf32>
    %cst_8 = arith.constant 8.000000e+00 : f32
    %11 = vector.broadcast %cst_8 : f32 to vector<16x1x32xf32>
    %12 = arith.divf %10, %11 : vector<16x1x32xf32>
    %13 = vector.broadcast %12 : vector<16x1x32xf32> to vector<16x8x32xf32>
    %14 = arith.subf %8, %13 : vector<16x8x32xf32>
    %15 = arith.mulf %14, %14 : vector<16x8x32xf32>
    %cst_9 = arith.constant dense<0.000000e+00> : vector<16x32xf32>
    %16 = vector.multi_reduction <add>, %15, %cst_9 [1] : vector<16x8x32xf32> to vector<16x32xf32>
    %17 = vector.shape_cast %16 : vector<16x32xf32> to vector<16x1x32xf32>
    %cst_10 = arith.constant 8.000000e+00 : f32
    %18 = vector.broadcast %cst_10 : f32 to vector<16x1x32xf32>
    %19 = arith.divf %17, %18 : vector<16x1x32xf32>
    %cst_11 = arith.constant 9.99999974E-6 : f32
    %20 = vector.broadcast %cst_11 : f32 to vector<16x1x32xf32>
    %21 = arith.addf %19, %20 : vector<16x1x32xf32>
    %22 = math.rsqrt %21 : vector<16x1x32xf32>
    %23 = vector.shape_cast %6 : vector<1x32xf32> to vector<1x1x32xf32>
    %24 = vector.broadcast %23 : vector<1x1x32xf32> to vector<16x1x32xf32>
    %25 = arith.mulf %24, %22 : vector<16x1x32xf32>
    %26 = arith.mulf %12, %25 : vector<16x1x32xf32>
    %27 = vector.shape_cast %7 : vector<1x32xf32> to vector<1x1x32xf32>
    %28 = vector.broadcast %27 : vector<1x1x32xf32> to vector<16x1x32xf32>
    %29 = arith.subf %28, %26 : vector<16x1x32xf32>
    %30 = vector.broadcast %25 : vector<16x1x32xf32> to vector<16x8x32xf32>
    %31 = arith.mulf %8, %30 : vector<16x8x32xf32>
    %32 = vector.broadcast %29 : vector<16x1x32xf32> to vector<16x8x32xf32>
    %33 = arith.addf %31, %32 : vector<16x8x32xf32>
    %34 = vector.shape_cast %33 : vector<16x8x32xf32> to vector<128x32xf32>
    %35 = vector.extract_strided_slice %34 {offsets = [0, 0], sizes = [128, 16], strides = [1, 1]} : vector<128x32xf32> to vector<128x16xf32>
    %36 = vector.extract_strided_slice %34 {offsets = [0, 16], sizes = [128, 16], strides = [1, 1]} : vector<128x32xf32> to vector<128x16xf32>
    %cst_12 = arith.constant 5.000000e-01 : f32
    %37 = vector.broadcast %cst_12 : f32 to vector<128x16xf32>
    %38 = arith.mulf %37, %36 : vector<128x16xf32>
    %39 = math.tanh %38 : vector<128x16xf32>
    %cst_13 = arith.constant 1.000000e+00 : f32
    %40 = vector.broadcast %cst_13 : f32 to vector<128x16xf32>
    %41 = arith.addf %39, %40 : vector<128x16xf32>
    %cst_14 = arith.constant 5.000000e-01 : f32
    %42 = vector.broadcast %cst_14 : f32 to vector<128x16xf32>
    %43 = arith.mulf %42, %41 : vector<128x16xf32>
    %44 = arith.mulf %35, %43 : vector<128x16xf32>
    %45 = arith.truncf %44 : vector<128x16xf32> to vector<128x16xbf16>
    %c0_15 = arith.constant 0 : index
    %c0_16 = arith.constant 0 : index
    %c0_17 = arith.constant 0 : index
    %46 = vector.load %arg3[%c0_15, %c0_16, %c0_17] : memref<3x16x32xbf16, #tpu.memory_space<vmem>>, vector<1x16x32xbf16>
    %47 = vector.shape_cast %46 : vector<1x16x32xbf16> to vector<16x32xbf16>
    %cst_18 = arith.constant dense<0.000000e+00> : vector<128x32xf32>
    %48 = tpu.matmul %45, %47, %cst_18 {dimension_numbers = #tpu.dot_dimension_numbers<[1], [0], [0], [1], [0, 0, 1, 1], [], []>} : vector<128x16xbf16>, vector<16x32xbf16>, vector<128x32xf32> -> vector<128x32xf32>
    %49 = vector.extract_strided_slice %2 {offsets = [1, 0], sizes = [1, 32], strides = [1, 1]} : vector<4x32xf32> to vector<1x32xf32>
    %50 = vector.extract_strided_slice %3 {offsets = [1, 0], sizes = [1, 32], strides = [1, 1]} : vector<4x32xf32> to vector<1x32xf32>
    %51 = vector.shape_cast %48 : vector<128x32xf32> to vector<16x8x32xf32>
    %cst_19 = arith.constant dense<0.000000e+00> : vector<16x32xf32>
    %52 = vector.multi_reduction <add>, %51, %cst_19 [1] : vector<16x8x32xf32> to vector<16x32xf32>
    %53 = vector.shape_cast %52 : vector<16x32xf32> to vector<16x1x32xf32>
    %cst_20 = arith.constant 8.000000e+00 : f32
    %54 = vector.broadcast %cst_20 : f32 to vector<16x1x32xf32>
    %55 = arith.divf %53, %54 : vector<16x1x32xf32>
    %56 = vector.broadcast %55 : vector<16x1x32xf32> to vector<16x8x32xf32>
    %57 = arith.subf %51, %56 : vector<16x8x32xf32>
    %58 = arith.mulf %57, %57 : vector<16x8x32xf32>
    %cst_21 = arith.constant dense<0.000000e+00> : vector<16x32xf32>
    %59 = vector.multi_reduction <add>, %58, %cst_21 [1] : vector<16x8x32xf32> to vector<16x32xf32>
    %60 = vector.shape_cast %59 : vector<16x32xf32> to vector<16x1x32xf32>
    %cst_22 = arith.constant 8.000000e+00 : f32
    %61 = vector.broadcast %cst_22 : f32 to vector<16x1x32xf32>
    %62 = arith.divf %60, %61 : vector<16x1x32xf32>
    %cst_23 = arith.constant 9.99999974E-6 : f32
    %63 = vector.broadcast %cst_23 : f32 to vector<16x1x32xf32>
    %64 = arith.addf %62, %63 : vector<16x1x32xf32>
    %65 = math.rsqrt %64 : vector<16x1x32xf32>
    %66 = vector.shape_cast %49 : vector<1x32xf32> to vector<1x1x32xf32>
    %67 = vector.broadcast %66 : vector<1x1x32xf32> to vector<16x1x32xf32>
    %68 = arith.mulf %67, %65 : vector<16x1x32xf32>
    %69 = arith.mulf %55, %68 : vector<16x1x32xf32>
    %70 = vector.shape_cast %50 : vector<1x32xf32> to vector<1x1x32xf32>
    %71 = vector.broadcast %70 : vector<1x1x32xf32> to vector<16x1x32xf32>
    %72 = arith.subf %71, %69 : vector<16x1x32xf32>
    %73 = vector.broadcast %68 : vector<16x1x32xf32> to vector<16x8x32xf32>
    %74 = arith.mulf %51, %73 : vector<16x8x32xf32>
    %75 = vector.broadcast %72 : vector<16x1x32xf32> to vector<16x8x32xf32>
    %76 = arith.addf %74, %75 : vector<16x8x32xf32>
    %77 = vector.shape_cast %76 : vector<16x8x32xf32> to vector<128x32xf32>
    %78 = vector.extract_strided_slice %77 {offsets = [0, 0], sizes = [128, 16], strides = [1, 1]} : vector<128x32xf32> to vector<128x16xf32>
    %79 = vector.extract_strided_slice %77 {offsets = [0, 16], sizes = [128, 16], strides = [1, 1]} : vector<128x32xf32> to vector<128x16xf32>
    %cst_24 = arith.constant 5.000000e-01 : f32
    %80 = vector.broadcast %cst_24 : f32 to vector<128x16xf32>
    %81 = arith.mulf %80, %79 : vector<128x16xf32>
    %82 = math.tanh %81 : vector<128x16xf32>
    %cst_25 = arith.constant 1.000000e+00 : f32
    %83 = vector.broadcast %cst_25 : f32 to vector<128x16xf32>
    %84 = arith.addf %82, %83 : vector<128x16xf32>
    %cst_26 = arith.constant 5.000000e-01 : f32
    %85 = vector.broadcast %cst_26 : f32 to vector<128x16xf32>
    %86 = arith.mulf %85, %84 : vector<128x16xf32>
    %87 = arith.mulf %78, %86 : vector<128x16xf32>
    %88 = arith.addf %44, %87 : vector<128x16xf32>
    %cst_27 = arith.constant 0.707106769 : f32
    %89 = vector.broadcast %cst_27 : f32 to vector<128x16xf32>
    %90 = arith.mulf %88, %89 : vector<128x16xf32>
    %91 = arith.truncf %90 : vector<128x16xf32> to vector<128x16xbf16>
    %c1 = arith.constant 1 : index
    %c0_28 = arith.constant 0 : index
    %c0_29 = arith.constant 0 : index
    %92 = vector.load %arg3[%c1, %c0_28, %c0_29] : memref<3x16x32xbf16, #tpu.memory_space<vmem>>, vector<1x16x32xbf16>
    %93 = vector.shape_cast %92 : vector<1x16x32xbf16> to vector<16x32xbf16>
    %cst_30 = arith.constant dense<0.000000e+00> : vector<128x32xf32>
    %94 = tpu.matmul %91, %93, %cst_30 {dimension_numbers = #tpu.dot_dimension_numbers<[1], [0], [0], [1], [0, 0, 1, 1], [], []>} : vector<128x16xbf16>, vector<16x32xbf16>, vector<128x32xf32> -> vector<128x32xf32>
    %95 = vector.extract_strided_slice %2 {offsets = [2, 0], sizes = [1, 32], strides = [1, 1]} : vector<4x32xf32> to vector<1x32xf32>
    %96 = vector.extract_strided_slice %3 {offsets = [2, 0], sizes = [1, 32], strides = [1, 1]} : vector<4x32xf32> to vector<1x32xf32>
    %97 = vector.shape_cast %94 : vector<128x32xf32> to vector<16x8x32xf32>
    %cst_31 = arith.constant dense<0.000000e+00> : vector<16x32xf32>
    %98 = vector.multi_reduction <add>, %97, %cst_31 [1] : vector<16x8x32xf32> to vector<16x32xf32>
    %99 = vector.shape_cast %98 : vector<16x32xf32> to vector<16x1x32xf32>
    %cst_32 = arith.constant 8.000000e+00 : f32
    %100 = vector.broadcast %cst_32 : f32 to vector<16x1x32xf32>
    %101 = arith.divf %99, %100 : vector<16x1x32xf32>
    %102 = vector.broadcast %101 : vector<16x1x32xf32> to vector<16x8x32xf32>
    %103 = arith.subf %97, %102 : vector<16x8x32xf32>
    %104 = arith.mulf %103, %103 : vector<16x8x32xf32>
    %cst_33 = arith.constant dense<0.000000e+00> : vector<16x32xf32>
    %105 = vector.multi_reduction <add>, %104, %cst_33 [1] : vector<16x8x32xf32> to vector<16x32xf32>
    %106 = vector.shape_cast %105 : vector<16x32xf32> to vector<16x1x32xf32>
    %cst_34 = arith.constant 8.000000e+00 : f32
    %107 = vector.broadcast %cst_34 : f32 to vector<16x1x32xf32>
    %108 = arith.divf %106, %107 : vector<16x1x32xf32>
    %cst_35 = arith.constant 9.99999974E-6 : f32
    %109 = vector.broadcast %cst_35 : f32 to vector<16x1x32xf32>
    %110 = arith.addf %108, %109 : vector<16x1x32xf32>
    %111 = math.rsqrt %110 : vector<16x1x32xf32>
    %112 = vector.shape_cast %95 : vector<1x32xf32> to vector<1x1x32xf32>
    %113 = vector.broadcast %112 : vector<1x1x32xf32> to vector<16x1x32xf32>
    %114 = arith.mulf %113, %111 : vector<16x1x32xf32>
    %115 = arith.mulf %101, %114 : vector<16x1x32xf32>
    %116 = vector.shape_cast %96 : vector<1x32xf32> to vector<1x1x32xf32>
    %117 = vector.broadcast %116 : vector<1x1x32xf32> to vector<16x1x32xf32>
    %118 = arith.subf %117, %115 : vector<16x1x32xf32>
    %119 = vector.broadcast %114 : vector<16x1x32xf32> to vector<16x8x32xf32>
    %120 = arith.mulf %97, %119 : vector<16x8x32xf32>
    %121 = vector.broadcast %118 : vector<16x1x32xf32> to vector<16x8x32xf32>
    %122 = arith.addf %120, %121 : vector<16x8x32xf32>
    %123 = vector.shape_cast %122 : vector<16x8x32xf32> to vector<128x32xf32>
    %124 = vector.extract_strided_slice %123 {offsets = [0, 0], sizes = [128, 16], strides = [1, 1]} : vector<128x32xf32> to vector<128x16xf32>
    %125 = vector.extract_strided_slice %123 {offsets = [0, 16], sizes = [128, 16], strides = [1, 1]} : vector<128x32xf32> to vector<128x16xf32>
    %cst_36 = arith.constant 5.000000e-01 : f32
    %126 = vector.broadcast %cst_36 : f32 to vector<128x16xf32>
    %127 = arith.mulf %126, %125 : vector<128x16xf32>
    %128 = math.tanh %127 : vector<128x16xf32>
    %cst_37 = arith.constant 1.000000e+00 : f32
    %129 = vector.broadcast %cst_37 : f32 to vector<128x16xf32>
    %130 = arith.addf %128, %129 : vector<128x16xf32>
    %cst_38 = arith.constant 5.000000e-01 : f32
    %131 = vector.broadcast %cst_38 : f32 to vector<128x16xf32>
    %132 = arith.mulf %131, %130 : vector<128x16xf32>
    %133 = arith.mulf %124, %132 : vector<128x16xf32>
    %134 = arith.addf %90, %133 : vector<128x16xf32>
    %cst_39 = arith.constant 0.707106769 : f32
    %135 = vector.broadcast %cst_39 : f32 to vector<128x16xf32>
    %136 = arith.mulf %134, %135 : vector<128x16xf32>
    %137 = arith.truncf %136 : vector<128x16xf32> to vector<128x16xbf16>
    %c2 = arith.constant 2 : index
    %c0_40 = arith.constant 0 : index
    %c0_41 = arith.constant 0 : index
    %138 = vector.load %arg3[%c2, %c0_40, %c0_41] : memref<3x16x32xbf16, #tpu.memory_space<vmem>>, vector<1x16x32xbf16>
    %139 = vector.shape_cast %138 : vector<1x16x32xbf16> to vector<16x32xbf16>
    %cst_42 = arith.constant dense<0.000000e+00> : vector<128x32xf32>
    %140 = tpu.matmul %137, %139, %cst_42 {dimension_numbers = #tpu.dot_dimension_numbers<[1], [0], [0], [1], [0, 0, 1, 1], [], []>} : vector<128x16xbf16>, vector<16x32xbf16>, vector<128x32xf32> -> vector<128x32xf32>
    %141 = vector.extract_strided_slice %2 {offsets = [3, 0], sizes = [1, 32], strides = [1, 1]} : vector<4x32xf32> to vector<1x32xf32>
    %142 = vector.extract_strided_slice %3 {offsets = [3, 0], sizes = [1, 32], strides = [1, 1]} : vector<4x32xf32> to vector<1x32xf32>
    %143 = vector.shape_cast %140 : vector<128x32xf32> to vector<16x8x32xf32>
    %cst_43 = arith.constant dense<0.000000e+00> : vector<16x32xf32>
    %144 = vector.multi_reduction <add>, %143, %cst_43 [1] : vector<16x8x32xf32> to vector<16x32xf32>
    %145 = vector.shape_cast %144 : vector<16x32xf32> to vector<16x1x32xf32>
    %cst_44 = arith.constant 8.000000e+00 : f32
    %146 = vector.broadcast %cst_44 : f32 to vector<16x1x32xf32>
    %147 = arith.divf %145, %146 : vector<16x1x32xf32>
    %148 = vector.broadcast %147 : vector<16x1x32xf32> to vector<16x8x32xf32>
    %149 = arith.subf %143, %148 : vector<16x8x32xf32>
    %150 = arith.mulf %149, %149 : vector<16x8x32xf32>
    %cst_45 = arith.constant dense<0.000000e+00> : vector<16x32xf32>
    %151 = vector.multi_reduction <add>, %150, %cst_45 [1] : vector<16x8x32xf32> to vector<16x32xf32>
    %152 = vector.shape_cast %151 : vector<16x32xf32> to vector<16x1x32xf32>
    %cst_46 = arith.constant 8.000000e+00 : f32
    %153 = vector.broadcast %cst_46 : f32 to vector<16x1x32xf32>
    %154 = arith.divf %152, %153 : vector<16x1x32xf32>
    %cst_47 = arith.constant 9.99999974E-6 : f32
    %155 = vector.broadcast %cst_47 : f32 to vector<16x1x32xf32>
    %156 = arith.addf %154, %155 : vector<16x1x32xf32>
    %157 = math.rsqrt %156 : vector<16x1x32xf32>
    %158 = vector.shape_cast %141 : vector<1x32xf32> to vector<1x1x32xf32>
    %159 = vector.broadcast %158 : vector<1x1x32xf32> to vector<16x1x32xf32>
    %160 = arith.mulf %159, %157 : vector<16x1x32xf32>
    %161 = arith.mulf %147, %160 : vector<16x1x32xf32>
    %162 = vector.shape_cast %142 : vector<1x32xf32> to vector<1x1x32xf32>
    %163 = vector.broadcast %162 : vector<1x1x32xf32> to vector<16x1x32xf32>
    %164 = arith.subf %163, %161 : vector<16x1x32xf32>
    %165 = vector.broadcast %160 : vector<16x1x32xf32> to vector<16x8x32xf32>
    %166 = arith.mulf %143, %165 : vector<16x8x32xf32>
    %167 = vector.broadcast %164 : vector<16x1x32xf32> to vector<16x8x32xf32>
    %168 = arith.addf %166, %167 : vector<16x8x32xf32>
    %169 = vector.shape_cast %168 : vector<16x8x32xf32> to vector<128x32xf32>
    %170 = vector.extract_strided_slice %169 {offsets = [0, 0], sizes = [128, 16], strides = [1, 1]} : vector<128x32xf32> to vector<128x16xf32>
    %171 = vector.extract_strided_slice %169 {offsets = [0, 16], sizes = [128, 16], strides = [1, 1]} : vector<128x32xf32> to vector<128x16xf32>
    %cst_48 = arith.constant 5.000000e-01 : f32
    %172 = vector.broadcast %cst_48 : f32 to vector<128x16xf32>
    %173 = arith.mulf %172, %171 : vector<128x16xf32>
    %174 = math.tanh %173 : vector<128x16xf32>
    %cst_49 = arith.constant 1.000000e+00 : f32
    %175 = vector.broadcast %cst_49 : f32 to vector<128x16xf32>
    %176 = arith.addf %174, %175 : vector<128x16xf32>
    %cst_50 = arith.constant 5.000000e-01 : f32
    %177 = vector.broadcast %cst_50 : f32 to vector<128x16xf32>
    %178 = arith.mulf %177, %176 : vector<128x16xf32>
    %179 = arith.mulf %170, %178 : vector<128x16xf32>
    %180 = arith.addf %136, %179 : vector<128x16xf32>
    %cst_51 = arith.constant 0.707106769 : f32
    %181 = vector.broadcast %cst_51 : f32 to vector<128x16xf32>
    %182 = arith.mulf %180, %181 : vector<128x16xf32>
    %c0_52 = arith.constant 0 : index
    %c0_53 = arith.constant 0 : index
    %183 = vector.load %arg6[%c0_52, %c0_53] : memref<128x16xf32, #tpu.memory_space<vmem>>, vector<128x16xf32>
    tpu.vector_store %arg6[%c0_52, %c0_53], %182 {strides = array<i32>} : memref<128x16xf32, #tpu.memory_space<vmem>>, vector<128x16xf32>,
    return
  }
  func.func @transform_0(%arg0: i32) -> (i32, i32) {
    %c0_i32 = arith.constant 0 : i32
    %c0_i32_0 = arith.constant 0 : i32
    return %arg0, %c0_i32 : i32, i32
  }
  func.func @transform_1(%arg0: i32) -> (i32, i32) {
    %c0_i32 = arith.constant 0 : i32
    %c0_i32_0 = arith.constant 0 : i32
    %c0_i32_1 = arith.constant 0 : i32
    return %c0_i32, %c0_i32_0 : i32, i32
  }
  func.func @transform_2(%arg0: i32) -> (i32, i32, i32) {
    %c0_i32 = arith.constant 0 : i32
    %c0_i32_0 = arith.constant 0 : i32
    %c0_i32_1 = arith.constant 0 : i32
    %c0_i32_2 = arith.constant 0 : i32
    return %c0_i32, %c0_i32_0, %c0_i32_1 : i32, i32, i32
  }
  func.func @transform_3(%arg0: i32) -> (i32, i32) {
    %c0_i32 = arith.constant 0 : i32
    %c0_i32_0 = arith.constant 0 : i32
    %c0_i32_1 = arith.constant 0 : i32
    return %c0_i32, %c0_i32_0 : i32, i32
  }
  func.func @transform_4(%arg0: i32) -> (i32, i32) {
    %c0_i32 = arith.constant 0 : i32
    %c0_i32_0 = arith.constant 0 : i32
    %c0_i32_1 = arith.constant 0 : i32
    return %c0_i32, %c0_i32_0 : i32, i32
  }
  func.func @transform_5(%arg0: i32) -> (i32, i32) {
    %c0_i32 = arith.constant 0 : i32
    %c0_i32_0 = arith.constant 0 : i32
    return %arg0, %c0_i32 : i32, i32
  }
}

</mosaic_0001>

<bundles_post_ra>
// kernel: tpu_custom_call.1
= control target key start
LH: loop header
LB: loop body
LE: loop exit
PB: predicated region body
PF: predicated region fallthrough
CT: control target
= control target key end

     0   :  { %s4142_s18 = smov 0   ;;  %s5876_s0 = inlined_call_operand.vmem [shape: f32[256,32], index: 0, kind: input, shape index: {}]   ;;  %s5877_s1 = inlined_call_operand.vmem [shape: bf16[32,32], index: 1, kind: input, shape index: {}]   ;;  %s5878_s2 = inlined_call_operand.vmem [shape: bf16[3,16,32], index: 2, kind: input, shape index: {}]   ;;  %s5879_s3 = inlined_call_operand.vmem [shape: f32[4,32], index: 3, kind: input, shape index: {}]   ;;  %s5880_s4 = inlined_call_operand.vmem [shape: f32[4,32], index: 4, kind: input, shape index: {}]   ;;  %s5881_s5 = inlined_call_operand.vmem [shape: f32[256,16], index: 5, kind: output, shape index: {}]  }
   0x1 LB: > { %s3664_s19 = sadd.s32 4294967295, %s4109_s18   ;;  %p3668_p0 = scmp.ge.s32.totalorder %s4109_s18, 1  ;;  %s4109_s18 = sphi %s4142_s18, %s15_s18  }
   0x2   : > { %p188_p1 = scmp.lt.s32.totalorder %s4109_s18, 3 }
   0x4   : > { %p189_p2 = pnand %p3668_p0, %p188_p1 }
   0x6   : > { %192 = sbr.rel (%p189_p2) target bundleno = 1864 (0x748), region = 40 }
   0xd   : > { %v3836_v0 = vld [vmem:[%s5877_s1] sm:$0xff]   ;;  %s3669_s22 = sshll.u32 %s3664_s19, 4  ;;  %v3837_v1 = vld [vmem:[%s5877_s1 + $0x8] sm:$0xff]   ;;  %vm271_vm0 = vcmask 261120   ;;  %v762_v38 = vlaneseq  ;;  %s4111_s8 = smov 112   ;;  %vm1082_vm1 = vcmask 130048  }
   0xe   : > { %p217_p3 = scmp.lt.s32.totalorder %s3669_s22, 31  ;;  %3753 = vmatprep.subr.bf16.mxu0 %v3836_v0 }
   0xf   : > { %3754 = vmatpush3.bf16.msra.mxu0 %v3836_v0  ;;  %v4208_v48 = vshrl.u32 %v762_v38, 7 }
  0x10   : > { %s5963_s22 = smov (!%p217_p3, %s3669_s22), 31  ;;  %3755 = vmatprep.subr.bf16.mxu0 %v3837_v1 }
  0x11   : > { %s3670_s25 = sshll.u32 %s5963_s22, 3  ;;  %5909 = vst [vmem:[#allocation2_spill] sm:$0xff] %v4208_v48 }
  0x12   : > { %s4164_s28 = scalar_lea.vmem %s5876_s0, %s3670_s25  ;;  %s5809_s7 = scalar_lea.vmem %s5881_s5, %s3670_s25 }
  0x13   : > { %3756 = vmatpush3.bf16.msra.mxu0 %v3837_v1  ;;  %v229_v2 = vld [vmem:[%s4164_s28] sm:$0xff]  ;;  %v230_v3 = vld [vmem:[%s4164_s28 + $0x8] sm:$0xff]  ;;  %v231_v4 = vld [vmem:[%s4164_s28 + $0x10] sm:$0xff] }
  0x14   : > { %v245_v5 = vpack.c.bf16 %v230_v3, %v229_v2  ;;  %v232_v6 = vld [vmem:[%s4164_s28 + $0x18] sm:$0xff]  ;;  %v233_v7 = vld [vmem:[%s4164_s28 + $0x20] sm:$0xff]  ;;  %v234_v8 = vld [vmem:[%s4164_s28 + $0x28] sm:$0xff] }
  0x15   : > { %v246_v9 = vpack.c.bf16 %v232_v6, %v231_v4  ;;  %v247_v10 = vpack.c.bf16 %v234_v8, %v233_v7  ;;  %v235_v11 = vld [vmem:[%s4164_s28 + $0x30] sm:$0xff]  ;;  %v236_v12 = vld [vmem:[%s4164_s28 + $0x38] sm:$0xff]  ;;  %v237_v13 = vld [vmem:[%s4164_s28 + $0x40] sm:$0xff] }
  0x16   : > { %3757 = vmatprep.mubr.msk.bf16.mxu0 %vm271_vm0, %v245_v5  ;;  %v238_v14 = vld [vmem:[%s4164_s28 + $0x48] sm:$0xff]  ;;  %v248_v15 = vpack.c.bf16 %v236_v12, %v235_v11  ;;  %v239_v17 = vld [vmem:[%s4164_s28 + $0x50] sm:$0xff]  ;;  %v240_v18 = vld [vmem:[%s4164_s28 + $0x58] sm:$0xff] }
  0x17   : > { %3758 = vmatmul.mubr.msk.bf16.vlgmr.msra.gmra.mrb[0].mxu0 %vm271_vm0, %v246_v9  ;;  %v249_v16 = vpack.c.bf16 %v238_v14, %v237_v13  ;;  %v241_v19 = vld [vmem:[%s4164_s28 + $0x60] sm:$0xff]  ;;  %v242_v20 = vld [vmem:[%s4164_s28 + $0x68] sm:$0xff]  ;;  %v250_v21 = vpack.c.bf16 %v240_v18, %v239_v17  ;;  %v243_v23 = vld [vmem:[%s4164_s28 + $0x70] sm:$0xff] }
  0x18   : > { %3761 = vmatprep.mubr.msk.bf16.mxu0 %vm271_vm0, %v247_v10  ;;  %v251_v22 = vpack.c.bf16 %v242_v20, %v241_v19  ;;  %v244_v24 = vld [vmem:[%s4164_s28 + $0x78] sm:$0xff] }
  0x19   : > { %v252_v25 = vpack.c.bf16 %v244_v24, %v243_v23 }
  0x1f   : > { %3762 = vmatmul.mubr.msk.bf16.gmra.mrb[4].mxu0 %vm271_vm0, %v248_v15 }
  0x20   : > { %3765 = vmatprep.mubr.msk.bf16.mxu0 %vm271_vm0, %v249_v16 }
  0x27   : > { %3766 = vmatmul.mubr.msk.bf16.gmra.mrb[8].mxu0 %vm271_vm0, %v250_v21 }
  0x28   : > { %3769 = vmatprep.mubr.msk.bf16.mxu0 %vm271_vm0, %v251_v22 }
  0x2f   : > { %3770 = vmatmul.mubr.msk.bf16.gmra.mrb[12].mxu0 %vm271_vm0, %v252_v25 }
  0xea   : > { %v4190_v26 = vpop.f32.mrb[0].mxu0 }
  0xeb   : > { %v407_v27 = vsel %vm271_vm0, %v4190_v26, 0.0  ;;  %v4194_v28 = vpop.f32.mrb[1].mxu0 }
  0xec   : > { %v408_v29 = vrot.slane %v407_v27, 4  ;;  %v393_v30 = vsel %vm271_vm0, %v4194_v28, 0.0  ;;  %v4198_v31 = vpop.f32.mrb[2].mxu0 }
  0xed   : > { %v394_v32 = vrot.slane %v393_v30, 4  ;;  %v414_v33 = vsel %vm271_vm0, %v4198_v31, 0.0  ;;  %v4202_v34 = vpop.f32.mrb[3].mxu0 }
  0xee   : > { %v409_v35 = vadd.f32 %v408_v29, %v407_v27  ;;  %v415_v36 = vrot.slane %v414_v33, 4  ;;  %v400_v37 = vsel %vm271_vm0, %v4202_v34, 0.0 }
  0xef   : > { %v395_v39 = vadd.f32 %v394_v32, %v393_v30  ;;  %v401_v40 = vrot.slane %v400_v37, 4 }
  0xf0   : > { %v410_v41 = vrot.slane %v409_v35, 2  ;;  %v416_v42 = vadd.f32 %v415_v36, %v414_v33 }
  0xf1   : > { %v396_v43 = vrot.slane %v395_v39, 2  ;;  %v402_v44 = vadd.f32 %v401_v40, %v400_v37 }
  0xf2   : > { %v411_v45 = vadd.f32 %v410_v41, %v409_v35  ;;  %v417_v46 = vrot.slane %v416_v42, 2  ;;  %v4206_v47 = vpop.f32.mrb[4].mxu0 }
  0xf3   : > { %v397_v49 = vadd.f32 %v396_v43, %v395_v39  ;;  %v403_v50 = vrot.slane %v402_v44, 2  ;;  %v435_v51 = vsel %vm271_vm0, %v4206_v47, 0.0  ;;  %v4212_v52 = vpop.f32.mrb[5].mxu0 }
  0xf4   : > { %v412_v53 = vrot.slane %v411_v45, 1  ;;  %v418_v54 = vadd.f32 %v417_v46, %v416_v42  ;;  %v436_v55 = vrot.slane %v435_v51, 4  ;;  %v421_v56 = vsel %vm271_vm0, %v4212_v52, 0.0  ;;  %v4216_v57 = vpop.f32.mrb[6].mxu0 }
  0xf5   : > { %v398_v58 = vrot.slane %v397_v49, 1  ;;  %v404_v59 = vadd.f32 %v403_v50, %v402_v44  ;;  %v422_v60 = vrot.slane %v421_v56, 4  ;;  %v442_v61 = vsel %vm271_vm0, %v4216_v57, 0.0  ;;  %v4220_v62 = vpop.f32.mrb[7].mxu0 }
  0xf6   : > { %v413_v63 = vadd.f32 %v412_v53, %v411_v45  ;;  %v419_v0 = vrot.slane %v418_v54, 1  ;;  %v437_v1 = vadd.f32 %v436_v55, %v435_v51  ;;  %v443_v2 = vrot.slane %v442_v61, 4 }
  0xf7   : > { %v399_v3 = vadd.f32 %v398_v58, %v397_v49  ;;  %v405_v4 = vrot.slane %v404_v59, 1  ;;  %v423_v5 = vadd.f32 %v422_v60, %v421_v56  ;;  %v428_v6 = vsel %vm271_vm0, %v4220_v62, 0.0 }
  0xf8   : > { %v4224_v7 = vmul.f32 0.125, %v413_v63  ;;  %v420_v8 = vadd.f32 %v419_v0, %v418_v54  ;;  %v438_v9 = vrot.slane %v437_v1, 2  ;;  %v444_v10 = vadd.f32 %v443_v2, %v442_v61 }
  0xf9   : > { %v4226_v11 = vmul.f32 0.125, %v399_v3  ;;  %v406_v12 = vadd.f32 %v405_v4, %v404_v59  ;;  %v424_v13 = vrot.slane %v423_v5, 2  ;;  %v429_v14 = vrot.slane %v428_v6, 4 }
  0xfa   : > { %v524_v15 = vsub.f32 %v4190_v26, %v4224_v7  ;;  %v4230_v16 = vmul.f32 0.125, %v420_v8  ;;  %v439_v17 = vadd.f32 %v438_v9, %v437_v1  ;;  %v445_v18 = vrot.slane %v444_v10, 2  ;;  %v4232_v19 = vpop.f32.mrb[8].mxu0 }
  0xfb   : > { %v522_v20 = vsub.f32 %v4194_v28, %v4226_v11  ;;  %v4236_v21 = vmul.f32 0.125, %v406_v12  ;;  %v425_v22 = vadd.f32 %v424_v13, %v423_v5  ;;  %v430_v23 = vadd.f32 %v429_v14, %v428_v6  ;;  %v4238_v24 = vpop.f32.mrb[9].mxu0 }
  0xfc   : > { %v540_v25 = vmul.f32 %v524_v15, %v524_v15  ;;  %v525_v27 = vsub.f32 %v4198_v31, %v4230_v16  ;;  %v440_v29 = vrot.slane %v439_v17, 1  ;;  %v446_v30 = vadd.f32 %v445_v18, %v444_v10  ;;  %v4242_v32 = vpop.f32.mrb[10].mxu0 }
  0xfd   : > { %v538_v33 = vmul.f32 %v522_v20, %v522_v20  ;;  %v523_v35 = vsub.f32 %v4202_v34, %v4236_v21  ;;  %v426_v36 = vrot.slane %v425_v22, 1  ;;  %v431_v37 = vrot.slane %v430_v23, 2  ;;  %v4246_v38 = vpop.f32.mrb[11].mxu0 }
  0xfe   : > { %v568_v39 = vsel %vm271_vm0, %v540_v25, 0.0  ;;  %v541_v40 = vmul.f32 %v525_v27, %v525_v27  ;;  %v441_v41 = vadd.f32 %v440_v29, %v439_v17  ;;  %v447_v42 = vrot.slane %v446_v30, 1 }
  0xff   : > { %v569_v43 = vrot.slane %v568_v39, 4  ;;  %v554_v44 = vsel %vm271_vm0, %v538_v33, 0.0  ;;  %v539_v45 = vmul.f32 %v523_v35, %v523_v35  ;;  %v427_v46 = vadd.f32 %v426_v36, %v425_v22 }
 0x100   : > { %v555_v49 = vrot.slane %v554_v44, 4  ;;  %v575_v50 = vsel %vm271_vm0, %v541_v40, 0.0  ;;  %v4251_v51 = vmul.f32 0.125, %v441_v41  ;;  %v448_v53 = vadd.f32 %v447_v42, %v446_v30 }
 0x101   : > { %v570_v54 = vadd.f32 %v569_v43, %v568_v39  ;;  %v576_v55 = vrot.slane %v575_v50, 4  ;;  %v561_v56 = vsel %vm271_vm0, %v539_v45, 0.0  ;;  %v4254_v58 = vmul.f32 0.125, %v427_v46 }
 0x102   : > { %v556_v59 = vadd.f32 %v555_v49, %v554_v44  ;;  %v562_v60 = vrot.slane %v561_v56, 4  ;;  %v528_v61 = vsub.f32 %v4206_v47, %v4251_v51  ;;  %v4258_v63 = vmul.f32 0.125, %v448_v53  ;;  %v4260_v0 = vpop.f32.mrb[12].mxu0 }
 0x103   : > { %v571_v1 = vrot.slane %v570_v54, 2  ;;  %v577_v2 = vadd.f32 %v576_v55, %v575_v50  ;;  %v526_v3 = vsub.f32 %v4212_v52, %v4254_v58  ;;  %v432_v4 = vadd.f32 %v431_v37, %v430_v23  ;;  %v4264_v5 = vpop.f32.mrb[13].mxu0 }
 0x104   : > { %v557_v6 = vrot.slane %v556_v59, 2  ;;  %v563_v8 = vadd.f32 %v562_v60, %v561_v56  ;;  %v544_v9 = vmul.f32 %v528_v61, %v528_v61  ;;  %v529_v10 = vsub.f32 %v4216_v57, %v4258_v63  ;;  %v4268_v12 = vpop.f32.mrb[14].mxu0 }
 0x105   : > { %v572_v13 = vadd.f32 %v571_v1, %v570_v54  ;;  %v578_v14 = vrot.slane %v577_v2, 2  ;;  %v542_v15 = vmul.f32 %v526_v3, %v526_v3  ;;  %v433_v17 = vrot.slane %v432_v4, 1  ;;  %v4270_v18 = vpop.f32.mrb[15].mxu0 }
 0x106   : > { %v558_v20 = vadd.f32 %v557_v6, %v556_v59  ;;  %v564_v22 = vrot.slane %v563_v8, 2  ;;  %v596_v23 = vsel %vm271_vm0, %v544_v9, 0.0  ;;  %v545_v25 = vmul.f32 %v529_v10, %v529_v10 }
 0x107   : > { %v573_v27 = vrot.slane %v572_v13, 1  ;;  %v579_v29 = vadd.f32 %v578_v14, %v577_v2  ;;  %v597_v30 = vrot.slane %v596_v23, 4  ;;  %v582_v33 = vsel %vm271_vm0, %v542_v15, 0.0 }
 0x108   : > { %v559_v35 = vrot.slane %v558_v20, 1  ;;  %v565_v36 = vadd.f32 %v564_v22, %v563_v8  ;;  %v583_v37 = vrot.slane %v582_v33, 4  ;;  %v603_v39 = vsel %vm271_vm0, %v545_v25, 0.0 }
 0x109   : > { %v574_v40 = vadd.f32 %v573_v27, %v572_v13  ;;  %v580_v41 = vrot.slane %v579_v29, 1  ;;  %v598_v42 = vadd.f32 %v597_v30, %v596_v23  ;;  %v604_v43 = vrot.slane %v603_v39, 4 }
 0x10a   : > { %v560_v44 = vadd.f32 %v559_v35, %v558_v20  ;;  %v566_v45 = vrot.slane %v565_v36, 1  ;;  %v584_v46 = vadd.f32 %v583_v37, %v582_v33  ;;  %v434_v49 = vadd.f32 %v433_v17, %v432_v4 }
 0x10b   : > { %v668_v50 = vmul.f32 0.125, %v574_v40  ;;  %v581_v53 = vadd.f32 %v580_v41, %v579_v29  ;;  %v599_v54 = vrot.slane %v598_v42, 2  ;;  %v605_v55 = vadd.f32 %v604_v43, %v603_v39 }
 0x10c   : > { %v666_v56 = vmul.f32 0.125, %v560_v44  ;;  %v567_v59 = vadd.f32 %v566_v45, %v565_v36  ;;  %v585_v60 = vrot.slane %v584_v46, 2  ;;  %v4275_v61 = vmul.f32 0.125, %v434_v49 }
 0x10d   : > { %v684_v1 = vadd.f32 1e-05, %v668_v50  ;;  %v669_v2 = vmul.f32 0.125, %v581_v53  ;;  %v600_v3 = vadd.f32 %v599_v54, %v598_v42  ;;  %v606_v6 = vrot.slane %v605_v55, 2 }
 0x10e   : > { %v682_v8 = vadd.f32 1e-05, %v666_v56  ;;  %v667_v9 = vmul.f32 0.125, %v567_v59  ;;  %v586_v10 = vadd.f32 %v585_v60, %v584_v46  ;;  %v527_v13 = vsub.f32 %v4220_v62, %v4275_v61 }
 0x10f   : > { %3841 = vrsqrt.f32 %v684_v1  ;;  %v685_v4 = vadd.f32 1e-05, %v669_v2  ;;  %v601_v14 = vrot.slane %v600_v3, 1  ;;  %v607_v15 = vadd.f32 %v606_v6, %v605_v55  ;;  %v4289_v55 = vld [vmem:[%s5879_s3] sm:$0xf] }
 0x110   : > { %3843 = vrsqrt.f32 %v682_v8  ;;  %v683_v17 = vadd.f32 1e-05, %v667_v9  ;;  %v587_v20 = vrot.slane %v586_v10, 1  ;;  %v543_v22 = vmul.f32 %v527_v13, %v527_v13 }
 0x111   : > { %3845 = vrsqrt.f32 %v685_v4  ;;  %v602_v23 = vadd.f32 %v601_v14, %v600_v3  ;;  %v608_v25 = vrot.slane %v607_v15, 1  ;;  %v463_v27 = vsel %vm271_vm0, %v4232_v19, 0.0 }
 0x112   : > { %3847 = vrsqrt.f32 %v683_v17  ;;  %v588_v29 = vadd.f32 %v587_v20, %v586_v10  ;;  %v589_v30 = vsel %vm271_vm0, %v543_v22, 0.0  ;;  %v464_v33 = vrot.slane %v463_v27, 4 }
 0x113   : > { %v672_v35 = vmul.f32 0.125, %v602_v23  ;;  %v609_v36 = vadd.f32 %v608_v25, %v607_v15  ;;  %v590_v37 = vrot.slane %v589_v30, 4  ;;  %v449_v39 = vsel %vm271_vm0, %v4238_v24, 0.0  ;;  %v4300_v15 = vld [vmem:[%s5880_s4] sm:$0xf] }
 0x114   : > { %v670_v40 = vmul.f32 0.125, %v588_v29  ;;  %v465_v41 = vadd.f32 %v464_v33, %v463_v27  ;;  %v450_v42 = vrot.slane %v449_v39, 4  ;;  %v470_v43 = vsel %vm271_vm0, %v4242_v32, 0.0 }
 0x115   : > { %v688_v44 = vadd.f32 1e-05, %v672_v35  ;;  %v673_v45 = vmul.f32 0.125, %v609_v36  ;;  %v591_v46 = vadd.f32 %v590_v37, %v589_v30  ;;  %v471_v49 = vrot.slane %v470_v43, 4 }
 0x116   : > { %v686_v50 = vadd.f32 1e-05, %v670_v40  ;;  %v466_v53 = vrot.slane %v465_v41, 2  ;;  %v451_v54 = vadd.f32 %v450_v42, %v449_v39  ;;  %v4292_v1 = vsub.s32 0, %v4208_v48 }
 0x117   : > { %3849 = vrsqrt.f32 %v688_v44  ;;  %v689_v56 = vadd.f32 1e-05, %v673_v45  ;;  %v592_v59 = vrot.slane %v591_v46, 2  ;;  %v472_v60 = vadd.f32 %v471_v49, %v470_v43 }
 0x118   : > { %3851 = vrsqrt.f32 %v686_v50  ;;  %v467_v2 = vadd.f32 %v466_v53, %v465_v41  ;;  %v456_v3 = vsel %vm271_vm0, %v4246_v38, 0.0  ;;  %v452_v4 = vrot.slane %v451_v54, 2 }
 0x119   : > { %v3842_v6 = vpop.eup %3841  ;;  %3853 = vrsqrt.f32 %v689_v56  ;;  %v593_v8 = vadd.f32 %v592_v59, %v591_v46  ;;  %v473_v22 = vrot.slane %v472_v60, 2  ;;  %v457_v23 = vrot.slane %v456_v3, 4 }
 0x11a   : > { %v3844_v9 = vpop.eup %3843  ;;  %v716_v10 = vmul.f32 %v3842_v6, %v4289_v55  ;;  %v468_v13 = vrot.slane %v467_v2, 1  ;;  %v4308_v33 = vsel %vm271_vm0, %v4260_v0, 0.0  ;;  %v453_v42 = vadd.f32 %v452_v4, %v451_v54 }
 0x11b   : > { %v3846_v14 = vpop.eup %3845  ;;  %v714_v17 = vmul.f32 %v3844_v9, %v4289_v55  ;;  %v594_v20 = vrot.slane %v593_v8, 1  ;;  %v458_v46 = vadd.f32 %v457_v23, %v456_v3  ;;  %v474_v53 = vadd.f32 %v473_v22, %v472_v60 }
 0x11c   : > { %v3848_v25 = vpop.eup %3847  ;;  %v732_v27 = vmul.f32 %v716_v10, %v4224_v7  ;;  %v773_v29 = vrot.slane %v716_v10, %v4292_v1  ;;  %v717_v30 = vmul.f32 %v3846_v14, %v4289_v55  ;;  %v469_v39 = vadd.f32 %v468_v13, %v467_v2 }
 0x11d   : > { %v730_v35 = vmul.f32 %v714_v17, %v4226_v11  ;;  %v715_v36 = vmul.f32 %v3848_v25, %v4289_v55  ;;  %v595_v37 = vadd.f32 %v594_v20, %v593_v8  ;;  %v765_v11 = vrot.slane %v714_v17, %v4292_v1 }
 0x11e   : > { %v748_v40 = vsub.f32 %v4300_v15, %v732_v27  ;;  %v733_v41 = vmul.f32 %v717_v30, %v4230_v16  ;;  %v777_v7 = vrot.slane %v717_v30, %v4292_v1  ;;  %v828_v59 = vmul.f32 %v4190_v26, %v773_v29 }
 0x11f   : > { %v746_v43 = vsub.f32 %v4300_v15, %v730_v35  ;;  %v731_v44 = vmul.f32 %v715_v36, %v4236_v21  ;;  %v769_v45 = vrot.slane %v715_v36, %v4292_v1  ;;  %v671_v50 = vmul.f32 0.125, %v595_v37 }
 0x120   : > { %v749_v49 = vsub.f32 %v4300_v15, %v733_v41  ;;  %v853_v16 = vrot.slane %v748_v40, %v4292_v1  ;;  %v4323_v2 = vmul.f32 0.125, %v469_v39  ;;  %v829_v21 = vmul.f32 %v4198_v31, %v777_v7 }
 0x121   : > { %v3850_v56 = vpop.eup %3849  ;;  %v747_v54 = vsub.f32 %v4300_v15, %v731_v44  ;;  %v687_v9 = vadd.f32 1e-05, %v671_v50  ;;  %v845_v60 = vrot.slane %v746_v43, %v4292_v1  ;;  %v827_v13 = vmul.f32 %v769_v45, %v4202_v34 }
 0x122   : > { %v3852_v6 = vpop.eup %3851  ;;  %v857_v3 = vrot.slane %v749_v49, %v4292_v1  ;;  %v720_v8 = vmul.f32 %v3850_v56, %v4289_v55  ;;  %v532_v20 = vsub.f32 %v4232_v19, %v4323_v2  ;;  %v826_v22 = vmul.f32 %v765_v11, %v4194_v28 }
 0x123   : > { %v3854_v10 = vpop.eup %3853  ;;  %v849_v26 = vrot.slane %v747_v54, %v4292_v1  ;;  %v718_v4 = vmul.f32 %v3852_v6, %v4289_v55  ;;  %3855 = vrsqrt.f32 %v687_v9  ;;  %v492_v29 = vrot.slane %v4308_v33, 4 }
 0x124   : > { %v4332_v14 = vadd.f32 %v857_v3, %v829_v21  ;;  %v736_v17 = vmul.f32 %v720_v8, %v4251_v51  ;;  %v721_v31 = vmul.f32 %v3854_v10, %v4289_v55  ;;  %v789_v23 = vrot.slane %v720_v8, %v4292_v1 }
 0x125   : > { %v734_v25 = vmul.f32 %v718_v4, %v4254_v58  ;;  %v4341_v34 = vadd.f32 %v849_v26, %v827_v13  ;;  %v4345_v30 = vadd.f32 %v853_v16, %v828_v59  ;;  %v4347_v51 = vadd.f32 %v845_v60, %v826_v22 }
 0x126   : > { %v752_v27 = vsub.f32 %v4300_v15, %v736_v17  ;;  %v4350_v35 = vmul.f32 0.5, %v4332_v14  ;;  %v781_v28 = vrot.slane %v718_v4, %v4292_v1  ;;  %v737_v58 = vmul.f32 %v721_v31, %v4258_v63 }
 0x127   : > { %v750_v36 = vsub.f32 %v4300_v15, %v734_v25  ;;  %v548_v37 = vmul.f32 %v532_v20, %v532_v20  ;;  %v454_v39 = vrot.slane %v453_v42, 1  ;;  %v832_v40 = vmul.f32 %v4206_v47, %v789_v23 }
 0x128   : > { %v793_v41 = vrot.slane %v721_v31, %v4292_v1  ;;  %v475_v7 = vrot.slane %v474_v53, 1  ;;  %v459_v43 = vrot.slane %v458_v46, 2  ;;  %v4358_v44 = vmul.f32 0.5, %v4341_v34 }
 0x129   : > { %v869_v45 = vrot.slane %v752_v27, %v4292_v1  ;;  %v624_v11 = vsel %vm271_vm0, %v548_v37, 0.0  ;;  %v455_v49 = vadd.f32 %v454_v39, %v453_v42  ;;  %v830_v50 = vmul.f32 %v781_v28, %v4212_v52 }
 0x12a   : > { %v625_v56 = vrot.slane %v624_v11, 4  ;;  %v476_v63 = vadd.f32 %v475_v7, %v474_v53  ;;  %v460_v59 = vadd.f32 %v459_v43, %v458_v46  ;;  %v861_v16 = vrot.slane %v750_v36, %v4292_v1 }
 0x12b   : > { %v753_v47 = vsub.f32 %v4300_v15, %v737_v58  ;;  %v4365_v54 = vmul.f32 0.125, %v455_v49  ;;  %v493_v6 = vadd.f32 %v492_v29, %v4308_v33  ;;  %v4369_v21 = vmul.f32 %v4216_v57, %v793_v41 }
 0x12c   : > { %v626_v3 = vadd.f32 %v625_v56, %v624_v11  ;;  %v4371_v8 = vmul.f32 0.125, %v476_v63  ;;  %v461_v42 = vrot.slane %v460_v59, 1  ;;  %v4373_v9 = vadd.f32 %v869_v45, %v832_v40 }
 0x12d   : > { %v530_v52 = vsub.f32 %v4238_v24, %v4365_v54  ;;  %v494_v46 = vrot.slane %v493_v6, 2  ;;  %v477_v53 = vsel %vm271_vm0, %v4264_v5, 0.0  ;;  %v3856_v10 = vpop.eup %3855  ;;  %v4382_v26 = vrot.slane %v753_v47, %v4292_v1 }
 0x12e   : > { %v627_v60 = vrot.slane %v626_v3, 2  ;;  %v533_v33 = vsub.f32 %v4242_v32, %v4371_v8  ;;  %v462_v57 = vadd.f32 %v461_v42, %v460_v59  ;;  %v478_v13 = vrot.slane %v477_v53, 4 }
 0x12f   : > { %v719_v4 = vmul.f32 %v3856_v10, %v4289_v55  ;;  %v546_v17 = vmul.f32 %v530_v52, %v530_v52  ;;  %v495_v31 = vadd.f32 %v494_v46, %v493_v6  ;;  %v498_v36 = vsel %vm271_vm0, %v4268_v12, 0.0 }
 0x130   : > { %v628_v20 = vadd.f32 %v627_v60, %v626_v3  ;;  %v549_v22 = vmul.f32 %v533_v33, %v533_v33  ;;  %v4385_v23 = vmul.f32 0.125, %v462_v57  ;;  %v479_v25 = vadd.f32 %v478_v13, %v477_v53 }
 0x131   : > { %v735_v27 = vmul.f32 %v719_v4, %v4275_v61  ;;  %v610_v29 = vsel %vm271_vm0, %v546_v17, 0.0  ;;  %v496_v28 = vrot.slane %v495_v31, 1  ;;  %v4394_v41 = vadd.f32 %v861_v16, %v830_v50 }
 0x132   : > { %v629_v58 = vrot.slane %v628_v20, 1  ;;  %v611_v37 = vrot.slane %v610_v29, 4  ;;  %v631_v39 = vsel %vm271_vm0, %v549_v22, 0.0  ;;  %v531_v40 = vsub.f32 %v4246_v38, %v4385_v23 }
 0x133   : > { %v785_v7 = vrot.slane %v719_v4, %v4292_v1  ;;  %v632_v43 = vrot.slane %v631_v39, 4  ;;  %v497_v45 = vadd.f32 %v496_v28, %v495_v31  ;;  %v480_v56 = vrot.slane %v479_v25, 2 }
 0x134   : > { %v630_v61 = vadd.f32 %v629_v58, %v628_v20  ;;  %v612_v11 = vadd.f32 %v611_v37, %v610_v29  ;;  %v547_v49 = vmul.f32 %v531_v40, %v531_v40  ;;  %v751_v63 = vsub.f32 %v4300_v15, %v735_v27 }
 0x135   : > { %v633_v59 = vadd.f32 %v632_v43, %v631_v39  ;;  %v4398_v47 = vmul.f32 0.125, %v497_v45  ;;  %v499_v6 = vrot.slane %v498_v36, 4  ;;  %v481_v50 = vadd.f32 %v480_v56, %v479_v25 }
 0x136   : > { %v676_v3 = vmul.f32 0.125, %v630_v61  ;;  %v613_v42 = vrot.slane %v612_v11, 2  ;;  %v617_v52 = vsel %vm271_vm0, %v547_v49, 0.0  ;;  %v831_v16 = vmul.f32 %v785_v7, %v4220_v62 }
 0x137   : > { %v634_v46 = vrot.slane %v633_v59, 2  ;;  %v618_v53 = vrot.slane %v617_v52, 4  ;;  %v536_v10 = vsub.f32 %v4260_v0, %v4398_v47  ;;  %v482_v57 = vrot.slane %v481_v50, 1 }
 0x138   : > { %v692_v60 = vadd.f32 1e-05, %v676_v3  ;;  %v614_v33 = vadd.f32 %v613_v42, %v612_v11  ;;  %v500_v13 = vadd.f32 %v499_v6, %v498_v36  ;;  %v865_v4 = vrot.slane %v751_v63, %v4292_v1 }
 0x139   : > { %v635_v17 = vadd.f32 %v634_v46, %v633_v59  ;;  %v619_v31 = vadd.f32 %v618_v53, %v617_v52  ;;  %v552_v20 = vmul.f32 %v536_v10, %v536_v10  ;;  %v483_v27 = vadd.f32 %v482_v57, %v481_v50 }
 0x13a   : > { %3857 = vrsqrt.f32 %v692_v60  ;;  %v615_v22 = vrot.slane %v614_v33, 1  ;;  %v501_v25 = vrot.slane %v500_v13, 2  ;;  %v484_v58 = vsel %vm271_vm0, %v4270_v18, 0.0 }
 0x13b   : > { %v636_v29 = vrot.slane %v635_v17, 1  ;;  %v620_v62 = vrot.slane %v619_v31, 2  ;;  %v652_v28 = vsel %vm271_vm0, %v552_v20, 0.0  ;;  %v4408_v40 = vmul.f32 0.125, %v483_v27 }
 0x13c   : > { %v616_v37 = vadd.f32 %v615_v22, %v614_v33  ;;  %v653_v39 = vrot.slane %v652_v28, 4  ;;  %v502_v36 = vadd.f32 %v501_v25, %v500_v13  ;;  %v485_v45 = vrot.slane %v484_v58, 4 }
 0x13d   : > { %v637_v7 = vadd.f32 %v636_v29, %v635_v17  ;;  %v621_v43 = vadd.f32 %v620_v62, %v619_v31  ;;  %v924_v61 = vmul.f32 0.5, %v4345_v30  ;;  %v534_v56 = vsub.f32 %v4264_v5, %v4408_v40 }
 0x13e   : > { %v674_v11 = vmul.f32 0.125, %v616_v37  ;;  %v654_v49 = vadd.f32 %v653_v39, %v652_v28  ;;  %v503_v63 = vrot.slane %v502_v36, 1  ;;  %v486_v3 = vadd.f32 %v485_v45, %v484_v58 }
 0x13f   : > { %v677_v59 = vmul.f32 0.125, %v637_v7  ;;  %v622_v6 = vrot.slane %v621_v43, 1  ;;  %3859 = vtanh.f32 %v924_v61  ;;  %v550_v50 = vmul.f32 %v534_v56, %v534_v56 }
 0x140   : > { %v690_v42 = vadd.f32 1e-05, %v674_v11  ;;  %v655_v52 = vrot.slane %v654_v49, 2  ;;  %v504_v46 = vadd.f32 %v503_v63, %v502_v36  ;;  %v487_v60 = vrot.slane %v486_v3, 2 }
 0x141   : > { %v693_v53 = vadd.f32 1e-05, %v677_v59  ;;  %v623_v10 = vadd.f32 %v622_v6, %v621_v43  ;;  %v922_v33 = vmul.f32 0.5, %v4347_v51  ;;  %v638_v13 = vsel %vm271_vm0, %v550_v50, 0.0 }
 0x142   : > { %3861 = vrsqrt.f32 %v690_v42  ;;  %v656_v57 = vadd.f32 %v655_v52, %v654_v49  ;;  %v4415_v17 = vmul.f32 0.125, %v504_v46  ;;  %v639_v20 = vrot.slane %v638_v13, 4 }
 0x143   : > { %3863 = vrsqrt.f32 %v693_v53  ;;  %v675_v31 = vmul.f32 0.125, %v623_v10  ;;  %v488_v22 = vadd.f32 %v487_v60, %v486_v3  ;;  %v4417_v25 = vadd.f32 %v865_v4, %v831_v16 }
 0x144   : > { %v3858_v27 = vpop.eup %3857  ;;  %v657_v29 = vrot.slane %v656_v57, 1  ;;  %v537_v62 = vsub.f32 %v4268_v12, %v4415_v17  ;;  %3865 = vtanh.f32 %v922_v33  ;;  %v640_v37 = vadd.f32 %v639_v20, %v638_v13 }
 0x145   : > { %v724_v28 = vmul.f32 %v3858_v27, %v4289_v55  ;;  %v691_v58 = vadd.f32 1e-05, %v675_v31  ;;  %v489_v39 = vrot.slane %v488_v22, 1  ;;  %v928_v36 = vmul.f32 0.5, %v4373_v9 }
 0x146   : > { %v658_v7 = vadd.f32 %v657_v29, %v656_v57  ;;  %v553_v43 = vmul.f32 %v537_v62, %v537_v62  ;;  %3867 = vtanh.f32 %v4350_v35  ;;  %v926_v45 = vmul.f32 0.5, %v4394_v41 }
 0x147   : > { %v740_v16 = vmul.f32 %v724_v28, %v4323_v2  ;;  %3869 = vrsqrt.f32 %v691_v58  ;;  %v641_v4 = vrot.slane %v640_v37, 2  ;;  %v805_v61 = vrot.slane %v724_v28, %v4292_v1 }
 0x148   : > { %v680_v11 = vmul.f32 0.125, %v658_v7  ;;  %v659_v49 = vsel %vm271_vm0, %v553_v43, 0.0  ;;  %v490_v56 = vadd.f32 %v489_v39, %v488_v22  ;;  %v927_v59 = vmul.f32 0.5, %v4417_v25  ;;  %v3838_v39 = vld [vmem:[%s5878_s2] sm:$0xff]  }
 0x149   : > { %v3860_v63 = vpop.eup %3859  ;;  %v756_v6 = vsub.f32 %v4300_v15, %v740_v16  ;;  %v642_v3 = vadd.f32 %v641_v4, %v640_v37  ;;  %v660_v42 = vrot.slane %v659_v49, 4  ;;  %3871 = vtanh.f32 %v4358_v44  ;;  %3773 = vmatprep.subr.bf16.mxu1 %v3838_v39 }
 0x14a   : > { %v696_v35 = vadd.f32 1e-05, %v680_v11  ;;  %v4430_v52 = vmul.f32 0.125, %v490_v56  ;;  %v956_v50 = vadd.f32 1.0, %v3860_v63  ;;  %3873 = vtanh.f32 %v926_v45  ;;  %3774 = vmatpush3.bf16.msra.mxu1 %v3838_v39 }
 0x14b   : > { %v885_v2 = vrot.slane %v756_v6, %v4292_v1  ;;  %v643_v46 = vrot.slane %v642_v3, 1  ;;  %v661_v53 = vadd.f32 %v660_v42, %v659_v49  ;;  %v836_v60 = vmul.f32 %v4232_v19, %v805_v61 }
 0x14c   : > { %v3862_v10 = vpop.eup %3861  ;;  %3875 = vrsqrt.f32 %v696_v35  ;;  %v535_v33 = vsub.f32 %v4270_v18, %v4430_v52  ;;  %v972_v57 = vmul.f32 0.5, %v956_v50  ;;  %v4440_v27 = vadd.f32 %v4382_v26, %v4369_v21 }
 0x14d   : > { %v3864_v13 = vpop.eup %3863  ;;  %v722_v31 = vmul.f32 %v3862_v10, %v4289_v55  ;;  %v644_v20 = vadd.f32 %v643_v46, %v642_v3  ;;  %v662_v22 = vrot.slane %v661_v53, 2  ;;  %3877 = vtanh.f32 %v927_v59 }
 0x14e   : > { %v3866_v44 = vpop.eup %3865  ;;  %v4442_v29 = vadd.f32 %v885_v2, %v836_v60  ;;  %v725_v19 = vmul.f32 %v3864_v13, %v4289_v55  ;;  %v551_v62 = vmul.f32 %v535_v33, %v535_v33  ;;  %1006 = vrot.lane.b32.xlu1 %v972_v57, %s4111_s8  ;;  %3879 = vtanh.f32 %v928_v36 }
 0x14f   : > { %v738_v28 = vmul.f32 %v722_v31, %v4365_v54  ;;  %v797_v58 = vrot.slane %v722_v31, %v4292_v1  ;;  %v678_v37 = vmul.f32 0.125, %v644_v20  ;;  %v663_v43 = vadd.f32 %v662_v22, %v661_v53 }
 0x150   : > { %v3868_v21 = vpop.eup %3867  ;;  %v741_v26 = vmul.f32 %v725_v19, %v4371_v8  ;;  %v809_v7 = vrot.slane %v725_v19, %v4292_v1  ;;  %v645_v45 = vsel %vm271_vm0, %v551_v62, 0.0  ;;  %v954_v6 = vadd.f32 1.0, %v3866_v44 }
 0x151   : > { %v3870_v16 = vpop.eup %3869  ;;  %v754_v4 = vsub.f32 %v4300_v15, %v738_v28  ;;  %v834_v54 = vmul.f32 %v797_v58, %v4238_v24  ;;  %v694_v61 = vadd.f32 1e-05, %v678_v37  ;;  %v646_v11 = vrot.slane %v645_v45, 4 }
 0x152   : > { %v757_v36 = vsub.f32 %v4300_v15, %v741_v26  ;;  %v837_v49 = vmul.f32 %v4242_v32, %v809_v7  ;;  %v723_v56 = vmul.f32 %v3870_v16, %v4289_v55  ;;  %v664_v8 = vrot.slane %v663_v43, 1 }
 0x153   : > { %v877_v63 = vrot.slane %v754_v4, %v4292_v1  ;;  %3881 = vrsqrt.f32 %v694_v61  ;;  %v647_v59 = vadd.f32 %v646_v11, %v645_v45  ;;  %v3872_v3 = vpop.eup %3871  ;;  %v970_v53 = vmul.f32 0.5, %v954_v6 }
 0x154   : > { %v889_v42 = vrot.slane %v757_v36, %v4292_v1  ;;  %v739_v24 = vmul.f32 %v723_v56, %v4385_v23  ;;  %v801_v35 = vrot.slane %v723_v56, %v4292_v1  ;;  %v665_v50 = vadd.f32 %v664_v8, %v663_v43  ;;  %v3874_v2 = vpop.eup %3873 }
 0x155   : > { %v4463_v46 = vadd.f32 %v877_v63, %v834_v54  ;;  %v648_v32 = vrot.slane %v647_v59, 2  ;;  %v957_v10 = vadd.f32 1.0, %v3868_v21  ;;  %v929_v33 = vmul.f32 0.5, %v4440_v27  ;;  %1002 = vrot.lane.b32.xlu0 %v970_v53, %s4111_s8 }
 0x156   : > { %v3876_v60 = vpop.eup %3875  ;;  %v932_v57 = vmul.f32 0.5, %v4442_v29  ;;  %v755_v13 = vsub.f32 %v4300_v15, %v739_v24  ;;  %v681_v31 = vmul.f32 0.125, %v665_v50  ;;  %v4468_v22 = vadd.f32 %v889_v42, %v837_v49 }
 0x157   : > { %v3878_v20 = vpop.eup %3877  ;;  %v728_v23 = vmul.f32 %v3876_v60, %v4289_v55  ;;  %v649_v44 = vadd.f32 %v648_v32, %v647_v59  ;;  %v973_v19 = vmul.f32 0.5, %v957_v10  ;;  %v835_v62 = vmul.f32 %v801_v35, %v4246_v38 }
 0x158   : > { %v881_v28 = vrot.slane %v755_v13, %v4292_v1  ;;  %v697_v58 = vadd.f32 1e-05, %v681_v31  ;;  %v955_v37 = vadd.f32 1.0, %v3872_v3  ;;  %v3880_v39 = vpop.eup %3879  ;;  %v930_v21 = vmul.f32 0.5, %v4463_v46 }
 0x159   : > { %v744_v26 = vmul.f32 %v728_v23, %v4398_v47  ;;  %v650_v7 = vrot.slane %v649_v44, 1  ;;  %1008 = vrot.lane.b32.xlu1 %v973_v19, %s4111_s8  ;;  %v958_v43 = vadd.f32 1.0, %v3874_v2  ;;  %v959_v4 = vadd.f32 1.0, %v3878_v20 }
 0x15a   : > { %v4477_v45 = vadd.f32 %v881_v28, %v835_v62  ;;  %3883 = vrsqrt.f32 %v697_v58  ;;  %v971_v16 = vmul.f32 0.5, %v955_v37  ;;  %v933_v38 = vmul.f32 0.5, %v4468_v22 }
 0x15b   : > { %v760_v54 = vsub.f32 %v4300_v15, %v744_v26  ;;  %v821_v61 = vrot.slane %v728_v23, %v4292_v1  ;;  %v651_v11 = vadd.f32 %v650_v7, %v649_v44  ;;  %v974_v47 = vmul.f32 0.5, %v958_v43 }
 0x15c   : > { %v931_v36 = vmul.f32 0.5, %v4477_v45  ;;  %1004 = vrot.lane.b32.xlu0 %v971_v16, %s4111_s8  ;;  %v975_v49 = vmul.f32 0.5, %v959_v4  ;;  %3885 = vtanh.f32 %v929_v33  ;;  %v960_v6 = vadd.f32 1.0, %v3880_v39 }
 0x15d   : > { %v3882_v56 = vpop.eup %3881  ;;  %v901_v8 = vrot.slane %v760_v54, %v4292_v1  ;;  %v679_v63 = vmul.f32 0.125, %v651_v11  ;;  %3887 = vtanh.f32 %v930_v21  ;;  %v840_v3 = vmul.f32 %v4260_v0, %v821_v61 }
 0x15e   : > { %v726_v59 = vmul.f32 %v3882_v56, %v4289_v55  ;;  %1012 = vrot.lane.b32.xlu1 %v975_v49, %s4111_s8  ;;  %3889 = vtanh.f32 %v931_v36  ;;  %v976_v32 = vmul.f32 0.5, %v960_v6 }
 0x15f   : > { %v695_v42 = vadd.f32 1e-05, %v679_v63  ;;  %3891 = vtanh.f32 %v932_v57  ;;  %v4491_v50 = vadd.f32 %v901_v8, %v840_v3 }
 0x160   : > { %v742_v24 = vmul.f32 %v726_v59, %v4408_v40  ;;  %v813_v35 = vrot.slane %v726_v59, %v4292_v1  ;;  %1010 = vrot.lane.b32.xlu0 %v974_v47, %s4111_s8  ;;  %3893 = vtanh.f32 %v933_v38 }
 0x161   : > { %3895 = vrsqrt.f32 %v695_v42  ;;  %v936_v40 = vmul.f32 0.5, %v4491_v50 }
 0x162   : > { %v758_v2 = vsub.f32 %v4300_v15, %v742_v24  ;;  %v838_v10 = vmul.f32 %v813_v35, %v4264_v5 }
 0x163   : > { %3897 = vtanh.f32 %v936_v40 }
 0x164   : > { %v3884_v53 = vpop.eup %3883  ;;  %v893_v0 = vrot.slane %v758_v2, %v4292_v1  ;;  %1014 = vrot.lane.b32.xlu0 %v976_v32, %s4111_s8 }
 0x165   : > { %v729_v60 = vmul.f32 %v3884_v53, %v4289_v55 }
 0x166   : > { %v3886_v33 = vpop.eup %3885  ;;  %v4499_v57 = vadd.f32 %v893_v0, %v838_v10 }
 0x167   : > { %v3888_v13 = vpop.eup %3887  ;;  %v745_v31 = vmul.f32 %v729_v60, %v4415_v17  ;;  %v825_v20 = vrot.slane %v729_v60, %v4292_v1  ;;  %v961_v23 = vadd.f32 1.0, %v3886_v33 }
 0x168   : > { %v3890_v44 = vpop.eup %3889  ;;  %v934_v5 = vmul.f32 0.5, %v4499_v57  ;;  %v962_v19 = vadd.f32 1.0, %v3888_v13 }
 0x169   : > { %v3892_v62 = vpop.eup %3891  ;;  %v761_v28 = vsub.f32 %v4300_v15, %v745_v31  ;;  %v977_v58 = vmul.f32 0.5, %v961_v23  ;;  %v963_v37 = vadd.f32 1.0, %v3890_v44  ;;  %v841_v17 = vmul.f32 %v4268_v12, %v825_v20 }
 0x16a   : > { %v3894_v39 = vpop.eup %3893  ;;  %v978_v21 = vmul.f32 0.5, %v962_v19  ;;  %v964_v26 = vadd.f32 1.0, %v3892_v62  ;;  %3899 = vtanh.f32 %v934_v5 }
 0x16b   : > { %v3896_v7 = vpop.eup %3895  ;;  %v905_v43 = vrot.slane %v761_v28, %v4292_v1  ;;  %1016 = vrot.lane.b32.xlu1 %v977_v58, %s4111_s8  ;;  %v979_v16 = vmul.f32 0.5, %v963_v37  ;;  %v965_v54 = vadd.f32 1.0, %v3894_v39 }
 0x16c   : > { %v727_v4 = vmul.f32 %v3896_v7, %v4289_v55  ;;  %1018 = vrot.lane.b32.xlu0 %v978_v21, %s4111_s8  ;;  %v980_v36 = vmul.f32 0.5, %v964_v26 }
 0x16d   : > { %v4510_v38 = vadd.f32 %v905_v43, %v841_v17  ;;  %v981_v47 = vmul.f32 0.5, %v965_v54  ;;  %v3898_v56 = vpop.eup %3897 }
 0x16e   : > { %v743_v61 = vmul.f32 %v727_v4, %v4430_v52  ;;  %v817_v11 = vrot.slane %v727_v4, %v4292_v1  ;;  %v968_v42 = vadd.f32 1.0, %v3898_v56 }
 0x16f   : > { %1020 = vrot.lane.b32.xlu1 %v979_v16, %s4111_s8  ;;  %v937_v8 = vmul.f32 0.5, %v4510_v38 }
 0x170   : > { %v759_v12 = vsub.f32 %v4300_v15, %v743_v61  ;;  %1022 = vrot.lane.b32.xlu0 %v980_v36, %s4111_s8  ;;  %v839_v49 = vmul.f32 %v817_v11, %v4270_v18  ;;  %v984_v15 = vmul.f32 0.5, %v968_v42 }
 0x171   : > { %3901 = vtanh.f32 %v937_v8 }
 0x172   : > { %v897_v55 = vrot.slane %v759_v12, %v4292_v1 }
 0x173   : > { %1024 = vrot.lane.b32.xlu1 %v981_v47, %s4111_s8 }
 0x174   : > { %v3900_v52 = vpop.eup %3899  ;;  %v919_v63 = vadd.f32 %v897_v55, %v839_v49 }
 0x175   : > { %v966_v59 = vadd.f32 1.0, %v3900_v52 }
 0x176   : > { %v935_v6 = vmul.f32 0.5, %v919_v63 }
 0x177   : > { %v982_v3 = vmul.f32 0.5, %v966_v59 }
 0x178   : > { %3903 = vtanh.f32 %v935_v6 }
 0x179   : > { %1026 = vrot.lane.b32.xlu0 %v982_v3, %s4111_s8 }
 0x17b   : > { %v3902_v18 = vpop.eup %3901 }
 0x17c   : > { %v969_v2 = vadd.f32 1.0, %v3902_v18 }
 0x17d   : > { %1030 = vrot.lane.b32.xlu0 %v984_v15, %s4111_s8 }
 0x17e   : > { %v985_v32 = vmul.f32 0.5, %v969_v2 }
 0x182   : > { %v3904_v1 = vpop.eup %3903 }
 0x183   : > { %v967_v24 = vadd.f32 1.0, %v3904_v1 }
 0x185   : > { %v983_v35 = vmul.f32 0.5, %v967_v24 }
 0x187   : > { %1028 = vrot.lane.b32.xlu1 %v983_v35, %s4111_s8 }
 0x18b   : > { %1032 = vrot.lane.b32.xlu1 %v985_v32, %s4111_s8 }
 0x1c0   : > { %v1007_v53 = vpop.permute.xlu1 %1006 }
 0x1c1   : > { %v4535_v31 = vmul.f32 %v1007_v53, %v4345_v30 }
 0x1c7   : > { %v1003_v10 = vpop.permute.xlu0 %1002 }
 0x1c8   : > { %v4529_v33 = vmul.f32 %v1003_v10, %v4347_v51 }
 0x1cb   : > { %v1009_v0 = vpop.permute.xlu1 %1008 }
 0x1cc   : > { %v4526_v40 = vmul.f32 %v1009_v0, %v4332_v14 }
 0x1ce   : > { %v1005_v60 = vpop.permute.xlu0 %1004  ;;  %v1067_v14 = vpack.c.bf16 %v4526_v40, %v4535_v31 }
 0x1cf   : > { %v4532_v13 = vmul.f32 %v1005_v60, %v4341_v34 }
 0x1d0   : > { %v1013_v20 = vpop.permute.xlu1 %1012 }
 0x1d1   : > { %v1066_v23 = vpack.c.bf16 %v4532_v13, %v4529_v33  ;;  %v4540_v44 = vmul.f32 %v1013_v20, %v4417_v25 }
 0x1d2   : > { %v1011_v5 = vpop.permute.xlu0 %1010 }
 0x1d3   : > { %v4545_v51 = vmul.f32 %v1011_v5, %v4394_v41  ;;  %3775 = vmatprep.mubr.msk.bf16.mxu1 %vm1082_vm1, %v1066_v23 }
 0x1d4   : > { %3776 = vmatmul.mubr.msk.bf16.vlgmr.msra.gmra.mrb[0].mxu1 %vm1082_vm1, %v1067_v14 }
 0x1d5   : > { %v1068_v34 = vpack.c.bf16 %v4540_v44, %v4545_v51 }
 0x1d6   : > { %v1015_v30 = vpop.permute.xlu0 %1014 }
 0x1d7   : > { %3779 = vmatprep.mubr.msk.bf16.mxu1 %vm1082_vm1, %v1068_v34  ;;  %v4553_v25 = vmul.f32 %v1015_v30, %v4373_v9 }
 0x1dd   : > { %v1017_v19 = vpop.permute.xlu1 %1016 }
 0x1de   : > { %v4556_v62 = vmul.f32 %v1017_v19, %v4440_v27  ;;  %v1019_v28 = vpop.permute.xlu0 %1018 }
 0x1df   : > { %v4561_v37 = vmul.f32 %v1019_v28, %v4463_v46 }
 0x1e0   : > { %v1069_v41 = vpack.c.bf16 %v4556_v62, %v4553_v25 }
 0x1e1   : > { %v1021_v58 = vpop.permute.xlu1 %1020  ;;  %5910 = vst [vmem:[#allocation3_spill] sm:$0xff] %v4561_v37 }
 0x1e2   : > { %v4564_v39 = vmul.f32 %v1021_v58, %v4477_v45  ;;  %3780 = vmatmul.mubr.msk.bf16.gmra.mrb[4].mxu1 %vm1082_vm1, %v1069_v41  ;;  %v1023_v21 = vpop.permute.xlu0 %1022 }
 0x1e3   : > { %v4570_v27 = vmul.f32 %v1023_v21, %v4442_v29 }
 0x1e4   : > { %5911 = vst [vmem:[#allocation4_spill] sm:$0xff] %v4564_v39  ;;  %v1070_v9 = vpack.c.bf16 %v4564_v39, %v4561_v37 }
 0x1e5   : > { %v1025_v26 = vpop.permute.xlu1 %1024  ;;  %5912 = vst [vmem:[#allocation5_spill] sm:$0xff] %v4570_v27 }
 0x1e6   : > { %v4573_v7 = vmul.f32 %v1025_v26, %v4468_v22  ;;  %3783 = vmatprep.mubr.msk.bf16.mxu1 %vm1082_vm1, %v1070_v9 }
 0x1e8   : > { %5913 = vst [vmem:[#allocation6_spill] sm:$0xff] %v4573_v7  ;;  %v1071_v46 = vpack.c.bf16 %v4573_v7, %v4570_v27 }
 0x1ea   : > { %3784 = vmatmul.mubr.msk.bf16.gmra.mrb[8].mxu1 %vm1082_vm1, %v1071_v46 }
 0x1eb   : > { %v1027_v45 = vpop.permute.xlu0 %1026 }
 0x1ec   : > { %v4580_v43 = vmul.f32 %v1027_v45, %v4499_v57 }
 0x1ee   : > { %5914 = vst [vmem:[#allocation7_spill] sm:$0xff] %v4580_v43 }
 0x1ef   : > { %v1031_v4 = vpop.permute.xlu0 %1030 }
 0x1f0   : > { %v4587_v54 = vmul.f32 %v1031_v4, %v4491_v50 }
 0x1f2   : > { %5916 = vst [vmem:[#allocation9_spill] sm:$0xff] %v4587_v54 }
 0x1f9   : > { %v1029_v17 = vpop.permute.xlu1 %1028 }
 0x1fa   : > { %v4582_v16 = vmul.f32 %v1029_v17, %v919_v63 }
 0x1fc   : > { %5915 = vst [vmem:[#allocation8_spill] sm:$0xff] %v4582_v16  ;;  %v1072_v29 = vpack.c.bf16 %v4582_v16, %v4580_v43 }
 0x1fd   : > { %v1033_v22 = vpop.permute.xlu1 %1032 }
 0x1fe   : > { %v4590_v61 = vmul.f32 %v1033_v22, %v4510_v38  ;;  %3787 = vmatprep.mubr.msk.bf16.mxu1 %vm1082_vm1, %v1072_v29 }
 0x200   : > { %5917 = vst [vmem:[#allocation10_spill] sm:$0xff] %v4590_v61  ;;  %v1073_v11 = vpack.c.bf16 %v4590_v61, %v4587_v54 }
 0x202   : > { %3788 = vmatmul.mubr.msk.bf16.gmra.mrb[12].mxu1 %vm1082_vm1, %v1073_v11 }
 0x2a7   : > { %v4596_v57 = vpop.f32.mrb[0].mxu1 }
 0x2a8   : > { %v1218_v36 = vsel %vm271_vm0, %v4596_v57, 0.0  ;;  %v4600_v12 = vpop.f32.mrb[1].mxu1 }
 0x2a9   : > { %v1219_v47 = vrot.slane %v1218_v36, 4  ;;  %v1204_v50 = vsel %vm271_vm0, %v4600_v12, 0.0  ;;  %v4604_v38 = vpop.f32.mrb[2].mxu1 }
 0x2aa   : > { %v1205_v49 = vrot.slane %v1204_v50, 4  ;;  %v1225_v55 = vsel %vm271_vm0, %v4604_v38, 0.0  ;;  %v4608_v56 = vpop.f32.mrb[3].mxu1 }
 0x2ab   : > { %v1220_v8 = vadd.f32 %v1219_v47, %v1218_v36  ;;  %v1226_v52 = vrot.slane %v1225_v55, 4  ;;  %v1211_v63 = vsel %vm271_vm0, %v4608_v56, 0.0 }
 0x2ac   : > { %v1206_v59 = vadd.f32 %v1205_v49, %v1204_v50  ;;  %v1212_v6 = vrot.slane %v1211_v63, 4 }
 0x2ad   : > { %v1221_v3 = vrot.slane %v1220_v8, 2  ;;  %v1227_v42 = vadd.f32 %v1226_v52, %v1225_v55 }
 0x2ae   : > { %v1207_v15 = vrot.slane %v1206_v59, 2  ;;  %v1213_v18 = vadd.f32 %v1212_v6, %v1211_v63 }
 0x2af   : > { %v1222_v1 = vadd.f32 %v1221_v3, %v1220_v8  ;;  %v1228_v24 = vrot.slane %v1227_v42, 2 }
 0x2b0   : > { %v1208_v35 = vadd.f32 %v1207_v15, %v1206_v59  ;;  %v1214_v2 = vrot.slane %v1213_v18, 2 }
 0x2b1   : > { %v1223_v32 = vrot.slane %v1222_v1, 1  ;;  %v1229_v53 = vadd.f32 %v1228_v24, %v1227_v42 }
 0x2b2   : > { %v1209_v10 = vrot.slane %v1208_v35, 1  ;;  %v1215_v0 = vadd.f32 %v1214_v2, %v1213_v18 }
 0x2b3   : > { %v1224_v60 = vadd.f32 %v1223_v32, %v1222_v1  ;;  %v1230_v20 = vrot.slane %v1229_v53, 1 }
 0x2b4   : > { %v1210_v23 = vadd.f32 %v1209_v10, %v1208_v35  ;;  %v1216_v14 = vrot.slane %v1215_v0, 1 }
 0x2b5   : > { %v4612_v5 = vmul.f32 0.125, %v1224_v60  ;;  %v1231_v34 = vadd.f32 %v1230_v20, %v1229_v53  ;;  %v4614_v30 = vpop.f32.mrb[4].mxu1 }
 0x2b6   : > { %v4616_v19 = vmul.f32 0.125, %v1210_v23  ;;  %v1217_v28 = vadd.f32 %v1216_v14, %v1215_v0  ;;  %v1246_v41 = vsel %vm271_vm0, %v4614_v30, 0.0  ;;  %v4620_v58 = vpop.f32.mrb[5].mxu1 }
 0x2b7   : > { %v1334_v21 = vsub.f32 %v4596_v57, %v4612_v5  ;;  %v4624_v9 = vmul.f32 0.125, %v1231_v34  ;;  %v1247_v26 = vrot.slane %v1246_v41, 4  ;;  %v1232_v46 = vsel %vm271_vm0, %v4620_v58, 0.0  ;;  %v4628_v45 = vpop.f32.mrb[6].mxu1 }
 0x2b8   : > { %v1332_v17 = vsub.f32 %v4600_v12, %v4616_v19  ;;  %v4632_v4 = vmul.f32 0.125, %v1217_v28  ;;  %v1233_v29 = vrot.slane %v1232_v46, 4  ;;  %v1253_v22 = vsel %vm271_vm0, %v4628_v45, 0.0  ;;  %v4636_v11 = vpop.f32.mrb[7].mxu1 }
 0x2b9   : > { %v1350_v36 = vmul.f32 %v1334_v21, %v1334_v21  ;;  %v1335_v47 = vsub.f32 %v4604_v38, %v4624_v9  ;;  %v1248_v50 = vadd.f32 %v1247_v26, %v1246_v41  ;;  %v1254_v49 = vrot.slane %v1253_v22, 4 }
 0x2ba   : > { %v1348_v55 = vmul.f32 %v1332_v17, %v1332_v17  ;;  %v1333_v8 = vsub.f32 %v4608_v56, %v4632_v4  ;;  %v1234_v52 = vadd.f32 %v1233_v29, %v1232_v46  ;;  %v1239_v63 = vsel %vm271_vm0, %v4636_v11, 0.0 }
 0x2bb   : > { %v1378_v59 = vsel %vm271_vm0, %v1350_v36, 0.0  ;;  %v1351_v6 = vmul.f32 %v1335_v47, %v1335_v47  ;;  %v1249_v3 = vrot.slane %v1248_v50, 2  ;;  %v1255_v42 = vadd.f32 %v1254_v49, %v1253_v22 }
 0x2bc   : > { %v1379_v15 = vrot.slane %v1378_v59, 4  ;;  %v1364_v18 = vsel %vm271_vm0, %v1348_v55, 0.0  ;;  %v1349_v1 = vmul.f32 %v1333_v8, %v1333_v8  ;;  %v1235_v24 = vrot.slane %v1234_v52, 2 }
 0x2bd   : > { %v1365_v35 = vrot.slane %v1364_v18, 4  ;;  %v1385_v2 = vsel %vm271_vm0, %v1351_v6, 0.0  ;;  %v1250_v32 = vadd.f32 %v1249_v3, %v1248_v50  ;;  %v1256_v53 = vrot.slane %v1255_v42, 2  ;;  %v4647_v10 = vpop.f32.mrb[8].mxu1 }
 0x2be   : > { %v1380_v0 = vadd.f32 %v1379_v15, %v1378_v59  ;;  %v1386_v60 = vrot.slane %v1385_v2, 4  ;;  %v1371_v20 = vsel %vm271_vm0, %v1349_v1, 0.0  ;;  %v1236_v23 = vadd.f32 %v1235_v24, %v1234_v52  ;;  %v4650_v14 = vpop.f32.mrb[9].mxu1 }
 0x2bf   : > { %v1366_v34 = vadd.f32 %v1365_v35, %v1364_v18  ;;  %v1372_v28 = vrot.slane %v1371_v20, 4  ;;  %v1251_v41 = vrot.slane %v1250_v32, 1  ;;  %v1257_v21 = vadd.f32 %v1256_v53, %v1255_v42  ;;  %v4652_v26 = vpop.f32.mrb[10].mxu1 }
 0x2c0   : > { %v1381_v46 = vrot.slane %v1380_v0, 2  ;;  %v1387_v17 = vadd.f32 %v1386_v60, %v1385_v2  ;;  %v1237_v29 = vrot.slane %v1236_v23, 1  ;;  %v1240_v22 = vrot.slane %v1239_v63, 4  ;;  %v4654_v36 = vpop.f32.mrb[11].mxu1 }
 0x2c1   : > { %v1367_v47 = vrot.slane %v1366_v34, 2  ;;  %v1373_v50 = vadd.f32 %v1372_v28, %v1371_v20  ;;  %v1252_v49 = vadd.f32 %v1251_v41, %v1250_v32  ;;  %v1258_v55 = vrot.slane %v1257_v21, 1 }
 0x2c2   : > { %v1382_v8 = vadd.f32 %v1381_v46, %v1380_v0  ;;  %v1388_v52 = vrot.slane %v1387_v17, 2  ;;  %v1238_v59 = vadd.f32 %v1237_v29, %v1236_v23  ;;  %v1241_v6 = vadd.f32 %v1240_v22, %v1239_v63 }
 0x2c3   : > { %v1368_v3 = vadd.f32 %v1367_v47, %v1366_v34  ;;  %v1374_v15 = vrot.slane %v1373_v50, 2  ;;  %v4656_v18 = vmul.f32 0.125, %v1252_v49  ;;  %v1259_v42 = vadd.f32 %v1258_v55, %v1257_v21 }
 0x2c4   : > { %v1383_v1 = vrot.slane %v1382_v8, 1  ;;  %v1389_v24 = vadd.f32 %v1388_v52, %v1387_v17  ;;  %v4658_v35 = vmul.f32 0.125, %v1238_v59  ;;  %v1242_v2 = vrot.slane %v1241_v6, 2 }
 0x2c5   : > { %v1369_v53 = vrot.slane %v1368_v3, 1  ;;  %v1375_v60 = vadd.f32 %v1374_v15, %v1373_v50  ;;  %v1338_v32 = vsub.f32 %v4614_v30, %v4656_v18  ;;  %v4662_v20 = vmul.f32 0.125, %v1259_v42 }
 0x2c6   : > { %v1384_v0 = vadd.f32 %v1383_v1, %v1382_v8  ;;  %v1390_v23 = vrot.slane %v1389_v24, 1  ;;  %v1336_v63 = vsub.f32 %v4620_v58, %v4658_v35  ;;  %v1243_v34 = vadd.f32 %v1242_v2, %v1241_v6 }
 0x2c7   : > { %v1370_v28 = vadd.f32 %v1369_v53, %v1368_v3  ;;  %v1376_v41 = vrot.slane %v1375_v60, 1  ;;  %v1354_v21 = vmul.f32 %v1338_v32, %v1338_v32  ;;  %v1339_v46 = vsub.f32 %v4628_v45, %v4662_v20 }
 0x2c8   : > { %v1478_v17 = vmul.f32 0.125, %v1384_v0  ;;  %v1391_v29 = vadd.f32 %v1390_v23, %v1389_v24  ;;  %v1352_v22 = vmul.f32 %v1336_v63, %v1336_v63  ;;  %v1244_v47 = vrot.slane %v1243_v34, 1 }
 0x2c9   : > { %v1476_v50 = vmul.f32 0.125, %v1370_v28  ;;  %v1377_v49 = vadd.f32 %v1376_v41, %v1375_v60  ;;  %v1406_v55 = vsel %vm271_vm0, %v1354_v21, 0.0  ;;  %v1355_v8 = vmul.f32 %v1339_v46, %v1339_v46  ;;  %v3839_v60 = vld [vmem:[%s5878_s2 + $0x8] sm:$0xff]  }
 0x2ca   : > { %v1494_v52 = vadd.f32 1e-05, %v1478_v17  ;;  %v1479_v59 = vmul.f32 0.125, %v1391_v29  ;;  %v1407_v15 = vrot.slane %v1406_v55, 4  ;;  %v1392_v6 = vsel %vm271_vm0, %v1352_v22, 0.0  ;;  %3791 = vmatprep.subr.bf16.mxu1 %v3839_v60 }
 0x2cb   : > { %v1492_v3 = vadd.f32 1e-05, %v1476_v50  ;;  %v1477_v42 = vmul.f32 0.125, %v1377_v49  ;;  %v1393_v1 = vrot.slane %v1392_v6, 4  ;;  %v1413_v2 = vsel %vm271_vm0, %v1355_v8, 0.0  ;;  %3792 = vmatpush3.bf16.msra.mxu1 %v3839_v60 }
 0x2cc   : > { %3905 = vrsqrt.f32 %v1494_v52  ;;  %v1495_v53 = vadd.f32 1e-05, %v1479_v59  ;;  %v1408_v24 = vadd.f32 %v1407_v15, %v1406_v55  ;;  %v1414_v32 = vrot.slane %v1413_v2, 4 }
 0x2cd   : > { %3907 = vrsqrt.f32 %v1492_v3  ;;  %v1493_v0 = vadd.f32 1e-05, %v1477_v42  ;;  %v1394_v23 = vadd.f32 %v1393_v1, %v1392_v6  ;;  %v1245_v63 = vadd.f32 %v1244_v47, %v1243_v34 }
 0x2ce   : > { %3909 = vrsqrt.f32 %v1495_v53  ;;  %v1409_v28 = vrot.slane %v1408_v24, 2  ;;  %v1415_v41 = vadd.f32 %v1414_v32, %v1413_v2  ;;  %v1274_v21 = vsel %vm271_vm0, %v4647_v10, 0.0 }
 0x2cf   : > { %3911 = vrsqrt.f32 %v1493_v0  ;;  %v1395_v46 = vrot.slane %v1394_v23, 2  ;;  %v4676_v17 = vmul.f32 0.125, %v1245_v63  ;;  %v1275_v29 = vrot.slane %v1274_v21, 4 }
 0x2d0   : > { %v1410_v22 = vadd.f32 %v1409_v28, %v1408_v24  ;;  %v1416_v50 = vrot.slane %v1415_v41, 2  ;;  %v1260_v49 = vsel %vm271_vm0, %v4650_v14, 0.0  ;;  %v1281_v34 = vsel %vm271_vm0, %v4652_v26, 0.0 }
 0x2d1   : > { %v1396_v47 = vadd.f32 %v1395_v46, %v1394_v23  ;;  %v1337_v55 = vsub.f32 %v4636_v11, %v4676_v17  ;;  %v1276_v8 = vadd.f32 %v1275_v29, %v1274_v21  ;;  %v1261_v52 = vrot.slane %v1260_v49, 4 }
 0x2d2   : > { %v1411_v59 = vrot.slane %v1410_v22, 1  ;;  %v1417_v15 = vadd.f32 %v1416_v50, %v1415_v41  ;;  %v1282_v6 = vrot.slane %v1281_v34, 4  ;;  %v4686_v3 = vsel %vm271_vm0, %v4654_v36, 0.0 }
 0x2d3   : > { %v1397_v42 = vrot.slane %v1396_v47, 1  ;;  %v1353_v1 = vmul.f32 %v1337_v55, %v1337_v55  ;;  %v1277_v2 = vrot.slane %v1276_v8, 2  ;;  %v1262_v53 = vadd.f32 %v1261_v52, %v1260_v49 }
 0x2d4   : > { %v1412_v24 = vadd.f32 %v1411_v59, %v1410_v22  ;;  %v1418_v32 = vrot.slane %v1417_v15, 1  ;;  %v4688_v60 = vadd.f32 %v1282_v6, %v1281_v34  ;;  %v4691_v0 = vsub.s32 1, %v4208_v48  ;;  %v4702_v34 = vld [vmem:[%s5879_s3] sm:$0xf] }
 0x2d5   : > { %v1398_v23 = vadd.f32 %v1397_v42, %v1396_v47  ;;  %v1399_v63 = vsel %vm271_vm0, %v1353_v1, 0.0  ;;  %v1278_v28 = vadd.f32 %v1277_v2, %v1276_v8  ;;  %v4694_v41 = vpop.f32.mrb[12].mxu1  ;;  %v1263_v50 = vrot.slane %v1262_v53, 2 }
 0x2d6   : > { %v3906_v21 = vpop.eup %3905  ;;  %v1482_v46 = vmul.f32 0.125, %v1412_v24  ;;  %v1419_v29 = vadd.f32 %v1418_v32, %v1417_v15  ;;  %v1268_v55 = vrot.slane %v4686_v3, 4  ;;  %v4697_v49 = vpop.f32.mrb[13].mxu1  ;;  %v1400_v8 = vrot.slane %v1399_v63, 4 }
 0x2d7   : > { %v3908_v22 = vpop.eup %3907  ;;  %v1526_v47 = vmul.f32 %v4702_v34, %v3906_v21  ;;  %v1480_v52 = vmul.f32 0.125, %v1398_v23  ;;  %v1284_v59 = vrot.slane %v4688_v60, 2  ;;  %v4706_v6 = vpop.f32.mrb[14].mxu1  ;;  %v1279_v24 = vrot.slane %v1278_v28, 1 }
 0x2d8   : > { %v3910_v15 = vpop.eup %3909  ;;  %v1524_v42 = vmul.f32 %v4702_v34, %v3908_v22  ;;  %v1498_v1 = vadd.f32 1e-05, %v1482_v46  ;;  %v1483_v2 = vmul.f32 0.125, %v1419_v29  ;;  %v4709_v32 = vpop.f32.mrb[15].mxu1  ;;  %v4720_v46 = vld [vmem:[%s5880_s4] sm:$0xf] }
 0x2d9   : > { %v3912_v48 = vpop.eup %3911  ;;  %v1542_v61 = vmul.f32 %v1526_v47, %v4612_v5  ;;  %v1583_v54 = vrot.slane %v1526_v47, %v4691_v0  ;;  %v1527_v23 = vmul.f32 %v4702_v34, %v3910_v15  ;;  %v1496_v21 = vadd.f32 1e-05, %v1480_v52 }
 0x2da   : > { %v1540_v16 = vmul.f32 %v1524_v42, %v4616_v19  ;;  %v1575_v43 = vrot.slane %v1524_v42, %v4691_v0  ;;  %v1525_v7 = vmul.f32 %v4702_v34, %v3912_v48  ;;  %3913 = vrsqrt.f32 %v1498_v1 }
 0x2db   : > { %v1558_v29 = vsub.f32 %v4720_v46, %v1542_v61  ;;  %v1543_v5 = vmul.f32 %v1527_v23, %v4624_v9  ;;  %v1587_v22 = vrot.slane %v1527_v23, %v4691_v0  ;;  %v1401_v47 = vadd.f32 %v1400_v8, %v1399_v63 }
 0x2dc   : > { %v1638_v52 = vmul.f32 %v4596_v57, %v1583_v54  ;;  %v1556_v19 = vsub.f32 %v4720_v46, %v1540_v16  ;;  %v1541_v15 = vmul.f32 %v1525_v7, %v4632_v4  ;;  %v1264_v48 = vadd.f32 %v1263_v50, %v1262_v53 }
 0x2dd   : > { %v1663_v42 = vrot.slane %v1558_v29, %v4691_v0  ;;  %v1636_v1 = vmul.f32 %v1575_v43, %v4600_v12  ;;  %v1559_v27 = vsub.f32 %v4720_v46, %v1543_v5  ;;  %3915 = vrsqrt.f32 %v1496_v21 }
 0x2de   : > { %v1655_v61 = vrot.slane %v1556_v19, %v4691_v0  ;;  %v1557_v9 = vsub.f32 %v4720_v46, %v1541_v15  ;;  %v1579_v63 = vrot.slane %v1525_v7, %v4691_v0  ;;  %v1499_v8 = vadd.f32 1e-05, %v1483_v2 }
 0x2df   : > { %v1639_v54 = vmul.f32 %v4604_v38, %v1587_v22  ;;  %v1667_v16 = vrot.slane %v1559_v27, %v4691_v0  ;;  %v1402_v57 = vrot.slane %v1401_v47, 2  ;;  %v1280_v4 = vadd.f32 %v1279_v24, %v1278_v28 }
 0x2e0   : > { %v4736_v53 = vadd.f32 %v1663_v42, %v1638_v52  ;;  %v4738_v50 = vadd.f32 %v1655_v61, %v1636_v1  ;;  %3917 = vrsqrt.f32 %v1499_v8  ;;  %v1265_v43 = vrot.slane %v1264_v48, 1 }
 0x2e1   : > { %v1403_v12 = vadd.f32 %v1402_v57, %v1401_v47  ;;  %v4740_v23 = vmul.f32 0.125, %v1280_v4  ;;  %v4742_v21 = vadd.f32 %v1667_v16, %v1639_v54  ;;  %v1659_v7 = vrot.slane %v1557_v9, %v4691_v0 }
 0x2e2   : > { %v1266_v2 = vadd.f32 %v1265_v43, %v1264_v48  ;;  %v1285_v38 = vadd.f32 %v1284_v59, %v4688_v60  ;;  %v1637_v27 = vmul.f32 %v1579_v63, %v4608_v56  ;;  %v1269_v24 = vadd.f32 %v1268_v55, %v4686_v3 }
 0x2e3   : > { %v1404_v29 = vrot.slane %v1403_v12, 1  ;;  %v1342_v28 = vsub.f32 %v4647_v10, %v4740_v23  ;;  %v4751_v22 = vmul.f32 0.5, %v4736_v53  ;;  %v4754_v47 = vmul.f32 0.5, %v4738_v50 }
 0x2e4   : > { %v3914_v5 = vpop.eup %3913  ;;  %v4756_v52 = vmul.f32 0.125, %v1266_v2  ;;  %v1286_v19 = vrot.slane %v1285_v38, 1  ;;  %v1270_v15 = vrot.slane %v1269_v24, 2  ;;  %v4760_v48 = vmul.f32 0.5, %v4742_v21 }
 0x2e5   : > { %v1530_v60 = vmul.f32 %v4702_v34, %v3914_v5  ;;  %v1405_v59 = vadd.f32 %v1404_v29, %v1403_v12  ;;  %v1358_v56 = vmul.f32 %v1342_v28, %v1342_v28  ;;  %v4762_v42 = vadd.f32 %v1659_v7, %v1637_v27 }
 0x2e6   : > { %v1340_v3 = vsub.f32 %v4650_v14, %v4756_v52  ;;  %v1287_v55 = vadd.f32 %v1286_v19, %v1285_v38  ;;  %v1271_v7 = vadd.f32 %v1270_v15, %v1269_v24  ;;  %v1302_v2 = vsel %vm271_vm0, %v4694_v41, 0.0 }
 0x2e7   : > { %v3916_v1 = vpop.eup %3915  ;;  %v1546_v61 = vmul.f32 %v1530_v60, %v4656_v18  ;;  %v1599_v9 = vrot.slane %v1530_v60, %v4691_v0  ;;  %v1481_v63 = vmul.f32 0.125, %v1405_v59  ;;  %v1434_v8 = vsel %vm271_vm0, %v1358_v56, 0.0 }
 0x2e8   : > { %v1528_v54 = vmul.f32 %v4702_v34, %v3916_v1  ;;  %v1435_v16 = vrot.slane %v1434_v8, 4  ;;  %v1356_v57 = vmul.f32 %v1340_v3, %v1340_v3  ;;  %v4770_v4 = vmul.f32 0.125, %v1287_v55 }
 0x2e9   : > { %v1562_v43 = vsub.f32 %v4720_v46, %v1546_v61  ;;  %v1497_v12 = vadd.f32 1e-05, %v1481_v63  ;;  %v1642_v59 = vmul.f32 %v4614_v30, %v1599_v9  ;;  %v1303_v1 = vrot.slane %v1302_v2, 4 }
 0x2ea   : > { %v3918_v38 = vpop.eup %3917  ;;  %v1544_v18 = vmul.f32 %v1528_v54, %v4658_v35  ;;  %v1591_v27 = vrot.slane %v1528_v54, %v4691_v0  ;;  %v1436_v29 = vadd.f32 %v1435_v16, %v1434_v8  ;;  %v1420_v28 = vsel %vm271_vm0, %v1356_v57, 0.0 }
 0x2eb   : > { %v1679_v5 = vrot.slane %v1562_v43, %v4691_v0  ;;  %v1531_v19 = vmul.f32 %v4702_v34, %v3918_v38  ;;  %3919 = vrsqrt.f32 %v1497_v12  ;;  %v1421_v60 = vrot.slane %v1420_v28, 4 }
 0x2ec   : > { %v1560_v24 = vsub.f32 %v4720_v46, %v1544_v18  ;;  %v1437_v56 = vrot.slane %v1436_v29, 2  ;;  %v1343_v15 = vsub.f32 %v4652_v26, %v4770_v4  ;;  %v4785_v35 = vmul.f32 0.5, %v4762_v42 }
 0x2ed   : > { %v1547_v3 = vmul.f32 %v1531_v19, %v4662_v20  ;;  %v1422_v55 = vadd.f32 %v1421_v60, %v1420_v28  ;;  %v4788_v61 = vadd.f32 %v1679_v5, %v1642_v59  ;;  %v1272_v54 = vrot.slane %v1271_v7, 1 }
 0x2ee   : > { %v1438_v63 = vadd.f32 %v1437_v56, %v1436_v29  ;;  %v1359_v8 = vmul.f32 %v1343_v15, %v1343_v15  ;;  %v1640_v30 = vmul.f32 %v1591_v27, %v4620_v58  ;;  %v1671_v9 = vrot.slane %v1560_v24, %v4691_v0 }
 0x2ef   : > { %v1423_v16 = vrot.slane %v1422_v55, 2  ;;  %v1288_v57 = vsel %vm271_vm0, %v4697_v49, 0.0  ;;  %v1603_v43 = vrot.slane %v1531_v19, %v4691_v0  ;;  %v1273_v38 = vadd.f32 %v1272_v54, %v1271_v7 }
 0x2f0   : > { %v1439_v12 = vrot.slane %v1438_v63, 1  ;;  %v1441_v20 = vsel %vm271_vm0, %v1359_v8, 0.0  ;;  %v1563_v18 = vsub.f32 %v4720_v46, %v1547_v3  ;;  %v1304_v5 = vadd.f32 %v1303_v1, %v1302_v2 }
 0x2f1   : > { %v1424_v28 = vadd.f32 %v1423_v16, %v1422_v55  ;;  %v1442_v29 = vrot.slane %v1441_v20, 4  ;;  %v4798_v60 = vmul.f32 0.5, %v4788_v61  ;;  %v4800_v27 = vmul.f32 0.125, %v1273_v38 }
 0x2f2   : > { %v1440_v58 = vadd.f32 %v1439_v12, %v1438_v63  ;;  %v1289_v59 = vrot.slane %v1288_v57, 4  ;;  %v4802_v24 = vadd.f32 %v1671_v9, %v1640_v30  ;;  %v1305_v15 = vrot.slane %v1304_v5, 2 }
 0x2f3   : > { %v1425_v56 = vrot.slane %v1424_v28, 1  ;;  %v1443_v19 = vadd.f32 %v1442_v29, %v1441_v20  ;;  %v1341_v7 = vsub.f32 %v4654_v36, %v4800_v27  ;;  %v1309_v2 = vsel %vm271_vm0, %v4706_v6, 0.0 }
 0x2f4   : > { %v1486_v39 = vmul.f32 0.125, %v1440_v58  ;;  %v1290_v3 = vadd.f32 %v1289_v59, %v1288_v57  ;;  %v1683_v1 = vrot.slane %v1563_v18, %v4691_v0  ;;  %v1306_v54 = vadd.f32 %v1305_v15, %v1304_v5 }
 0x2f5   : > { %v3920_v55 = vpop.eup %3919  ;;  %v1426_v63 = vadd.f32 %v1425_v56, %v1424_v28  ;;  %v1444_v8 = vrot.slane %v1443_v19, 2  ;;  %v1357_v16 = vmul.f32 %v1341_v7, %v1341_v7  ;;  %v1310_v58 = vrot.slane %v1309_v2, 4 }
 0x2f6   : > { %v1529_v30 = vmul.f32 %v4702_v34, %v3920_v55  ;;  %v1502_v9 = vadd.f32 1e-05, %v1486_v39  ;;  %v1291_v12 = vrot.slane %v1290_v3, 2  ;;  %v1307_v29 = vrot.slane %v1306_v54, 1 }
 0x2f7   : > { %v1484_v20 = vmul.f32 0.125, %v1426_v63  ;;  %v1445_v38 = vadd.f32 %v1444_v8, %v1443_v19  ;;  %v4811_v57 = vmul.f32 0.5, %v4802_v24  ;;  %v1643_v59 = vmul.f32 %v4628_v45, %v1603_v43 }
 0x2f8   : > { %3921 = vrsqrt.f32 %v1502_v9  ;;  %v1427_v18 = vsel %vm271_vm0, %v1357_v16, 0.0  ;;  %v1308_v15 = vadd.f32 %v1307_v29, %v1306_v54  ;;  %v1545_v39 = vmul.f32 %v1529_v30, %v4676_v17 }
 0x2f9   : > { %v1500_v28 = vadd.f32 1e-05, %v1484_v20  ;;  %v1446_v56 = vrot.slane %v1445_v38, 1  ;;  %v1428_v5 = vrot.slane %v1427_v18, 4  ;;  %v4815_v55 = vadd.f32 %v1683_v1, %v1643_v59 }
 0x2fa   : > { %v1292_v7 = vadd.f32 %v1291_v12, %v1290_v3  ;;  %v1311_v19 = vadd.f32 %v1310_v58, %v1309_v2  ;;  %v4818_v37 = vmul.f32 0.125, %v1308_v15  ;;  %v1595_v45 = vrot.slane %v1529_v30, %v4691_v0 }
 0x2fb   : > { %3923 = vrsqrt.f32 %v1500_v28  ;;  %v1447_v63 = vadd.f32 %v1446_v56, %v1445_v38  ;;  %v1429_v8 = vadd.f32 %v1428_v5, %v1427_v18  ;;  %v1295_v16 = vsel %vm271_vm0, %v4709_v32, 0.0 }
 0x2fc   : > { %v1293_v43 = vrot.slane %v1292_v7, 1  ;;  %v1312_v9 = vrot.slane %v1311_v19, 2  ;;  %v1346_v1 = vsub.f32 %v4694_v41, %v4818_v37  ;;  %v1296_v17 = vrot.slane %v1295_v16, 4 }
 0x2fd   : > { %v1487_v20 = vmul.f32 0.125, %v1447_v63  ;;  %v1430_v54 = vrot.slane %v1429_v8, 2  ;;  %v1561_v3 = vsub.f32 %v4720_v46, %v1545_v39  ;;  %3925 = vtanh.f32 %v4754_v47 }
 0x2fe   : > { %v1294_v2 = vadd.f32 %v1293_v43, %v1292_v7  ;;  %v1313_v12 = vadd.f32 %v1312_v9, %v1311_v19  ;;  %v1362_v30 = vmul.f32 %v1346_v1, %v1346_v1  ;;  %v1297_v58 = vadd.f32 %v1296_v17, %v1295_v16 }
 0x2ff   : > { %v1503_v38 = vadd.f32 1e-05, %v1487_v20  ;;  %v1431_v29 = vadd.f32 %v1430_v54, %v1429_v8  ;;  %v4828_v59 = vmul.f32 0.5, %v4815_v55  ;;  %v1641_v18 = vmul.f32 %v1595_v45, %v4636_v11 }
 0x300   : > { %v4831_v28 = vmul.f32 0.125, %v1294_v2  ;;  %v1314_v56 = vrot.slane %v1313_v12, 1  ;;  %v1462_v15 = vsel %vm271_vm0, %v1362_v30, 0.0  ;;  %v1298_v39 = vrot.slane %v1297_v58, 2 }
 0x301   : > { %3927 = vrsqrt.f32 %v1503_v38  ;;  %v1432_v5 = vrot.slane %v1431_v29, 1  ;;  %v1675_v47 = vrot.slane %v1561_v3, %v4691_v0  ;;  %v1463_v19 = vrot.slane %v1462_v15, 4 }
 0x302   : > { %v3922_v7 = vpop.eup %3921  ;;  %v1344_v63 = vsub.f32 %v4697_v49, %v4831_v28  ;;  %v1315_v8 = vadd.f32 %v1314_v56, %v1313_v12  ;;  %v1299_v11 = vadd.f32 %v1298_v39, %v1297_v58  ;;  %3929 = vtanh.f32 %v4785_v35 }
 0x303   : > { %v1534_v43 = vmul.f32 %v4702_v34, %v3922_v7  ;;  %v1433_v9 = vadd.f32 %v1432_v5, %v1431_v29  ;;  %v1464_v45 = vadd.f32 %v1463_v19, %v1462_v15  ;;  %3931 = vtanh.f32 %v4751_v22 }
 0x304   : > { %v1360_v16 = vmul.f32 %v1344_v63, %v1344_v63  ;;  %v4839_v20 = vmul.f32 0.125, %v1315_v8  ;;  %v1300_v3 = vrot.slane %v1299_v11, 1  ;;  %3933 = vtanh.f32 %v4760_v48 }
 0x305   : > { %v3924_v54 = vpop.eup %3923  ;;  %v1550_v1 = vmul.f32 %v1534_v43, %v4740_v23  ;;  %v1485_v17 = vmul.f32 0.125, %v1433_v9  ;;  %v1465_v12 = vrot.slane %v1464_v45, 2  ;;  %v4848_v29 = vadd.f32 %v1675_v47, %v1641_v18 }
 0x306   : > { %v1532_v2 = vmul.f32 %v4702_v34, %v3924_v54  ;;  %v1448_v38 = vsel %vm271_vm0, %v1360_v16, 0.0  ;;  %v1347_v35 = vsub.f32 %v4706_v6, %v4839_v20  ;;  %3935 = vtanh.f32 %v4811_v57 }
 0x307   : > { %v1501_v30 = vadd.f32 1e-05, %v1485_v17  ;;  %v1449_v58 = vrot.slane %v1448_v38, 4  ;;  %v3926_v22 = vpop.eup %3925  ;;  %v1615_v23 = vrot.slane %v1534_v43, %v4691_v0  ;;  %v1466_v48 = vadd.f32 %v1465_v12, %v1464_v45 }
 0x308   : > { %v1548_v56 = vmul.f32 %v1532_v2, %v4756_v52  ;;  %v1363_v5 = vmul.f32 %v1347_v35, %v1347_v35  ;;  %v1566_v15 = vsub.f32 %v4720_v46, %v1550_v1  ;;  %v1301_v7 = vadd.f32 %v1300_v3, %v1299_v11 }
 0x309   : > { %3937 = vrsqrt.f32 %v1501_v30  ;;  %v1450_v39 = vadd.f32 %v1449_v58, %v1448_v38  ;;  %v1607_v18 = vrot.slane %v1532_v2, %v4691_v0  ;;  %v1467_v47 = vrot.slane %v1466_v48, 1 }
 0x30a   : > { %v1564_v19 = vsub.f32 %v4720_v46, %v1548_v56  ;;  %v1469_v63 = vsel %vm271_vm0, %v1363_v5, 0.0  ;;  %v4858_v8 = vmul.f32 0.5, %v4848_v29  ;;  %v4860_v9 = vmul.f32 0.125, %v1301_v7 }
 0x30b   : > { %v3928_v57 = vpop.eup %3927  ;;  %v1451_v43 = vrot.slane %v1450_v39, 2  ;;  %v1470_v52 = vrot.slane %v1469_v63, 4  ;;  %v1468_v11 = vadd.f32 %v1467_v47, %v1466_v48  ;;  %v1764_v54 = vadd.f32 1.0, %v3926_v22 }
 0x30c   : > { %v1687_v45 = vrot.slane %v1564_v19, %v4691_v0  ;;  %v1535_v16 = vmul.f32 %v4702_v34, %v3928_v57  ;;  %v3930_v1 = vpop.eup %3929  ;;  %v1646_v17 = vmul.f32 %v4647_v10, %v1615_v23  ;;  %v1345_v12 = vsub.f32 %v4709_v32, %v4860_v9 }
 0x30d   : > { %v1452_v3 = vadd.f32 %v1451_v43, %v1450_v39  ;;  %v1471_v2 = vadd.f32 %v1470_v52, %v1469_v63  ;;  %v3932_v38 = vpop.eup %3931  ;;  %v1695_v35 = vrot.slane %v1566_v15, %v4691_v0  ;;  %v1644_v30 = vmul.f32 %v1607_v18, %v4650_v14 }
 0x30e   : > { %v1551_v58 = vmul.f32 %v1535_v16, %v4770_v4  ;;  %v1490_v56 = vmul.f32 0.125, %v1468_v11  ;;  %v3934_v5 = vpop.eup %3933  ;;  %v1361_v22 = vmul.f32 %v1345_v12, %v1345_v12  ;;  %v1780_v19 = vmul.f32 0.5, %v1764_v54 }
 0x30f   : > { %v1453_v7 = vrot.slane %v1452_v3, 1  ;;  %v1472_v48 = vrot.slane %v1471_v2, 2  ;;  %v4870_v47 = vadd.f32 %v1687_v45, %v1644_v30  ;;  %v1619_v23 = vrot.slane %v1535_v16, %v4691_v0 }
 0x310   : > { %v1567_v10 = vsub.f32 %v4720_v46, %v1551_v58  ;;  %v1506_v39 = vadd.f32 1e-05, %v1490_v56  ;;  %v3936_v63 = vpop.eup %3935  ;;  %v1455_v14 = vsel %vm271_vm0, %v1361_v22, 0.0  ;;  %1812 = vrot.lane.b32.xlu0 %v1780_v19, %s4111_s8  ;;  %v1765_v4 = vadd.f32 1.0, %v3930_v1 }
 0x311   : > { %v1454_v57 = vadd.f32 %v1453_v7, %v1452_v3  ;;  %v1473_v15 = vadd.f32 %v1472_v48, %v1471_v2  ;;  %v1456_v43 = vrot.slane %v1455_v14, 4  ;;  %v1766_v52 = vadd.f32 1.0, %v3932_v38 }
 0x312   : > { %v1699_v18 = vrot.slane %v1567_v10, %v4691_v0  ;;  %3939 = vrsqrt.f32 %v1506_v39  ;;  %v1781_v12 = vmul.f32 0.5, %v1765_v4  ;;  %v1767_v30 = vadd.f32 1.0, %v3934_v5 }
 0x313   : > { %v3938_v45 = vpop.eup %3937  ;;  %v1488_v11 = vmul.f32 0.125, %v1454_v57  ;;  %v1474_v54 = vrot.slane %v1473_v15, 1  ;;  %v1647_v16 = vmul.f32 %v4652_v26, %v1619_v23  ;;  %v1457_v2 = vadd.f32 %v1456_v43, %v1455_v14 }
 0x314   : > { %v1533_v3 = vmul.f32 %v4702_v34, %v3938_v45  ;;  %v1782_v58 = vmul.f32 0.5, %v1766_v52  ;;  %v4879_v56 = vadd.f32 %v1695_v35, %v1646_v17  ;;  %1814 = vrot.lane.b32.xlu1 %v1781_v12, %s4111_s8  ;;  %v1768_v48 = vadd.f32 1.0, %v3936_v63 }
 0x315   : > { %v1504_v7 = vadd.f32 1e-05, %v1488_v11  ;;  %v1475_v1 = vadd.f32 %v1474_v54, %v1473_v15  ;;  %v4882_v22 = vadd.f32 %v1699_v18, %v1647_v16  ;;  %v1458_v5 = vrot.slane %v1457_v2, 2 }
 0x316   : > { %v1549_v38 = vmul.f32 %v1533_v3, %v4800_v27  ;;  %v1611_v19 = vrot.slane %v1533_v3, %v4691_v0  ;;  %1816 = vrot.lane.b32.xlu0 %v1782_v58, %s4111_s8  ;;  %v1783_v10 = vmul.f32 0.5, %v1767_v30  ;;  %v1784_v23 = vmul.f32 0.5, %v1768_v48 }
 0x317   : > { %3941 = vrsqrt.f32 %v1504_v7  ;;  %v1491_v26 = vmul.f32 0.125, %v1475_v1  ;;  %v1740_v17 = vmul.f32 0.5, %v4870_v47  ;;  %v1459_v39 = vadd.f32 %v1458_v5, %v1457_v2 }
 0x318   : > { %v1565_v35 = vsub.f32 %v4720_v46, %v1549_v38  ;;  %3943 = vtanh.f32 %v4858_v8  ;;  %v1742_v63 = vmul.f32 0.5, %v4879_v56  ;;  %1818 = vrot.lane.b32.xlu1 %v1783_v10, %s4111_s8  ;;  %v1645_v27 = vmul.f32 %v1611_v19, %v4654_v36 }
 0x319   : > { %v1507_v57 = vadd.f32 1e-05, %v1491_v26  ;;  %3945 = vtanh.f32 %v4798_v60  ;;  %v1460_v14 = vrot.slane %v1459_v39, 1  ;;  %v1743_v4 = vmul.f32 0.5, %v4882_v22 }
 0x31a   : > { %v1691_v15 = vrot.slane %v1565_v35, %v4691_v0  ;;  %1820 = vrot.lane.b32.xlu0 %v1784_v23, %s4111_s8  ;;  %3947 = vtanh.f32 %v4828_v59 }
 0x31b   : > { %3949 = vrsqrt.f32 %v1507_v57  ;;  %v1461_v43 = vadd.f32 %v1460_v14, %v1459_v39 }
 0x31c   : > { %v3940_v8 = vpop.eup %3939  ;;  %v4898_v18 = vadd.f32 %v1691_v15, %v1645_v27  ;;  %3951 = vtanh.f32 %v1740_v17 }
 0x31d   : > { %v1538_v52 = vmul.f32 %v4702_v34, %v3940_v8  ;;  %3953 = vtanh.f32 %v1742_v63  ;;  %v1489_v60 = vmul.f32 0.125, %v1461_v43 }
 0x31e   : > { %v1741_v36 = vmul.f32 0.5, %v4898_v18  ;;  %3955 = vtanh.f32 %v1743_v4 }
 0x31f   : > { %v1554_v45 = vmul.f32 %v1538_v52, %v4818_v37  ;;  %v1631_v11 = vrot.slane %v1538_v52, %v4691_v0  ;;  %v1505_v59 = vadd.f32 1e-05, %v1489_v60 }
 0x320   : > { %3957 = vtanh.f32 %v1741_v36 }
 0x321   : > { %v3942_v54 = vpop.eup %3941  ;;  %v1570_v12 = vsub.f32 %v4720_v46, %v1554_v45  ;;  %3959 = vrsqrt.f32 %v1505_v59  ;;  %v1650_v2 = vmul.f32 %v4694_v41, %v1631_v11 }
 0x322   : > { %v3944_v30 = vpop.eup %3943  ;;  %v1536_v16 = vmul.f32 %v4702_v34, %v3942_v54 }
 0x323   : > { %v3946_v3 = vpop.eup %3945  ;;  %v1711_v58 = vrot.slane %v1570_v12, %v4691_v0  ;;  %v1769_v7 = vadd.f32 1.0, %v3944_v30 }
 0x324   : > { %v3948_v1 = vpop.eup %3947  ;;  %v1552_v37 = vmul.f32 %v1536_v16, %v4831_v28  ;;  %v1623_v48 = vrot.slane %v1536_v16, %v4691_v0  ;;  %v1770_v38 = vadd.f32 1.0, %v3946_v3 }
 0x325   : > { %v3950_v19 = vpop.eup %3949  ;;  %v4910_v5 = vadd.f32 %v1711_v58, %v1650_v2  ;;  %v1785_v26 = vmul.f32 0.5, %v1769_v7  ;;  %v1771_v10 = vadd.f32 1.0, %v3948_v1 }
 0x326   : > { %v3952_v23 = vpop.eup %3951  ;;  %v1568_v17 = vsub.f32 %v4720_v46, %v1552_v37  ;;  %v1539_v35 = vmul.f32 %v4702_v34, %v3950_v19  ;;  %v1786_v41 = vmul.f32 0.5, %v1770_v38  ;;  %v1648_v28 = vmul.f32 %v1623_v48, %v4697_v49 }
 0x327   : > { %v3954_v39 = vpop.eup %3953  ;;  %1822 = vrot.lane.b32.xlu1 %v1785_v26, %s4111_s8  ;;  %v1772_v63 = vadd.f32 1.0, %v3952_v23  ;;  %v1746_v14 = vmul.f32 0.5, %v4910_v5  ;;  %v1787_v4 = vmul.f32 0.5, %v1771_v10 }
 0x328   : > { %v1703_v57 = vrot.slane %v1568_v17, %v4691_v0  ;;  %v1555_v27 = vmul.f32 %v1539_v35, %v4839_v20  ;;  %1824 = vrot.lane.b32.xlu0 %v1786_v41, %s4111_s8  ;;  %v3956_v15 = vpop.eup %3955  ;;  %v1635_v60 = vrot.slane %v1539_v35, %v4691_v0  ;;  %v1774_v45 = vadd.f32 1.0, %v3954_v39 }
 0x329   : > { %v1788_v8 = vmul.f32 0.5, %v1772_v63  ;;  %v1775_v30 = vadd.f32 1.0, %v3956_v15  ;;  %3961 = vtanh.f32 %v1746_v14 }
 0x32a   : > { %v3958_v43 = vpop.eup %3957  ;;  %v4920_v52 = vadd.f32 %v1703_v57, %v1648_v28  ;;  %v1571_v36 = vsub.f32 %v4720_v46, %v1555_v27  ;;  %v1651_v16 = vmul.f32 %v4706_v6, %v1635_v60  ;;  %v1790_v3 = vmul.f32 0.5, %v1774_v45 }
 0x32b   : > { %1826 = vrot.lane.b32.xlu1 %v1787_v4, %s4111_s8  ;;  %v1773_v49 = vadd.f32 1.0, %v3958_v43  ;;  %v3960_v11 = vpop.eup %3959 }
 0x32c   : > { %v1744_v20 = vmul.f32 0.5, %v4920_v52  ;;  %v1715_v59 = vrot.slane %v1571_v36, %v4691_v0  ;;  %1828 = vrot.lane.b32.xlu0 %v1788_v8, %s4111_s8  ;;  %v1537_v54 = vmul.f32 %v4702_v34, %v3960_v11  ;;  %v1791_v34 = vmul.f32 0.5, %v1775_v30 }
 0x32d   : > { %v1789_v12 = vmul.f32 0.5, %v1773_v49 }
 0x32e   : > { %3963 = vtanh.f32 %v1744_v20  ;;  %v1553_v2 = vmul.f32 %v1537_v54, %v4860_v9  ;;  %v1627_v58 = vrot.slane %v1537_v54, %v4691_v0  ;;  %v4933_v7 = vadd.f32 %v1715_v59, %v1651_v16 }
 0x32f   : > { %1830 = vrot.lane.b32.xlu1 %v1789_v12, %s4111_s8 }
 0x330   : > { %1832 = vrot.lane.b32.xlu0 %v1790_v3, %s4111_s8  ;;  %v1569_v1 = vsub.f32 %v4720_v46, %v1553_v2  ;;  %v1649_v37 = vmul.f32 %v1627_v58, %v4709_v32  ;;  %v1747_v6 = vmul.f32 0.5, %v4933_v7 }
 0x332   : > { %v1707_v48 = vrot.slane %v1569_v1, %v4691_v0  ;;  %3965 = vtanh.f32 %v1747_v6 }
 0x333   : > { %1834 = vrot.lane.b32.xlu1 %v1791_v34, %s4111_s8  ;;  %v3962_v38 = vpop.eup %3961 }
 0x334   : > { %v4941_v9 = vadd.f32 %v1707_v48, %v1649_v37  ;;  %v1778_v46 = vadd.f32 1.0, %v3962_v38  ;;  %v5919_v48 = vld [vmem:[#allocation3_spill] sm:$0xff] }
 0x336   : > { %v1745_v19 = vmul.f32 0.5, %v4941_v9  ;;  %v1794_v32 = vmul.f32 0.5, %v1778_v46  ;;  %v5923_v46 = vld [vmem:[#allocation5_spill] sm:$0xff] }
 0x338   : > { %v3964_v26 = vpop.eup %3963  ;;  %3967 = vtanh.f32 %v1745_v19  ;;  %v5920_v19 = vld [vmem:[#allocation4_spill] sm:$0xff] }
 0x339   : > { %v1776_v10 = vadd.f32 1.0, %v3964_v26 }
 0x33b   : > { %v1792_v23 = vmul.f32 0.5, %v1776_v10 }
 0x33c   : > { %v3966_v0 = vpop.eup %3965 }
 0x33d   : > { %1836 = vrot.lane.b32.xlu0 %v1792_v23, %s4111_s8  ;;  %v1779_v39 = vadd.f32 1.0, %v3966_v0 }
 0x33f   : > { %v1795_v63 = vmul.f32 0.5, %v1779_v39 }
 0x341   : > { %1840 = vrot.lane.b32.xlu0 %v1794_v32, %s4111_s8 }
 0x342   : > { %v3968_v17 = vpop.eup %3967 }
 0x343   : > { %v1777_v35 = vadd.f32 1.0, %v3968_v17 }
 0x345   : > { %v1793_v41 = vmul.f32 0.5, %v1777_v35 }
 0x347   : > { %1838 = vrot.lane.b32.xlu1 %v1793_v41, %s4111_s8 }
 0x34b   : > { %1842 = vrot.lane.b32.xlu1 %v1795_v63, %s4111_s8 }
 0x382   : > { %v1813_v28 = vpop.permute.xlu0 %1812 }
 0x383   : > { %v1860_v57 = vmul.f32 %v1813_v28, %v4738_v50 }
 0x385   : > { %v1876_v15 = vadd.f32 %v1860_v57, %v4529_v33 }
 0x386   : > { %v1815_v27 = vpop.permute.xlu1 %1814 }
 0x387   : > { %v1861_v14 = vmul.f32 %v1815_v27, %v4762_v42  ;;  %v4953_v60 = vmul.f32 0.70710677, %v1876_v15  ;;  %v5927_v27 = vld [vmem:[#allocation7_spill] sm:$0xff] }
 0x388   : > { %v1817_v4 = vpop.permute.xlu0 %1816 }
 0x389   : > { %v1862_v8 = vmul.f32 %v1817_v4, %v4736_v53  ;;  %v1877_v43 = vadd.f32 %v1861_v14, %v4532_v13 }
 0x38a   : > { %v1819_v36 = vpop.permute.xlu1 %1818 }
 0x38b   : > { %v4955_v45 = vmul.f32 0.70710677, %v1877_v43  ;;  %v1878_v49 = vadd.f32 %v1862_v8, %v4535_v31  ;;  %v1863_v11 = vmul.f32 %v1819_v36, %v4742_v21  ;;  %v5928_v8 = vld [vmem:[#allocation8_spill] sm:$0xff] }
 0x38c   : > { %v1821_v53 = vpop.permute.xlu0 %1820 }
 0x38d   : > { %v1908_v50 = vpack.c.bf16 %v4955_v45, %v4953_v60  ;;  %v1879_v33 = vadd.f32 %v1863_v11, %v4526_v40  ;;  %v4962_v42 = vmul.f32 0.70710677, %v1878_v49  ;;  %v1864_v31 = vmul.f32 %v1821_v53, %v4802_v24  ;;  %v5932_v53 = vld [vmem:[#allocation10_spill] sm:$0xff] }
 0x38f   : > { %v4964_v20 = vmul.f32 0.70710677, %v1879_v33  ;;  %3793 = vmatprep.mubr.msk.bf16.mxu1 %vm1082_vm1, %v1908_v50  ;;  %v1880_v59 = vadd.f32 %v1864_v31, %v4545_v51  ;;  %v5931_v50 = vld [vmem:[#allocation9_spill] sm:$0xff] }
 0x391   : > { %v1909_v13 = vpack.c.bf16 %v4964_v20, %v4962_v42  ;;  %v4975_v3 = vmul.f32 0.70710677, %v1880_v59 }
 0x393   : > { %3794 = vmatmul.mubr.msk.bf16.vlgmr.msra.gmra.mrb[16].mxu1 %vm1082_vm1, %v1909_v13 }
 0x399   : > { %v1823_v21 = vpop.permute.xlu1 %1822 }
 0x39a   : > { %v1865_v54 = vmul.f32 %v1823_v21, %v4848_v29  ;;  %v1825_v40 = vpop.permute.xlu0 %1824 }
 0x39b   : > { %v1866_v12 = vmul.f32 %v1825_v40, %v4788_v61 }
 0x39c   : > { %v1881_v30 = vadd.f32 %v1865_v54, %v4540_v44 }
 0x39d   : > { %v1827_v16 = vpop.permute.xlu1 %1826  ;;  %v1882_v58 = vadd.f32 %v1866_v12, %v4553_v25 }
 0x39e   : > { %v4977_v2 = vmul.f32 0.70710677, %v1881_v30  ;;  %v1867_v1 = vmul.f32 %v1827_v16, %v4815_v55  ;;  %v1829_v24 = vpop.permute.xlu0 %1828 }
 0x39f   : > { %v1868_v34 = vmul.f32 %v1829_v24, %v4870_v47  ;;  %v4985_v37 = vmul.f32 0.70710677, %v1882_v58 }
 0x3a0   : > { %v1910_v51 = vpack.c.bf16 %v4977_v2, %v4975_v3  ;;  %v1883_v29 = vadd.f32 %v1867_v1, %v4556_v62 }
 0x3a1   : > { %v1831_v61 = vpop.permute.xlu1 %1830  ;;  %v1884_v6 = vadd.f32 %v1868_v34, %v5919_v48 }
 0x3a2   : > { %v4987_v44 = vmul.f32 0.70710677, %v1883_v29  ;;  %v1869_v38 = vmul.f32 %v1831_v61, %v4898_v18  ;;  %3797 = vmatprep.mubr.msk.bf16.mxu1 %vm1082_vm1, %v1910_v51  ;;  %v1833_v25 = vpop.permute.xlu0 %1832 }
 0x3a3   : > { %v1870_v55 = vmul.f32 %v1833_v25, %v4879_v56  ;;  %v4996_v10 = vmul.f32 0.70710677, %v1884_v6  ;;  %v5924_v56 = vld [vmem:[#allocation6_spill] sm:$0xff] }
 0x3a4   : > { %5918 = vst [vmem:[#allocation11_spill] sm:$0xff] %v4987_v44  ;;  %v1911_v47 = vpack.c.bf16 %v4987_v44, %v4985_v37  ;;  %v1885_v26 = vadd.f32 %v1869_v38, %v5920_v19 }
 0x3a5   : > { %v1835_v62 = vpop.permute.xlu1 %1834  ;;  %5921 = vst [vmem:[#allocation3_spill] sm:$0xff] %v4996_v10  ;;  %v1886_v32 = vadd.f32 %v1870_v55, %v5923_v46 }
 0x3a6   : > { %v4998_v23 = vmul.f32 0.70710677, %v1885_v26  ;;  %v1871_v0 = vmul.f32 %v1835_v62, %v4882_v22  ;;  %3798 = vmatmul.mubr.msk.bf16.gmra.mrb[20].mxu1 %vm1082_vm1, %v1911_v47 }
 0x3a7   : > { %v5006_v35 = vmul.f32 0.70710677, %v1886_v32 }
 0x3a8   : > { %5922 = vst [vmem:[#allocation4_spill] sm:$0xff] %v4998_v23  ;;  %v1912_v18 = vpack.c.bf16 %v4998_v23, %v4996_v10  ;;  %v1887_v17 = vadd.f32 %v1871_v0, %v5924_v56 }
 0x3a9   : > { %5925 = vst [vmem:[#allocation5_spill] sm:$0xff] %v5006_v35 }
 0x3aa   : > { %v5008_v41 = vmul.f32 0.70710677, %v1887_v17  ;;  %3801 = vmatprep.mubr.msk.bf16.mxu1 %vm1082_vm1, %v1912_v18 }
 0x3ac   : > { %5926 = vst [vmem:[#allocation6_spill] sm:$0xff] %v5008_v41  ;;  %v1913_v39 = vpack.c.bf16 %v5008_v41, %v5006_v35 }
 0x3ae   : > { %3802 = vmatmul.mubr.msk.bf16.gmra.mrb[24].mxu1 %vm1082_vm1, %v1913_v39 }
 0x3af   : > { %v1837_v63 = vpop.permute.xlu0 %1836 }
 0x3b0   : > { %v1872_v22 = vmul.f32 %v1837_v63, %v4920_v52 }
 0x3b2   : > { %v1888_v15 = vadd.f32 %v1872_v22, %v5927_v27 }
 0x3b3   : > { %v1841_v28 = vpop.permute.xlu0 %1840 }
 0x3b4   : > { %v1874_v4 = vmul.f32 %v1841_v28, %v4910_v5  ;;  %v5019_v49 = vmul.f32 0.70710677, %v1888_v15 }
 0x3b6   : > { %5929 = vst [vmem:[#allocation7_spill] sm:$0xff] %v5019_v49  ;;  %v1890_v33 = vadd.f32 %v1874_v4, %v5931_v50 }
 0x3b8   : > { %v5028_v21 = vmul.f32 0.70710677, %v1890_v33 }
 0x3b9   : > { %v1839_v57 = vpop.permute.xlu1 %1838 }
 0x3ba   : > { %v1873_v14 = vmul.f32 %v1839_v57, %v4941_v9  ;;  %5933 = vst [vmem:[#allocation9_spill] sm:$0xff] %v5028_v21 }
 0x3bc   : > { %v1889_v43 = vadd.f32 %v1873_v14, %v5928_v8 }
 0x3bd   : > { %v1843_v36 = vpop.permute.xlu1 %1842 }
 0x3be   : > { %v5021_v11 = vmul.f32 0.70710677, %v1889_v43  ;;  %v1875_v13 = vmul.f32 %v1843_v36, %v4933_v7 }
 0x3c0   : > { %5930 = vst [vmem:[#allocation8_spill] sm:$0xff] %v5021_v11  ;;  %v1914_v52 = vpack.c.bf16 %v5021_v11, %v5019_v49  ;;  %v1891_v31 = vadd.f32 %v1875_v13, %v5932_v53 }
 0x3c2   : > { %v5030_v9 = vmul.f32 0.70710677, %v1891_v31  ;;  %3805 = vmatprep.mubr.msk.bf16.mxu1 %vm1082_vm1, %v1914_v52 }
 0x3c4   : > { %5934 = vst [vmem:[#allocation10_spill] sm:$0xff] %v5030_v9  ;;  %v1915_v5 = vpack.c.bf16 %v5030_v9, %v5028_v21 }
 0x3c6   : > { %3806 = vmatmul.mubr.msk.bf16.gmra.mrb[28].mxu1 %vm1082_vm1, %v1915_v5 }
 0x466   : > { %v5036_v59 = vpop.f32.mrb[16].mxu1 }
 0x467   : > { %v2060_v7 = vsel %vm271_vm0, %v5036_v59, 0.0  ;;  %v5040_v54 = vpop.f32.mrb[17].mxu1 }
 0x468   : > { %v2061_v40 = vrot.slane %v2060_v7, 4  ;;  %v2046_v12 = vsel %vm271_vm0, %v5040_v54, 0.0  ;;  %v5044_v30 = vpop.f32.mrb[18].mxu1 }
 0x469   : > { %v2047_v16 = vrot.slane %v2046_v12, 4  ;;  %v2067_v58 = vsel %vm271_vm0, %v5044_v30, 0.0  ;;  %v5048_v1 = vpop.f32.mrb[19].mxu1 }
 0x46a   : > { %v2062_v24 = vadd.f32 %v2061_v40, %v2060_v7  ;;  %v2068_v34 = vrot.slane %v2067_v58, 4  ;;  %v2053_v51 = vsel %vm271_vm0, %v5048_v1, 0.0 }
 0x46b   : > { %v2048_v29 = vadd.f32 %v2047_v16, %v2046_v12  ;;  %v2054_v61 = vrot.slane %v2053_v51, 4 }
 0x46c   : > { %v2063_v48 = vrot.slane %v2062_v24, 2  ;;  %v2069_v6 = vadd.f32 %v2068_v34, %v2067_v58 }
 0x46d   : > { %v2049_v38 = vrot.slane %v2048_v29, 2  ;;  %v2055_v25 = vadd.f32 %v2054_v61, %v2053_v51 }
 0x46e   : > { %v2064_v55 = vadd.f32 %v2063_v48, %v2062_v24  ;;  %v2070_v47 = vrot.slane %v2069_v6, 2 }
 0x46f   : > { %v2050_v19 = vadd.f32 %v2049_v38, %v2048_v29  ;;  %v2056_v26 = vrot.slane %v2055_v25, 2 }
 0x470   : > { %v2065_v62 = vrot.slane %v2064_v55, 1  ;;  %v2071_v46 = vadd.f32 %v2070_v47, %v2069_v6 }
 0x471   : > { %v2051_v32 = vrot.slane %v2050_v19, 1  ;;  %v2057_v0 = vadd.f32 %v2056_v26, %v2055_v25 }
 0x472   : > { %v2066_v18 = vadd.f32 %v2065_v62, %v2064_v55  ;;  %v2072_v56 = vrot.slane %v2071_v46, 1 }
 0x473   : > { %v2052_v17 = vadd.f32 %v2051_v32, %v2050_v19  ;;  %v2058_v39 = vrot.slane %v2057_v0, 1 }
 0x474   : > { %v5052_v63 = vmul.f32 0.125, %v2066_v18  ;;  %v2073_v22 = vadd.f32 %v2072_v56, %v2071_v46 }
 0x475   : > { %v5054_v28 = vmul.f32 0.125, %v2052_v17  ;;  %v2059_v57 = vadd.f32 %v2058_v39, %v2057_v0 }
 0x476   : > { %v2176_v27 = vsub.f32 %v5036_v59, %v5052_v63  ;;  %v5058_v15 = vmul.f32 0.125, %v2073_v22 }
 0x477   : > { %v2174_v14 = vsub.f32 %v5040_v54, %v5054_v28  ;;  %v5062_v4 = vmul.f32 0.125, %v2059_v57 }
 0x478   : > { %v2192_v8 = vmul.f32 %v2176_v27, %v2176_v27  ;;  %v2177_v43 = vsub.f32 %v5044_v30, %v5058_v15 }
 0x479   : > { %v5066_v36 = vpop.f32.mrb[20].mxu1  ;;  %v2190_v50 = vmul.f32 %v2174_v14, %v2174_v14  ;;  %v2175_v33 = vsub.f32 %v5048_v1, %v5062_v4 }
 0x47a   : > { %v2088_v13 = vsel %vm271_vm0, %v5066_v36, 0.0  ;;  %v5072_v52 = vpop.f32.mrb[21].mxu1  ;;  %v2220_v53 = vsel %vm271_vm0, %v2192_v8, 0.0  ;;  %v2193_v31 = vmul.f32 %v2177_v43, %v2177_v43 }
 0x47b   : > { %v2089_v5 = vrot.slane %v2088_v13, 4  ;;  %v2074_v7 = vsel %vm271_vm0, %v5072_v52, 0.0  ;;  %v5077_v40 = vpop.f32.mrb[22].mxu1  ;;  %v2221_v12 = vrot.slane %v2220_v53, 4  ;;  %v2206_v16 = vsel %vm271_vm0, %v2190_v50, 0.0 }
 0x47c   : > { %v2191_v58 = vmul.f32 %v2175_v33, %v2175_v33  ;;  %v2075_v24 = vrot.slane %v2074_v7, 4  ;;  %v5080_v34 = vpop.f32.mrb[23].mxu1  ;;  %v2207_v51 = vrot.slane %v2206_v16, 4  ;;  %v2227_v29 = vsel %vm271_vm0, %v2193_v31, 0.0 }
 0x47d   : > { %v2090_v61 = vadd.f32 %v2089_v5, %v2088_v13  ;;  %v2095_v48 = vsel %vm271_vm0, %v5077_v40, 0.0  ;;  %v2222_v6 = vadd.f32 %v2221_v12, %v2220_v53  ;;  %v2228_v38 = vrot.slane %v2227_v29, 4 }
 0x47e   : > { %v2213_v25 = vsel %vm271_vm0, %v2191_v58, 0.0  ;;  %v2076_v55 = vadd.f32 %v2075_v24, %v2074_v7  ;;  %v2208_v47 = vadd.f32 %v2207_v51, %v2206_v16  ;;  %v2096_v62 = vrot.slane %v2095_v48, 4 }
 0x47f   : > { %v2214_v19 = vrot.slane %v2213_v25, 4  ;;  %v2091_v26 = vrot.slane %v2090_v61, 2  ;;  %v2223_v46 = vrot.slane %v2222_v6, 2  ;;  %v2229_v32 = vadd.f32 %v2228_v38, %v2227_v29 }
 0x480   : > { %v2077_v0 = vrot.slane %v2076_v55, 2  ;;  %v2081_v18 = vsel %vm271_vm0, %v5080_v34, 0.0  ;;  %v2209_v56 = vrot.slane %v2208_v47, 2  ;;  %v2097_v22 = vadd.f32 %v2096_v62, %v2095_v48 }
 0x481   : > { %v2215_v17 = vadd.f32 %v2214_v19, %v2213_v25  ;;  %v2092_v39 = vadd.f32 %v2091_v26, %v2090_v61  ;;  %v5088_v57 = vpop.f32.mrb[24].mxu1  ;;  %v2224_v27 = vadd.f32 %v2223_v46, %v2222_v6  ;;  %v2230_v14 = vrot.slane %v2229_v32, 2 }
 0x482   : > { %v2078_v8 = vadd.f32 %v2077_v0, %v2076_v55  ;;  %v2082_v43 = vrot.slane %v2081_v18, 4  ;;  %v5090_v50 = vpop.f32.mrb[25].mxu1  ;;  %v2210_v33 = vadd.f32 %v2209_v56, %v2208_v47  ;;  %v2098_v31 = vrot.slane %v2097_v22, 2 }
 0x483   : > { %v2216_v13 = vrot.slane %v2215_v17, 2  ;;  %v2093_v53 = vrot.slane %v2092_v39, 1  ;;  %v5092_v5 = vpop.f32.mrb[26].mxu1  ;;  %v2225_v7 = vrot.slane %v2224_v27, 1  ;;  %v2231_v12 = vadd.f32 %v2230_v14, %v2229_v32 }
 0x484   : > { %v2079_v16 = vrot.slane %v2078_v8, 1  ;;  %v2083_v58 = vadd.f32 %v2082_v43, %v2081_v18  ;;  %v5094_v24 = vpop.f32.mrb[27].mxu1  ;;  %v2211_v51 = vrot.slane %v2210_v33, 1  ;;  %v2099_v48 = vadd.f32 %v2098_v31, %v2097_v22 }
 0x485   : > { %v2217_v29 = vadd.f32 %v2216_v13, %v2215_v17  ;;  %v2094_v61 = vadd.f32 %v2093_v53, %v2092_v39  ;;  %v2226_v6 = vadd.f32 %v2225_v7, %v2224_v27  ;;  %v2232_v38 = vrot.slane %v2231_v12, 1 }
 0x486   : > { %v2080_v25 = vadd.f32 %v2079_v16, %v2078_v8  ;;  %v2084_v55 = vrot.slane %v2083_v58, 2  ;;  %v2212_v47 = vadd.f32 %v2211_v51, %v2210_v33  ;;  %v2100_v62 = vrot.slane %v2099_v48, 1 }
 0x487   : > { %v2218_v19 = vrot.slane %v2217_v29, 1  ;;  %v5096_v26 = vmul.f32 0.125, %v2094_v61  ;;  %v2320_v46 = vmul.f32 0.125, %v2226_v6  ;;  %v2233_v0 = vadd.f32 %v2232_v38, %v2231_v12 }
 0x488   : > { %v5098_v32 = vmul.f32 0.125, %v2080_v25  ;;  %v2085_v18 = vadd.f32 %v2084_v55, %v2083_v58  ;;  %v2318_v56 = vmul.f32 0.125, %v2212_v47  ;;  %v2101_v39 = vadd.f32 %v2100_v62, %v2099_v48  ;;  %v3840_v47 = vld [vmem:[%s5878_s2 + $0x10] sm:$0xff]  }
 0x489   : > { %v2219_v14 = vadd.f32 %v2218_v19, %v2217_v29  ;;  %v2180_v17 = vsub.f32 %v5066_v36, %v5096_v26  ;;  %v2336_v22 = vadd.f32 1e-05, %v2320_v46  ;;  %v2321_v27 = vmul.f32 0.125, %v2233_v0  ;;  %3809 = vmatprep.subr.bf16.mxu0 %v3840_v47 }
 0x48a   : > { %v2178_v8 = vsub.f32 %v5072_v52, %v5098_v32  ;;  %v2086_v43 = vrot.slane %v2085_v18, 1  ;;  %v2334_v33 = vadd.f32 1e-05, %v2318_v56  ;;  %v5104_v31 = vmul.f32 0.125, %v2101_v39  ;;  %3810 = vmatpush3.bf16.msra.mxu0 %v3840_v47 }
 0x48b   : > { %v2319_v13 = vmul.f32 0.125, %v2219_v14  ;;  %v2196_v53 = vmul.f32 %v2180_v17, %v2180_v17  ;;  %3969 = vrsqrt.f32 %v2336_v22  ;;  %v2337_v7 = vadd.f32 1e-05, %v2321_v27 }
 0x48c   : > { %v2194_v12 = vmul.f32 %v2178_v8, %v2178_v8  ;;  %v2087_v16 = vadd.f32 %v2086_v43, %v2085_v18  ;;  %3971 = vrsqrt.f32 %v2334_v33  ;;  %v2181_v29 = vsub.f32 %v5077_v40, %v5104_v31 }
 0x48d   : > { %v2335_v58 = vadd.f32 1e-05, %v2319_v13  ;;  %v2248_v51 = vsel %vm271_vm0, %v2196_v53, 0.0  ;;  %3973 = vrsqrt.f32 %v2337_v7  ;;  %v2116_v55 = vsel %vm271_vm0, %v5088_v57, 0.0 }
 0x48e   : > { %v2249_v61 = vrot.slane %v2248_v51, 4  ;;  %v2234_v48 = vsel %vm271_vm0, %v2194_v12, 0.0  ;;  %v5110_v6 = vmul.f32 0.125, %v2087_v16  ;;  %v2197_v25 = vmul.f32 %v2181_v29, %v2181_v29  ;;  %v5935_v29 = vld [vmem:[#allocation2_spill] sm:$0xff] }
 0x48f   : > { %3975 = vrsqrt.f32 %v2335_v58  ;;  %v2235_v38 = vrot.slane %v2234_v48, 4  ;;  %v2117_v46 = vrot.slane %v2116_v55, 4  ;;  %v2102_v0 = vsel %vm271_vm0, %v5090_v50, 0.0 }
 0x490   : > { %v2250_v19 = vadd.f32 %v2249_v61, %v2248_v51  ;;  %v2179_v62 = vsub.f32 %v5080_v34, %v5110_v6  ;;  %v2255_v56 = vsel %vm271_vm0, %v2197_v25, 0.0  ;;  %v2103_v14 = vrot.slane %v2102_v0, 4  ;;  %v5131_v25 = vld [vmem:[%s5879_s3] sm:$0xf] }
 0x491   : > { %v2236_v18 = vadd.f32 %v2235_v38, %v2234_v48  ;;  %v2123_v17 = vsel %vm271_vm0, %v5092_v5, 0.0  ;;  %v2256_v22 = vrot.slane %v2255_v56, 4  ;;  %v2118_v8 = vadd.f32 %v2117_v46, %v2116_v55 }
 0x492   : > { %v2251_v39 = vrot.slane %v2250_v19, 2  ;;  %v2195_v27 = vmul.f32 %v2179_v62, %v2179_v62  ;;  %v2104_v53 = vadd.f32 %v2103_v14, %v2102_v0  ;;  %v2124_v58 = vrot.slane %v2123_v17, 4 }
 0x493   : > { %v2237_v43 = vrot.slane %v2236_v18, 2  ;;  %v2257_v13 = vadd.f32 %v2256_v22, %v2255_v56  ;;  %v2119_v16 = vrot.slane %v2118_v8, 2  ;;  %v5126_v61 = vsub.s32 2, %v5935_v29 }
 0x494   : > { %v2252_v33 = vadd.f32 %v2251_v39, %v2250_v19  ;;  %v2241_v12 = vsel %vm271_vm0, %v2195_v27, 0.0  ;;  %v2109_v62 = vsel %vm271_vm0, %v5094_v24, 0.0  ;;  %v2105_v14 = vrot.slane %v2104_v53, 2 }
 0x495   : > { %v2238_v7 = vadd.f32 %v2237_v43, %v2236_v18  ;;  %v3970_v51 = vpop.eup %3969  ;;  %v2258_v19 = vrot.slane %v2257_v13, 2  ;;  %v2242_v56 = vrot.slane %v2241_v12, 4  ;;  %v2120_v43 = vadd.f32 %v2119_v16, %v2118_v8 }
 0x496   : > { %v2253_v48 = vrot.slane %v2252_v33, 1  ;;  %v3972_v38 = vpop.eup %3971  ;;  %v2368_v55 = vmul.f32 %v5131_v25, %v3970_v51  ;;  %v2125_v29 = vadd.f32 %v2124_v58, %v2123_v17 }
 0x497   : > { %v2239_v47 = vrot.slane %v2238_v7, 1  ;;  %v3974_v46 = vpop.eup %3973  ;;  %v2366_v0 = vmul.f32 %v5131_v25, %v3972_v38  ;;  %v2259_v17 = vadd.f32 %v2258_v19, %v2257_v13  ;;  %v2243_v58 = vadd.f32 %v2242_v56, %v2241_v12 }
 0x498   : > { %v2254_v18 = vadd.f32 %v2253_v48, %v2252_v33  ;;  %v2384_v22 = vmul.f32 %v2368_v55, %v5052_v63  ;;  %v2369_v27 = vmul.f32 %v5131_v25, %v3974_v46  ;;  %v5146_v33 = vld [vmem:[%s5880_s4] sm:$0xf]  ;;  %v2425_v63 = vrot.slane %v2368_v55, %v5126_v61 }
 0x499   : > { %v3976_v39 = vpop.eup %3975  ;;  %v2382_v51 = vmul.f32 %v2366_v0, %v5054_v28  ;;  %v2240_v11 = vadd.f32 %v2239_v47, %v2238_v7  ;;  %v5141_v49 = vpop.f32.mrb[28].mxu1  ;;  %v2417_v7 = vrot.slane %v2366_v0, %v5126_v61  ;;  %v2110_v38 = vrot.slane %v2109_v62, 4 }
 0x49a   : > { %v2367_v9 = vmul.f32 %v5131_v25, %v3976_v39  ;;  %v2324_v21 = vmul.f32 0.125, %v2254_v18  ;;  %v2400_v48 = vsub.f32 %v5146_v33, %v2384_v22  ;;  %v2385_v8 = vmul.f32 %v2369_v27, %v5058_v15  ;;  %v5151_v16 = vpop.f32.mrb[29].mxu1 }
 0x49b   : > { %v2398_v28 = vsub.f32 %v5146_v33, %v2382_v51  ;;  %v5155_v47 = vpop.f32.mrb[30].mxu1  ;;  %v2429_v46 = vrot.slane %v2369_v27, %v5126_v61  ;;  %v2121_v22 = vrot.slane %v2120_v43, 1  ;;  %v2322_v19 = vmul.f32 0.125, %v2240_v11 }
 0x49c   : > { %v2383_v18 = vmul.f32 %v2367_v9, %v5062_v4  ;;  %v2340_v39 = vadd.f32 1e-05, %v2324_v21  ;;  %v5159_v55 = vpop.f32.mrb[31].mxu1  ;;  %v2505_v15 = vrot.slane %v2400_v48, %v5126_v61  ;;  %v2421_v13 = vrot.slane %v2367_v9, %v5126_v61 }
 0x49d   : > { %v2106_v51 = vadd.f32 %v2105_v14, %v2104_v53  ;;  %v2480_v0 = vmul.f32 %v5036_v59, %v2425_v63  ;;  %v2401_v12 = vsub.f32 %v5146_v33, %v2385_v8  ;;  %v2260_v56 = vrot.slane %v2259_v17, 1 }
 0x49e   : > { %3977 = vrsqrt.f32 %v2340_v39  ;;  %v2478_v27 = vmul.f32 %v2417_v7, %v5040_v54  ;;  %v2497_v4 = vrot.slane %v2398_v28, %v5126_v61  ;;  %v2338_v21 = vadd.f32 1e-05, %v2322_v19 }
 0x49f   : > { %v2244_v41 = vrot.slane %v2243_v58, 2  ;;  %v2481_v35 = vmul.f32 %v5044_v30, %v2429_v46  ;;  %v2399_v48 = vsub.f32 %v5146_v33, %v2383_v18  ;;  %v2261_v23 = vadd.f32 %v2260_v56, %v2259_v17 }
 0x4a0   : > { %v2122_v9 = vadd.f32 %v2121_v22, %v2120_v43  ;;  %v5169_v11 = vadd.f32 %v2505_v15, %v2480_v0  ;;  %v2479_v59 = vmul.f32 %v2421_v13, %v5048_v1  ;;  %3979 = vrsqrt.f32 %v2338_v21 }
 0x4a1   : > { %v2245_v53 = vadd.f32 %v2244_v41, %v2243_v58  ;;  %v2509_v14 = vrot.slane %v2401_v12, %v5126_v61  ;;  %v2325_v63 = vmul.f32 0.125, %v2261_v23  ;;  %v2107_v8 = vrot.slane %v2106_v51, 1 }
 0x4a2   : > { %v5173_v54 = vmul.f32 0.125, %v2122_v9  ;;  %v5175_v28 = vadd.f32 %v2497_v4, %v2478_v27  ;;  %v2126_v30 = vrot.slane %v2125_v29, 2  ;;  %v2111_v46 = vadd.f32 %v2110_v38, %v2109_v62 }
 0x4a3   : > { %v2246_v7 = vrot.slane %v2245_v53, 1  ;;  %v2341_v18 = vadd.f32 1e-05, %v2325_v63  ;;  %v2108_v17 = vadd.f32 %v2107_v8, %v2106_v51  ;;  %v2144_v1 = vsel %vm271_vm0, %v5141_v49, 0.0 }
 0x4a4   : > { %v2184_v43 = vsub.f32 %v5088_v57, %v5173_v54  ;;  %v2127_v58 = vadd.f32 %v2126_v30, %v2125_v29  ;;  %v2112_v39 = vrot.slane %v2111_v46, 2  ;;  %v2145_v23 = vrot.slane %v2144_v1, 4 }
 0x4a5   : > { %v2247_v41 = vadd.f32 %v2246_v7, %v2245_v53  ;;  %v2501_v22 = vrot.slane %v2399_v48, %v5126_v61  ;;  %3981 = vrsqrt.f32 %v2341_v18  ;;  %v5182_v13 = vmul.f32 0.125, %v2108_v17 }
 0x4a6   : > { %v2200_v15 = vmul.f32 %v2184_v43, %v2184_v43  ;;  %v2128_v62 = vrot.slane %v2127_v58, 1  ;;  %v2113_v38 = vadd.f32 %v2112_v39, %v2111_v46  ;;  %v2146_v0 = vadd.f32 %v2145_v23, %v2144_v1 }
 0x4a7   : > { %v2323_v19 = vmul.f32 0.125, %v2247_v41  ;;  %v5185_v51 = vmul.f32 0.5, %v5169_v11  ;;  %v5187_v56 = vadd.f32 %v2509_v14, %v2481_v35  ;;  %v2182_v27 = vsub.f32 %v5090_v50, %v5182_v13 }
 0x4a8   : > { %v3978_v12 = vpop.eup %3977  ;;  %v2276_v29 = vsel %vm271_vm0, %v2200_v15, 0.0  ;;  %v2129_v9 = vadd.f32 %v2128_v62, %v2127_v58  ;;  %v5194_v53 = vmul.f32 0.5, %v5175_v28  ;;  %v5196_v63 = vadd.f32 %v2501_v22, %v2479_v59 }
 0x4a9   : > { %v2372_v4 = vmul.f32 %v5131_v25, %v3978_v12  ;;  %v2339_v21 = vadd.f32 1e-05, %v2323_v19  ;;  %v2277_v48 = vrot.slane %v2276_v29, 4  ;;  %v2198_v8 = vmul.f32 %v2182_v27, %v2182_v27 }
 0x4aa   : > { %v2114_v7 = vrot.slane %v2113_v38, 1  ;;  %v3980_v30 = vpop.eup %3979  ;;  %v2147_v46 = vrot.slane %v2146_v0, 2  ;;  %v5201_v17 = vmul.f32 0.125, %v2129_v9  ;;  %v2130_v39 = vsel %vm271_vm0, %v5151_v16, 0.0 }
 0x4ab   : > { %v2388_v35 = vmul.f32 %v2372_v4, %v5096_v26  ;;  %3983 = vrsqrt.f32 %v2339_v21  ;;  %v2278_v14 = vadd.f32 %v2277_v48, %v2276_v29  ;;  %v2370_v18 = vmul.f32 %v5131_v25, %v3980_v30 }
 0x4ac   : > { %v2262_v43 = vsel %vm271_vm0, %v2198_v8, 0.0  ;;  %v2115_v1 = vadd.f32 %v2114_v7, %v2113_v38  ;;  %v2441_v23 = vrot.slane %v2372_v4, %v5126_v61  ;;  %v2185_v22 = vsub.f32 %v5092_v5, %v5201_v17 }
 0x4ad   : > { %v2404_v41 = vsub.f32 %v5146_v33, %v2388_v35  ;;  %v2279_v58 = vrot.slane %v2278_v14, 2  ;;  %v2263_v59 = vrot.slane %v2262_v43, 4  ;;  %v2386_v26 = vmul.f32 %v2370_v18, %v5098_v32 }
 0x4ae   : > { %v5210_v15 = vmul.f32 0.125, %v2115_v1  ;;  %v5213_v19 = vmul.f32 0.5, %v5187_v56  ;;  %v2148_v12 = vadd.f32 %v2147_v46, %v2146_v0  ;;  %v5216_v27 = vmul.f32 0.5, %v5196_v63 }
 0x4af   : > { %v2280_v62 = vadd.f32 %v2279_v58, %v2278_v14  ;;  %v2264_v38 = vadd.f32 %v2263_v59, %v2262_v43  ;;  %v3982_v29 = vpop.eup %3981  ;;  %v2521_v21 = vrot.slane %v2404_v41, %v5126_v61  ;;  %v2201_v4 = vmul.f32 %v2185_v22, %v2185_v22 }
 0x4b0   : > { %v2183_v32 = vsub.f32 %v5094_v24, %v5210_v15  ;;  %v2433_v48 = vrot.slane %v2370_v18, %v5126_v61  ;;  %v2131_v7 = vrot.slane %v2130_v39, 4  ;;  %v2484_v30 = vmul.f32 %v5066_v36, %v2441_v23 }
 0x4b1   : > { %v2281_v9 = vrot.slane %v2280_v62, 1  ;;  %v2265_v8 = vrot.slane %v2264_v38, 2  ;;  %v2402_v35 = vsub.f32 %v5146_v33, %v2386_v26  ;;  %v2283_v0 = vsel %vm271_vm0, %v2201_v4, 0.0 }
 0x4b2   : > { %v2199_v14 = vmul.f32 %v2183_v32, %v2183_v32  ;;  %v5226_v46 = vmul.f32 %v5131_v25, %v3982_v29  ;;  %v2149_v1 = vrot.slane %v2148_v12, 1  ;;  %v2151_v41 = vsel %vm271_vm0, %v5155_v47, 0.0 }
 0x4b3   : > { %v2282_v43 = vadd.f32 %v2281_v9, %v2280_v62  ;;  %v5230_v58 = vadd.f32 %v2521_v21, %v2484_v30  ;;  %v2266_v18 = vadd.f32 %v2265_v8, %v2264_v38  ;;  %v2284_v59 = vrot.slane %v2283_v0, 4 }
 0x4b4   : > { %v2269_v22 = vsel %vm271_vm0, %v2199_v14, 0.0  ;;  %v2482_v23 = vmul.f32 %v2433_v48, %v5072_v52  ;;  %v2132_v32 = vadd.f32 %v2131_v7, %v2130_v39  ;;  %v2513_v29 = vrot.slane %v2402_v35, %v5126_v61 }
 0x4b5   : > { %v3984_v36 = vpop.eup %3983  ;;  %v2328_v26 = vmul.f32 0.125, %v2282_v43  ;;  %v2270_v4 = vrot.slane %v2269_v22, 4  ;;  %v2267_v9 = vrot.slane %v2266_v18, 1  ;;  %v2285_v10 = vadd.f32 %v2284_v59, %v2283_v0 }
 0x4b6   : > { %v2371_v62 = vmul.f32 %v5131_v25, %v3984_v36  ;;  %v2389_v21 = vmul.f32 %v5226_v46, %v5104_v31  ;;  %v2150_v8 = vadd.f32 %v2149_v1, %v2148_v12  ;;  %v5239_v14 = vmul.f32 0.5, %v5230_v58 }
 0x4b7   : > { %v2344_v30 = vadd.f32 1e-05, %v2328_v26  ;;  %v2271_v38 = vadd.f32 %v2270_v4, %v2269_v22  ;;  %v2268_v48 = vadd.f32 %v2267_v9, %v2266_v18  ;;  %v2286_v43 = vrot.slane %v2285_v10, 2 }
 0x4b8   : > { %v2387_v52 = vmul.f32 %v2371_v62, %v5110_v6  ;;  %v2445_v39 = vrot.slane %v5226_v46, %v5126_v61  ;;  %v5244_v35 = vmul.f32 0.125, %v2150_v8  ;;  %v5246_v0 = vadd.f32 %v2513_v29, %v2482_v23 }
 0x4b9   : > { %3985 = vrsqrt.f32 %v2344_v30  ;;  %v2272_v7 = vrot.slane %v2271_v38, 2  ;;  %v2326_v59 = vmul.f32 0.125, %v2268_v48  ;;  %v2287_v12 = vadd.f32 %v2286_v43, %v2285_v10 }
 0x4ba   : > { %v2403_v31 = vsub.f32 %v5146_v33, %v2387_v52  ;;  %v2405_v1 = vsub.f32 %v5146_v33, %v2389_v21  ;;  %v2188_v6 = vsub.f32 %v5141_v49, %v5244_v35  ;;  %v2133_v18 = vrot.slane %v2132_v32, 2 }
 0x4bb   : > { %v2273_v22 = vadd.f32 %v2272_v7, %v2271_v38  ;;  %v2437_v36 = vrot.slane %v2371_v62, %v5126_v61  ;;  %v2342_v46 = vadd.f32 1e-05, %v2326_v59  ;;  %v2288_v26 = vrot.slane %v2287_v12, 1 }
 0x4bc   : > { %v2152_v4 = vrot.slane %v2151_v41, 4  ;;  %v2204_v30 = vmul.f32 %v2188_v6, %v2188_v6  ;;  %v2134_v23 = vadd.f32 %v2133_v18, %v2132_v32  ;;  %v2137_v29 = vsel %vm271_vm0, %v5159_v55, 0.0 }
 0x4bd   : > { %v2274_v9 = vrot.slane %v2273_v22, 1  ;;  %v2517_v10 = vrot.slane %v2403_v31, %v5126_v61  ;;  %3987 = vrsqrt.f32 %v2342_v46  ;;  %v2289_v21 = vadd.f32 %v2288_v26, %v2287_v12 }
 0x4be   : > { %v2153_v38 = vadd.f32 %v2152_v4, %v2151_v41  ;;  %v2304_v52 = vsel %vm271_vm0, %v2204_v30, 0.0  ;;  %v2135_v48 = vrot.slane %v2134_v23, 1  ;;  %v2138_v43 = vrot.slane %v2137_v29, 4 }
 0x4bf   : > { %v2275_v8 = vadd.f32 %v2274_v9, %v2273_v22  ;;  %v2483_v62 = vmul.f32 %v2437_v36, %v5080_v34  ;;  %v2329_v7 = vmul.f32 0.125, %v2289_v21  ;;  %v2305_v59 = vrot.slane %v2304_v52, 4 }
 0x4c0   : > { %v2154_v44 = vrot.slane %v2153_v38, 2  ;;  %v2136_v32 = vadd.f32 %v2135_v48, %v2134_v23  ;;  %v2139_v18 = vadd.f32 %v2138_v43, %v2137_v29  ;;  %3989 = vtanh.f32 %v5194_v53 }
 0x4c1   : > { %v2327_v6 = vmul.f32 0.125, %v2275_v8  ;;  %v2525_v31 = vrot.slane %v2405_v1, %v5126_v61  ;;  %v2345_v46 = vadd.f32 1e-05, %v2329_v7  ;;  %v2306_v12 = vadd.f32 %v2305_v59, %v2304_v52 }
 0x4c2   : > { %v2155_v41 = vadd.f32 %v2154_v44, %v2153_v38  ;;  %v5260_v26 = vadd.f32 %v2517_v10, %v2483_v62  ;;  %v5262_v9 = vmul.f32 0.125, %v2136_v32  ;;  %v2140_v34 = vrot.slane %v2139_v18, 2 }
 0x4c3   : > { %v3986_v22 = vpop.eup %3985  ;;  %v2343_v4 = vadd.f32 1e-05, %v2327_v6  ;;  %3991 = vrsqrt.f32 %v2345_v46  ;;  %v2307_v30 = vrot.slane %v2306_v12, 2  ;;  %v2485_v29 = vmul.f32 %v5077_v40, %v2445_v39 }
 0x4c4   : > { %v2376_v36 = vmul.f32 %v5131_v25, %v3986_v22  ;;  %v2156_v23 = vrot.slane %v2155_v41, 1  ;;  %v2186_v53 = vsub.f32 %v5151_v16, %v5262_v9  ;;  %v2141_v1 = vadd.f32 %v2140_v34, %v2139_v18 }
 0x4c5   : > { %3993 = vrsqrt.f32 %v2343_v4  ;;  %v2578_v44 = vmul.f32 0.5, %v5246_v0  ;;  %v2308_v21 = vadd.f32 %v2307_v30, %v2306_v12  ;;  %v5270_v8 = vadd.f32 %v2525_v31, %v2485_v29 }
 0x4c6   : > { %v2392_v10 = vmul.f32 %v2376_v36, %v5173_v54  ;;  %v2157_v38 = vadd.f32 %v2156_v23, %v2155_v41  ;;  %v2202_v52 = vmul.f32 %v2186_v53, %v2186_v53  ;;  %v2142_v48 = vrot.slane %v2141_v1, 1 }
 0x4c7   : > { %3995 = vtanh.f32 %v5216_v27  ;;  %v3988_v43 = vpop.eup %3987  ;;  %v2579_v40 = vmul.f32 0.5, %v5260_v26  ;;  %v2309_v39 = vrot.slane %v2308_v21, 1  ;;  %v2457_v46 = vrot.slane %v2376_v36, %v5126_v61 }
 0x4c8   : > { %v5274_v62 = vmul.f32 0.125, %v2157_v38  ;;  %3997 = vtanh.f32 %v5185_v51  ;;  %v2374_v7 = vmul.f32 %v5131_v25, %v3988_v43  ;;  %v2290_v54 = vsel %vm271_vm0, %v2202_v52, 0.0 }
 0x4c9   : > { %v2143_v59 = vadd.f32 %v2142_v48, %v2141_v1  ;;  %3999 = vtanh.f32 %v5213_v19  ;;  %v2408_v6 = vsub.f32 %v5146_v33, %v2392_v10  ;;  %v2310_v32 = vadd.f32 %v2309_v39, %v2308_v21 }
 0x4ca   : > { %v2291_v18 = vrot.slane %v2290_v54, 4  ;;  %v2189_v27 = vsub.f32 %v5155_v47, %v5274_v62  ;;  %v3990_v31 = vpop.eup %3989  ;;  %v2390_v12 = vmul.f32 %v2374_v7, %v5182_v13  ;;  %4001 = vtanh.f32 %v2578_v44 }
 0x4cb   : > { %v5285_v51 = vmul.f32 0.125, %v2143_v59  ;;  %v2332_v41 = vmul.f32 0.125, %v2310_v32  ;;  %4003 = vtanh.f32 %v2579_v40  ;;  %v2449_v34 = vrot.slane %v2374_v7, %v5126_v61 }
 0x4cc   : > { %v2292_v22 = vadd.f32 %v2291_v18, %v2290_v54  ;;  %v2205_v4 = vmul.f32 %v2189_v27, %v2189_v27  ;;  %v2406_v19 = vsub.f32 %v5146_v33, %v2390_v12  ;;  %v2606_v23 = vadd.f32 1.0, %v3990_v31 }
 0x4cd   : > { %v2187_v30 = vsub.f32 %v5159_v55, %v5285_v51  ;;  %v3992_v29 = vpop.eup %3991  ;;  %v2537_v36 = vrot.slane %v2408_v6, %v5126_v61  ;;  %v2348_v53 = vadd.f32 1e-05, %v2332_v41  ;;  %v2488_v7 = vmul.f32 %v5088_v57, %v2457_v46 }
 0x4ce   : > { %v2293_v13 = vrot.slane %v2292_v22, 2  ;;  %v2311_v1 = vsel %vm271_vm0, %v2205_v4, 0.0  ;;  %v2529_v10 = vrot.slane %v2406_v19, %v5126_v61  ;;  %v2377_v21 = vmul.f32 %v5131_v25, %v3992_v29 }
 0x4cf   : > { %v3994_v44 = vpop.eup %3993  ;;  %v2312_v38 = vrot.slane %v2311_v1, 4  ;;  %v2203_v52 = vmul.f32 %v2187_v30, %v2187_v30  ;;  %4005 = vrsqrt.f32 %v2348_v53  ;;  %v2622_v40 = vmul.f32 0.5, %v2606_v23 }
 0x4d0   : > { %v2375_v48 = vmul.f32 %v5131_v25, %v3994_v44  ;;  %v2294_v43 = vadd.f32 %v2293_v13, %v2292_v22  ;;  %v2486_v54 = vmul.f32 %v2449_v34, %v5090_v50  ;;  %v2393_v59 = vmul.f32 %v2377_v21, %v5201_v17 }
 0x4d1   : > { %v3996_v39 = vpop.eup %3995  ;;  %v2313_v6 = vadd.f32 %v2312_v38, %v2311_v1  ;;  %v2297_v12 = vsel %vm271_vm0, %v2203_v52, 0.0  ;;  %2654 = vrot.lane.b32.xlu0 %v2622_v40, %s4111_s8  ;;  %v5303_v22 = vadd.f32 %v2537_v36, %v2488_v7  ;;  %v2461_v17 = vrot.slane %v2377_v21, %v5126_v61 }
 0x4d2   : > { %v3998_v32 = vpop.eup %3997  ;;  %v2391_v18 = vmul.f32 %v2375_v48, %v5210_v15  ;;  %v2453_v27 = vrot.slane %v2375_v48, %v5126_v61  ;;  %v2295_v31 = vrot.slane %v2294_v43, 1  ;;  %v5305_v4 = vadd.f32 %v2529_v10, %v2486_v54 }
 0x4d3   : > { %v4000_v41 = vpop.eup %3999  ;;  %v2409_v57 = vsub.f32 %v5146_v33, %v2393_v59  ;;  %v2314_v50 = vrot.slane %v2313_v6, 2  ;;  %v2298_v19 = vrot.slane %v2297_v12, 4  ;;  %v2607_v29 = vadd.f32 1.0, %v3996_v39 }
 0x4d4   : > { %v2407_v46 = vsub.f32 %v5146_v33, %v2391_v18  ;;  %v2296_v15 = vadd.f32 %v2295_v31, %v2294_v43  ;;  %v4002_v34 = vpop.eup %4001  ;;  %v2487_v30 = vmul.f32 %v2453_v27, %v5094_v24  ;;  %v2608_v53 = vadd.f32 1.0, %v3998_v32 }
 0x4d5   : > { %v2315_v23 = vadd.f32 %v2314_v50, %v2313_v6  ;;  %v4004_v13 = vpop.eup %4003  ;;  %v2541_v36 = vrot.slane %v2409_v57, %v5126_v61  ;;  %v2299_v10 = vadd.f32 %v2298_v19, %v2297_v12  ;;  %v2623_v52 = vmul.f32 0.5, %v2607_v29 }
 0x4d6   : > { %v2533_v1 = vrot.slane %v2407_v46, %v5126_v61  ;;  %v2330_v44 = vmul.f32 0.125, %v2296_v15  ;;  %v2624_v21 = vmul.f32 0.5, %v2608_v53  ;;  %v2609_v48 = vadd.f32 1.0, %v4000_v41 }
 0x4d7   : > { %v2316_v38 = vrot.slane %v2315_v23, 1  ;;  %v2489_v43 = vmul.f32 %v5092_v5, %v2461_v17  ;;  %v2300_v24 = vrot.slane %v2299_v10, 2  ;;  %v2581_v39 = vmul.f32 0.5, %v5270_v8  ;;  %2656 = vrot.lane.b32.xlu1 %v2623_v52, %s4111_s8 }
 0x4d8   : > { %v5314_v40 = vadd.f32 %v2533_v1, %v2487_v30  ;;  %v2346_v7 = vadd.f32 1e-05, %v2330_v44  ;;  %2658 = vrot.lane.b32.xlu0 %v2624_v21, %s4111_s8  ;;  %v2610_v59 = vadd.f32 1.0, %v4002_v34  ;;  %v2611_v6 = vadd.f32 1.0, %v4004_v13 }
 0x4d9   : > { %v2317_v54 = vadd.f32 %v2316_v38, %v2315_v23  ;;  %v4006_v32 = vpop.eup %4005  ;;  %v2582_v18 = vmul.f32 0.5, %v5305_v4  ;;  %v5320_v27 = vadd.f32 %v2541_v36, %v2489_v43  ;;  %v2301_v5 = vadd.f32 %v2300_v24, %v2299_v10 }
 0x4da   : > { %4007 = vrsqrt.f32 %v2346_v7  ;;  %v2380_v31 = vmul.f32 %v5131_v25, %v4006_v32  ;;  %v2625_v41 = vmul.f32 0.5, %v2609_v48  ;;  %v2626_v57 = vmul.f32 0.5, %v2610_v59 }
 0x4db   : > { %v2333_v12 = vmul.f32 0.125, %v2317_v54  ;;  %v2584_v50 = vmul.f32 0.5, %v5303_v22  ;;  %v2583_v17 = vmul.f32 0.5, %v5314_v40  ;;  %v2302_v46 = vrot.slane %v2301_v5, 1 }
 0x4dc   : > { %4009 = vtanh.f32 %v5239_v14  ;;  %v2396_v15 = vmul.f32 %v2380_v31, %v5244_v35  ;;  %2660 = vrot.lane.b32.xlu1 %v2625_v41, %s4111_s8  ;;  %2662 = vrot.lane.b32.xlu0 %v2626_v57, %s4111_s8  ;;  %v2627_v34 = vmul.f32 0.5, %v2611_v6  ;;  %v2585_v30 = vmul.f32 0.5, %v5320_v27 }
 0x4dd   : > { %v2349_v19 = vadd.f32 1e-05, %v2333_v12  ;;  %4011 = vtanh.f32 %v2581_v39  ;;  %v2303_v23 = vadd.f32 %v2302_v46, %v2301_v5  ;;  %v2473_v14 = vrot.slane %v2380_v31, %v5126_v61 }
 0x4de   : > { %4013 = vtanh.f32 %v2582_v18  ;;  %v2412_v29 = vsub.f32 %v5146_v33, %v2396_v15 }
 0x4df   : > { %4015 = vrsqrt.f32 %v2349_v19  ;;  %v2331_v53 = vmul.f32 0.125, %v2303_v23  ;;  %v2492_v10 = vmul.f32 %v5141_v49, %v2473_v14 }
 0x4e0   : > { %4017 = vtanh.f32 %v2583_v17  ;;  %2664 = vrot.lane.b32.xlu1 %v2627_v34, %s4111_s8  ;;  %v2553_v36 = vrot.slane %v2412_v29, %v5126_v61 }
 0x4e1   : > { %4019 = vtanh.f32 %v2584_v50  ;;  %v2347_v35 = vadd.f32 1e-05, %v2331_v53 }
 0x4e2   : > { %4021 = vtanh.f32 %v2585_v30  ;;  %v5338_v7 = vadd.f32 %v2553_v36, %v2492_v10 }
 0x4e3   : > { %4023 = vrsqrt.f32 %v2347_v35 }
 0x4e4   : > { %v4008_v13 = vpop.eup %4007  ;;  %v2588_v50 = vmul.f32 0.5, %v5338_v7 }
 0x4e5   : > { %v2378_v1 = vmul.f32 %v5131_v25, %v4008_v13 }
 0x4e6   : > { %v4010_v44 = vpop.eup %4009  ;;  %4025 = vtanh.f32 %v2588_v50 }
 0x4e7   : > { %v4012_v38 = vpop.eup %4011  ;;  %v2394_v52 = vmul.f32 %v2378_v1, %v5262_v9  ;;  %v2465_v21 = vrot.slane %v2378_v1, %v5126_v61  ;;  %v2612_v48 = vadd.f32 1.0, %v4010_v44 }
 0x4e8   : > { %v4014_v43 = vpop.eup %4013  ;;  %v2613_v24 = vadd.f32 1.0, %v4012_v38 }
 0x4e9   : > { %v4016_v39 = vpop.eup %4015  ;;  %v2410_v54 = vsub.f32 %v5146_v33, %v2394_v52  ;;  %v2628_v59 = vmul.f32 0.5, %v2612_v48  ;;  %v2614_v6 = vadd.f32 1.0, %v4014_v43  ;;  %v2490_v31 = vmul.f32 %v2465_v21, %v5151_v16 }
 0x4ea   : > { %v4018_v32 = vpop.eup %4017  ;;  %v2381_v18 = vmul.f32 %v5131_v25, %v4016_v39  ;;  %v2629_v5 = vmul.f32 0.5, %v2613_v24 }
 0x4eb   : > { %v4020_v49 = vpop.eup %4019  ;;  %v2545_v9 = vrot.slane %v2410_v54, %v5126_v61  ;;  %2666 = vrot.lane.b32.xlu0 %v2628_v59, %s4111_s8  ;;  %v2630_v12 = vmul.f32 0.5, %v2614_v6  ;;  %v2615_v41 = vadd.f32 1.0, %v4018_v32 }
 0x4ec   : > { %v4022_v57 = vpop.eup %4021  ;;  %v2397_v17 = vmul.f32 %v2381_v18, %v5274_v62  ;;  %v2477_v46 = vrot.slane %v2381_v18, %v5126_v61  ;;  %2668 = vrot.lane.b32.xlu1 %v2629_v5, %s4111_s8  ;;  %v2616_v34 = vadd.f32 1.0, %v4020_v49 }
 0x4ed   : > { %v5349_v15 = vadd.f32 %v2545_v9, %v2490_v31  ;;  %v2631_v19 = vmul.f32 0.5, %v2615_v41  ;;  %v4024_v16 = vpop.eup %4023  ;;  %v2617_v23 = vadd.f32 1.0, %v4022_v57 }
 0x4ee   : > { %v2413_v30 = vsub.f32 %v5146_v33, %v2397_v17  ;;  %v2379_v53 = vmul.f32 %v5131_v25, %v4024_v16  ;;  %v2493_v62 = vmul.f32 %v5155_v47, %v2477_v46  ;;  %v2632_v36 = vmul.f32 0.5, %v2616_v34 }
 0x4ef   : > { %v2586_v29 = vmul.f32 0.5, %v5349_v15  ;;  %2670 = vrot.lane.b32.xlu0 %v2630_v12, %s4111_s8  ;;  %v2633_v44 = vmul.f32 0.5, %v2617_v23 }
 0x4f0   : > { %v2557_v14 = vrot.slane %v2413_v30, %v5126_v61  ;;  %2672 = vrot.lane.b32.xlu1 %v2631_v19, %s4111_s8  ;;  %v2395_v35 = vmul.f32 %v2379_v53, %v5285_v51  ;;  %v2469_v13 = vrot.slane %v2379_v53, %v5126_v61  ;;  %v4026_v21 = vpop.eup %4025 }
 0x4f1   : > { %4027 = vtanh.f32 %v2586_v29  ;;  %v2620_v24 = vadd.f32 1.0, %v4026_v21 }
 0x4f2   : > { %v5360_v1 = vadd.f32 %v2557_v14, %v2493_v62  ;;  %v2411_v25 = vsub.f32 %v5146_v33, %v2395_v35  ;;  %v2491_v47 = vmul.f32 %v2469_v13, %v5159_v55 }
 0x4f3   : > { %2674 = vrot.lane.b32.xlu0 %v2632_v36, %s4111_s8  ;;  %v2636_v39 = vmul.f32 0.5, %v2620_v24 }
 0x4f4   : > { %2676 = vrot.lane.b32.xlu1 %v2633_v44, %s4111_s8  ;;  %v2549_v10 = vrot.slane %v2411_v25, %v5126_v61  ;;  %v2589_v38 = vmul.f32 0.5, %v5360_v1 }
 0x4f6   : > { %v5368_v51 = vadd.f32 %v2549_v10, %v2491_v47  ;;  %4029 = vtanh.f32 %v2589_v38 }
 0x4f8   : > { %v2587_v52 = vmul.f32 0.5, %v5368_v51 }
 0x4fa   : > { %4031 = vtanh.f32 %v2587_v52  ;;  %v5937_v52 = vld [vmem:[#allocation3_spill] sm:$0xff] }
 0x4fb   : > { %v4028_v48 = vpop.eup %4027 }
 0x4fc   : > { %v2618_v43 = vadd.f32 1.0, %v4028_v48 }
 0x4fe   : > { %v2634_v33 = vmul.f32 0.5, %v2618_v43 }
 0x500   : > { %2678 = vrot.lane.b32.xlu0 %v2634_v33, %s4111_s8  ;;  %v4030_v54 = vpop.eup %4029 }
 0x501   : > { %v2621_v6 = vadd.f32 1.0, %v4030_v54 }
 0x503   : > { %v2637_v32 = vmul.f32 0.5, %v2621_v6 }
 0x504   : > { %2682 = vrot.lane.b32.xlu0 %v2636_v39, %s4111_s8  ;;  %v4032_v61 = vpop.eup %4031 }
 0x505   : > { %v2619_v55 = vadd.f32 1.0, %v4032_v61 }
 0x507   : > { %v2635_v59 = vmul.f32 0.5, %v2619_v55  ;;  %v5942_v55 = vld [vmem:[#allocation6_spill] sm:$0xff] }
 0x509   : > { %2680 = vrot.lane.b32.xlu1 %v2635_v59, %s4111_s8 }
 0x50d   : > { %2684 = vrot.lane.b32.xlu1 %v2637_v32, %s4111_s8 }
 0x543   : > { %v2655_v18 = vpop.permute.xlu0 %2654 }
 0x544   : > { %v2702_v5 = vmul.f32 %v2655_v18, %v5175_v28 }
 0x546   : > { %v2718_v49 = vadd.f32 %v2702_v5, %v4953_v60 }
 0x548   : > { %v5380_v50 = vmul.f32 0.70710677, %v2718_v49 }
 0x549   : > { %v2657_v31 = vpop.permute.xlu1 %2656 }
 0x54a   : > { %v2659_v9 = vpop.permute.xlu0 %2658  ;;  %v2703_v12 = vmul.f32 %v2657_v31, %v5196_v63  ;;  %v5945_v31 = vld [vmem:[#allocation7_spill] sm:$0xff] }
 0x54b   : > { %v2704_v41 = vmul.f32 %v2659_v9, %v5169_v11 }
 0x54c   : > { %v2719_v57 = vadd.f32 %v2703_v12, %v4955_v45 }
 0x54d   : > { %v2720_v34 = vadd.f32 %v2704_v41, %v4962_v42 }
 0x54e   : > { %v2661_v17 = vpop.permute.xlu1 %2660  ;;  %v2663_v46 = vpop.permute.xlu0 %2662  ;;  %v5382_v19 = vmul.f32 0.70710677, %v2719_v57  ;;  %v5946_v57 = vld [vmem:[#allocation8_spill] sm:$0xff] }
 0x54f   : > { %v2705_v28 = vmul.f32 %v2661_v17, %v5187_v56  ;;  %v2706_v60 = vmul.f32 %v2663_v46, %v5246_v0  ;;  %v5390_v30 = vmul.f32 0.70710677, %v2720_v34 }
 0x550   : > { %v2750_v16 = vpack.c.bf16 %v5382_v19, %v5380_v50 }
 0x551   : > { %v2721_v63 = vadd.f32 %v2705_v28, %v4964_v20  ;;  %v2722_v23 = vadd.f32 %v2706_v60, %v4975_v3  ;;  %v5949_v60 = vld [vmem:[#allocation9_spill] sm:$0xff] }
 0x552   : > { %v2665_v11 = vpop.permute.xlu1 %2664  ;;  %3811 = vmatprep.mubr.msk.bf16.mxu0 %vm1082_vm1, %v2750_v16 }
 0x553   : > { %v5392_v45 = vmul.f32 0.70710677, %v2721_v63  ;;  %v2707_v42 = vmul.f32 %v2665_v11, %v5260_v26  ;;  %v5400_v29 = vmul.f32 0.70710677, %v2722_v23  ;;  %v5950_v11 = vld [vmem:[#allocation10_spill] sm:$0xff] }
 0x555   : > { %v2751_v56 = vpack.c.bf16 %v5392_v45, %v5390_v30  ;;  %v2723_v0 = vadd.f32 %v2707_v42, %v4977_v2  ;;  %v5936_v2 = vld [vmem:[#allocation11_spill] sm:$0xff] }
 0x557   : > { %v5402_v53 = vmul.f32 0.70710677, %v2723_v0  ;;  %3812 = vmatmul.mubr.msk.bf16.vlgmr.msra.gmra.mrb[16].mxu0 %vm1082_vm1, %v2751_v56 }
 0x559   : > { %v2752_v20 = vpack.c.bf16 %v5402_v53, %v5400_v29 }
 0x55b   : > { %3815 = vmatprep.mubr.msk.bf16.mxu0 %vm1082_vm1, %v2752_v20 }
 0x55d   : > { %v2667_v3 = vpop.permute.xlu0 %2666 }
 0x55e   : > { %v2708_v62 = vmul.f32 %v2667_v3, %v5230_v58  ;;  %v2669_v26 = vpop.permute.xlu1 %2668 }
 0x55f   : > { %v2709_v14 = vmul.f32 %v2669_v26, %v5270_v8  ;;  %v5938_v8 = vld [vmem:[#allocation4_spill] sm:$0xff] }
 0x560   : > { %v2724_v35 = vadd.f32 %v2708_v62, %v4985_v37 }
 0x561   : > { %v2725_v13 = vadd.f32 %v2709_v14, %v5936_v2  ;;  %v2671_v36 = vpop.permute.xlu0 %2670 }
 0x562   : > { %v2710_v44 = vmul.f32 %v2671_v36, %v5305_v4  ;;  %v2673_v25 = vpop.permute.xlu1 %2672  ;;  %v5413_v47 = vmul.f32 0.70710677, %v2724_v35 }
 0x563   : > { %v5415_v10 = vmul.f32 0.70710677, %v2725_v13  ;;  %v2711_v38 = vmul.f32 %v2673_v25, %v5314_v40  ;;  %v5941_v40 = vld [vmem:[#allocation5_spill] sm:$0xff] }
 0x564   : > { %v2726_v21 = vadd.f32 %v2710_v44, %v5937_v52 }
 0x565   : > { %v2753_v58 = vpack.c.bf16 %v5415_v10, %v5413_v47  ;;  %v2727_v48 = vadd.f32 %v2711_v38, %v5938_v8  ;;  %v2675_v37 = vpop.permute.xlu0 %2674 }
 0x566   : > { %v2712_v43 = vmul.f32 %v2675_v37, %v5303_v22  ;;  %v2677_v33 = vpop.permute.xlu1 %2676  ;;  %v5423_v24 = vmul.f32 0.70710677, %v2726_v21 }
 0x567   : > { %v5425_v4 = vmul.f32 0.70710677, %v2727_v48  ;;  %v2713_v39 = vmul.f32 %v2677_v33, %v5320_v27  ;;  %3816 = vmatmul.mubr.msk.bf16.gmra.mrb[20].mxu0 %vm1082_vm1, %v2753_v58 }
 0x568   : > { %5939 = vst [vmem:[#allocation11_spill] sm:$0xff] %v5423_v24  ;;  %v2728_v54 = vadd.f32 %v2712_v43, %v5941_v40 }
 0x569   : > { %5940 = vst [vmem:[#allocation3_spill] sm:$0xff] %v5425_v4  ;;  %v2754_v61 = vpack.c.bf16 %v5425_v4, %v5423_v24  ;;  %v2729_v59 = vadd.f32 %v2713_v39, %v5942_v55 }
 0x56a   : > { %v5433_v6 = vmul.f32 0.70710677, %v2728_v54 }
 0x56b   : > { %v5435_v32 = vmul.f32 0.70710677, %v2729_v59  ;;  %3819 = vmatprep.mubr.msk.bf16.mxu0 %vm1082_vm1, %v2754_v61 }
 0x56c   : > { %5943 = vst [vmem:[#allocation4_spill] sm:$0xff] %v5433_v6 }
 0x56d   : > { %5944 = vst [vmem:[#allocation5_spill] sm:$0xff] %v5435_v32  ;;  %v2755_v22 = vpack.c.bf16 %v5435_v32, %v5433_v6 }
 0x56f   : > { %3820 = vmatmul.mubr.msk.bf16.gmra.mrb[24].mxu0 %vm1082_vm1, %v2755_v22 }
 0x572   : > { %v2679_v27 = vpop.permute.xlu0 %2678 }
 0x573   : > { %v2714_v18 = vmul.f32 %v2679_v27, %v5349_v15 }
 0x575   : > { %v2730_v9 = vadd.f32 %v2714_v18, %v5945_v31 }
 0x576   : > { %v2683_v5 = vpop.permute.xlu0 %2682 }
 0x577   : > { %v2716_v41 = vmul.f32 %v2683_v5, %v5338_v7  ;;  %v5446_v34 = vmul.f32 0.70710677, %v2730_v9 }
 0x579   : > { %5947 = vst [vmem:[#allocation6_spill] sm:$0xff] %v5446_v34  ;;  %v2732_v16 = vadd.f32 %v2716_v41, %v5949_v60 }
 0x57b   : > { %v2681_v49 = vpop.permute.xlu1 %2680  ;;  %v5455_v42 = vmul.f32 0.70710677, %v2732_v16 }
 0x57c   : > { %v2715_v12 = vmul.f32 %v2681_v49, %v5368_v51 }
 0x57d   : > { %5951 = vst [vmem:[#allocation8_spill] sm:$0xff] %v5455_v42 }
 0x57e   : > { %v2731_v17 = vadd.f32 %v2715_v12, %v5946_v57 }
 0x57f   : > { %v2685_v46 = vpop.permute.xlu1 %2684 }
 0x580   : > { %v5448_v28 = vmul.f32 0.70710677, %v2731_v17  ;;  %v2717_v63 = vmul.f32 %v2685_v46, %v5360_v1 }
 0x582   : > { %5948 = vst [vmem:[#allocation7_spill] sm:$0xff] %v5448_v28  ;;  %v2756_v15 = vpack.c.bf16 %v5448_v28, %v5446_v34  ;;  %v2733_v23 = vadd.f32 %v2717_v63, %v5950_v11 }
 0x584   : > { %v5457_v51 = vmul.f32 0.70710677, %v2733_v23  ;;  %3823 = vmatprep.mubr.msk.bf16.mxu0 %vm1082_vm1, %v2756_v15 }
 0x586   : > { %5952 = vst [vmem:[#allocation9_spill] sm:$0xff] %v5457_v51  ;;  %v2757_v7 = vpack.c.bf16 %v5457_v51, %v5455_v42 }
 0x588   : > { %3824 = vmatmul.mubr.msk.bf16.gmra.mrb[28].mxu0 %vm1082_vm1, %v2757_v7 }
 0x62a   : > { %v5463_v56 = vpop.f32.mrb[16].mxu0 }
 0x62b   : > { %v2902_v1 = vsel %vm271_vm0, %v5463_v56, 0.0  ;;  %v5467_v0 = vpop.f32.mrb[17].mxu0 }
 0x62c   : > { %v2903_v20 = vrot.slane %v2902_v1, 4  ;;  %v2888_v3 = vsel %vm271_vm0, %v5467_v0, 0.0  ;;  %v5471_v62 = vpop.f32.mrb[18].mxu0 }
 0x62d   : > { %v2889_v26 = vrot.slane %v2888_v3, 4  ;;  %v2909_v14 = vsel %vm271_vm0, %v5471_v62, 0.0  ;;  %v5475_v35 = vpop.f32.mrb[19].mxu0 }
 0x62e   : > { %v2904_v2 = vadd.f32 %v2903_v20, %v2902_v1  ;;  %v2910_v13 = vrot.slane %v2909_v14, 4  ;;  %v2895_v36 = vsel %vm271_vm0, %v5475_v35, 0.0 }
 0x62f   : > { %v2890_v44 = vadd.f32 %v2889_v26, %v2888_v3  ;;  %v2896_v25 = vrot.slane %v2895_v36, 4 }
 0x630   : > { %v2905_v38 = vrot.slane %v2904_v2, 2  ;;  %v2911_v52 = vadd.f32 %v2910_v13, %v2909_v14 }
 0x631   : > { %v2891_v21 = vrot.slane %v2890_v44, 2  ;;  %v2897_v58 = vadd.f32 %v2896_v25, %v2895_v36 }
 0x632   : > { %v2906_v8 = vadd.f32 %v2905_v38, %v2904_v2  ;;  %v2912_v48 = vrot.slane %v2911_v52, 2 }
 0x633   : > { %v2892_v37 = vadd.f32 %v2891_v21, %v2890_v44  ;;  %v2898_v43 = vrot.slane %v2897_v58, 2 }
 0x634   : > { %v2907_v33 = vrot.slane %v2906_v8, 1  ;;  %v2913_v39 = vadd.f32 %v2912_v48, %v2911_v52 }
 0x635   : > { %v2893_v40 = vrot.slane %v2892_v37, 1  ;;  %v2899_v54 = vadd.f32 %v2898_v43, %v2897_v58 }
 0x636   : > { %v2908_v61 = vadd.f32 %v2907_v33, %v2906_v8  ;;  %v2914_v55 = vrot.slane %v2913_v39, 1 }
 0x637   : > { %v2894_v59 = vadd.f32 %v2893_v40, %v2892_v37  ;;  %v2900_v22 = vrot.slane %v2899_v54, 1 }
 0x638   : > { %v5479_v27 = vmul.f32 0.125, %v2908_v61  ;;  %v2915_v18 = vadd.f32 %v2914_v55, %v2913_v39 }
 0x639   : > { %v5481_v5 = vmul.f32 0.125, %v2894_v59  ;;  %v2901_v49 = vadd.f32 %v2900_v22, %v2899_v54 }
 0x63a   : > { %v5483_v31 = vpop.f32.mrb[20].mxu0  ;;  %v3018_v9 = vsub.f32 %v5463_v56, %v5479_v27  ;;  %v5487_v12 = vmul.f32 0.125, %v2915_v18 }
 0x63b   : > { %v2930_v41 = vsel %vm271_vm0, %v5483_v31, 0.0  ;;  %v5491_v57 = vpop.f32.mrb[21].mxu0  ;;  %v3016_v17 = vsub.f32 %v5467_v0, %v5481_v5  ;;  %v5495_v46 = vmul.f32 0.125, %v2901_v49 }
 0x63c   : > { %v2931_v60 = vrot.slane %v2930_v41, 4  ;;  %v2916_v16 = vsel %vm271_vm0, %v5491_v57, 0.0  ;;  %v5499_v63 = vpop.f32.mrb[22].mxu0  ;;  %v3034_v15 = vmul.f32 %v3018_v9, %v3018_v9  ;;  %v3019_v11 = vsub.f32 %v5471_v62, %v5487_v12 }
 0x63d   : > { %v2917_v23 = vrot.slane %v2916_v16, 4  ;;  %v2937_v7 = vsel %vm271_vm0, %v5499_v63, 0.0  ;;  %v5505_v1 = vpop.f32.mrb[23].mxu0  ;;  %v3032_v20 = vmul.f32 %v3016_v17, %v3016_v17  ;;  %v3017_v3 = vsub.f32 %v5475_v35, %v5495_v46 }
 0x63e   : > { %v2932_v26 = vadd.f32 %v2931_v60, %v2930_v41  ;;  %v2938_v14 = vrot.slane %v2937_v7, 4  ;;  %v3062_v2 = vsel %vm271_vm0, %v3034_v15, 0.0  ;;  %v3035_v13 = vmul.f32 %v3019_v11, %v3019_v11 }
 0x63f   : > { %v2918_v36 = vadd.f32 %v2917_v23, %v2916_v16  ;;  %v2923_v44 = vsel %vm271_vm0, %v5505_v1, 0.0  ;;  %v3063_v25 = vrot.slane %v3062_v2, 4  ;;  %v3048_v38 = vsel %vm271_vm0, %v3032_v20, 0.0 }
 0x640   : > { %v3033_v52 = vmul.f32 %v3017_v3, %v3017_v3  ;;  %v2933_v21 = vrot.slane %v2932_v26, 2  ;;  %v3049_v58 = vrot.slane %v3048_v38, 4  ;;  %v3069_v8 = vsel %vm271_vm0, %v3035_v13, 0.0 }
 0x641   : > { %v2919_v48 = vrot.slane %v2918_v36, 2  ;;  %v2939_v37 = vadd.f32 %v2938_v14, %v2937_v7  ;;  %v3064_v43 = vadd.f32 %v3063_v25, %v3062_v2  ;;  %v3070_v33 = vrot.slane %v3069_v8, 4 }
 0x642   : > { %v3055_v39 = vsel %vm271_vm0, %v3033_v52, 0.0  ;;  %v2934_v40 = vadd.f32 %v2933_v21, %v2932_v26  ;;  %v5515_v54 = vpop.f32.mrb[24].mxu0  ;;  %v3050_v61 = vadd.f32 %v3049_v58, %v3048_v38  ;;  %v2924_v17 = vrot.slane %v2923_v44, 4 }
 0x643   : > { %v3056_v55 = vrot.slane %v3055_v39, 4  ;;  %v2920_v59 = vadd.f32 %v2919_v48, %v2918_v36  ;;  %v2940_v22 = vrot.slane %v2939_v37, 2  ;;  %v5517_v18 = vpop.f32.mrb[25].mxu0  ;;  %v3065_v49 = vrot.slane %v3064_v43, 2 }
 0x644   : > { %v3071_v9 = vadd.f32 %v3070_v33, %v3069_v8  ;;  %v2935_v41 = vrot.slane %v2934_v40, 1  ;;  %v5519_v60 = vpop.f32.mrb[26].mxu0  ;;  %v3051_v16 = vrot.slane %v3050_v61, 2  ;;  %v2925_v14 = vadd.f32 %v2924_v17, %v2923_v44 }
 0x645   : > { %v3057_v15 = vadd.f32 %v3056_v55, %v3055_v39  ;;  %v2921_v11 = vrot.slane %v2920_v59, 1  ;;  %v2941_v23 = vadd.f32 %v2940_v22, %v2939_v37  ;;  %v5521_v7 = vpop.f32.mrb[27].mxu0  ;;  %v3066_v20 = vadd.f32 %v3065_v49, %v3064_v43 }
 0x646   : > { %v3072_v3 = vrot.slane %v3071_v9, 2  ;;  %v2936_v26 = vadd.f32 %v2935_v41, %v2934_v40  ;;  %v3052_v2 = vadd.f32 %v3051_v16, %v3050_v61  ;;  %v2926_v58 = vrot.slane %v2925_v14, 2 }
 0x647   : > { %v3058_v13 = vrot.slane %v3057_v15, 2  ;;  %v2922_v36 = vadd.f32 %v2921_v11, %v2920_v59  ;;  %v2942_v25 = vrot.slane %v2941_v23, 1  ;;  %v3067_v38 = vrot.slane %v3066_v20, 1 }
 0x648   : > { %v3073_v52 = vadd.f32 %v3072_v3, %v3071_v9  ;;  %v5523_v21 = vmul.f32 0.125, %v2936_v26  ;;  %v3053_v8 = vrot.slane %v3052_v2, 1  ;;  %v2927_v44 = vadd.f32 %v2926_v58, %v2925_v14 }
 0x649   : > { %v3059_v48 = vadd.f32 %v3058_v13, %v3057_v15  ;;  %v5525_v33 = vmul.f32 0.125, %v2922_v36  ;;  %v2943_v37 = vadd.f32 %v2942_v25, %v2941_v23  ;;  %v3068_v39 = vadd.f32 %v3067_v38, %v3066_v20 }
 0x64a   : > { %v3074_v55 = vrot.slane %v3073_v52, 1  ;;  %v3022_v43 = vsub.f32 %v5483_v31, %v5523_v21  ;;  %v3054_v40 = vadd.f32 %v3053_v8, %v3052_v2  ;;  %v2928_v17 = vrot.slane %v2927_v44, 1 }
 0x64b   : > { %v3060_v61 = vrot.slane %v3059_v48, 1  ;;  %v3020_v59 = vsub.f32 %v5491_v57, %v5525_v33  ;;  %v5531_v22 = vmul.f32 0.125, %v2943_v37  ;;  %v3162_v49 = vmul.f32 0.125, %v3068_v39 }
 0x64c   : > { %v3075_v9 = vadd.f32 %v3074_v55, %v3073_v52  ;;  %v3038_v41 = vmul.f32 %v3022_v43, %v3022_v43  ;;  %v3160_v16 = vmul.f32 0.125, %v3054_v40  ;;  %v2929_v14 = vadd.f32 %v2928_v17, %v2927_v44 }
 0x64d   : > { %v3061_v15 = vadd.f32 %v3060_v61, %v3059_v48  ;;  %v3036_v11 = vmul.f32 %v3020_v59, %v3020_v59  ;;  %v3023_v23 = vsub.f32 %v5499_v63, %v5531_v22  ;;  %v3178_v20 = vadd.f32 1e-05, %v3162_v49 }
 0x64e   : > { %v3163_v3 = vmul.f32 0.125, %v3075_v9  ;;  %v3090_v26 = vsel %vm271_vm0, %v3038_v41, 0.0  ;;  %v3176_v2 = vadd.f32 1e-05, %v3160_v16  ;;  %v5537_v37 = vmul.f32 0.125, %v2929_v14 }
 0x64f   : > { %v3161_v13 = vmul.f32 0.125, %v3061_v15  ;;  %v3091_v36 = vrot.slane %v3090_v26, 4  ;;  %v3076_v25 = vsel %vm271_vm0, %v3036_v11, 0.0  ;;  %4033 = vrsqrt.f32 %v3178_v20 }
 0x650   : > { %v3179_v38 = vadd.f32 1e-05, %v3163_v3  ;;  %v3077_v52 = vrot.slane %v3076_v25, 4  ;;  %v3039_v58 = vmul.f32 %v3023_v23, %v3023_v23  ;;  %4035 = vrsqrt.f32 %v3176_v2 }
 0x651   : > { %v3177_v8 = vadd.f32 1e-05, %v3161_v13  ;;  %v3092_v48 = vadd.f32 %v3091_v36, %v3090_v26  ;;  %v2958_v43 = vsel %vm271_vm0, %v5515_v54, 0.0  ;;  %v3021_v61 = vsub.f32 %v5505_v1, %v5537_v37 }
 0x652   : > { %4037 = vrsqrt.f32 %v3179_v38  ;;  %v3078_v39 = vadd.f32 %v3077_v52, %v3076_v25  ;;  %v3097_v55 = vsel %vm271_vm0, %v3039_v58, 0.0  ;;  %v2959_v49 = vrot.slane %v2958_v43, 4 }
 0x653   : > { %4039 = vrsqrt.f32 %v3177_v8  ;;  %v3093_v44 = vrot.slane %v3092_v48, 2  ;;  %v3098_v40 = vrot.slane %v3097_v55, 4  ;;  %v2944_v9 = vsel %vm271_vm0, %v5517_v18, 0.0 }
 0x654   : > { %v3079_v59 = vrot.slane %v3078_v39, 2  ;;  %v2965_v41 = vsel %vm271_vm0, %v5519_v60, 0.0  ;;  %v3037_v15 = vmul.f32 %v3021_v61, %v3021_v61  ;;  %v2945_v11 = vrot.slane %v2944_v9, 4  ;;  %v5559_v61 = vld [vmem:[%s5879_s3] sm:$0xf] }
 0x655   : > { %v3094_v17 = vadd.f32 %v3093_v44, %v3092_v48  ;;  %v3099_v16 = vadd.f32 %v3098_v40, %v3097_v55  ;;  %v2960_v20 = vadd.f32 %v2959_v49, %v2958_v43  ;;  %v2966_v3 = vrot.slane %v2965_v41, 4  ;;  %v5953_v55 = vld [vmem:[#allocation2_spill] sm:$0xff] }
 0x656   : > { %v3080_v23 = vadd.f32 %v3079_v59, %v3078_v39  ;;  %v3083_v2 = vsel %vm271_vm0, %v3037_v15, 0.0  ;;  %v2946_v13 = vadd.f32 %v2945_v11, %v2944_v9  ;;  %v5551_v8 = vsel %vm271_vm0, %v5521_v7, 0.0 }
 0x657   : > { %v3095_v26 = vrot.slane %v3094_v17, 1  ;;  %v3100_v14 = vrot.slane %v3099_v16, 2  ;;  %v3084_v25 = vrot.slane %v3083_v2, 4  ;;  %v2961_v38 = vrot.slane %v2960_v20, 2 }
 0x658   : > { %v3081_v36 = vrot.slane %v3080_v23, 1  ;;  %v5554_v44 = vsub.s32 3, %v5953_v55  ;;  %v2947_v43 = vrot.slane %v2946_v13, 2 }
 0x659   : > { %v3096_v52 = vadd.f32 %v3095_v26, %v3094_v17  ;;  %v3101_v58 = vadd.f32 %v3100_v14, %v3099_v16  ;;  %v4034_v48 = vpop.eup %4033  ;;  %v3085_v9 = vadd.f32 %v3084_v25, %v3083_v2  ;;  %v2967_v17 = vadd.f32 %v2966_v3, %v2965_v41 }
 0x65a   : > { %v3082_v39 = vadd.f32 %v3081_v36, %v3080_v23  ;;  %v4036_v40 = vpop.eup %4035  ;;  %v3210_v59 = vmul.f32 %v5559_v61, %v4034_v48  ;;  %v2962_v26 = vadd.f32 %v2961_v38, %v2960_v20  ;;  %v2952_v14 = vrot.slane %v5551_v8, 4  ;;  %v5577_v38 = vld [vmem:[%s5880_s4] sm:$0xf] }
 0x65b   : > { %v3166_v49 = vmul.f32 0.125, %v3096_v52  ;;  %v3208_v15 = vmul.f32 %v5559_v61, %v4036_v40  ;;  %v5564_v23 = vpop.f32.mrb[28].mxu0  ;;  %v3102_v42 = vrot.slane %v3101_v58, 1  ;;  %v2948_v25 = vadd.f32 %v2947_v43, %v2946_v13 }
 0x65c   : > { %v4038_v16 = vpop.eup %4037  ;;  %v3164_v11 = vmul.f32 0.125, %v3082_v39  ;;  %v3226_v55 = vmul.f32 %v3210_v59, %v5479_v27  ;;  %v5568_v48 = vpop.f32.mrb[29].mxu0  ;;  %v3267_v52 = vrot.slane %v3210_v59, %v5554_v44  ;;  %v3086_v40 = vrot.slane %v3085_v9, 2 }
 0x65d   : > { %v4040_v36 = vpop.eup %4039  ;;  %v3211_v51 = vmul.f32 %v5559_v61, %v4038_v16  ;;  %v3182_v28 = vadd.f32 1e-05, %v3166_v49  ;;  %v3224_v41 = vmul.f32 %v3208_v15, %v5481_v5  ;;  %v5572_v20 = vpop.f32.mrb[30].mxu0  ;;  %v3259_v13 = vrot.slane %v3208_v15, %v5554_v44 }
 0x65e   : > { %v3209_v3 = vmul.f32 %v5559_v61, %v4040_v36  ;;  %v3180_v2 = vadd.f32 1e-05, %v3164_v11  ;;  %v3242_v27 = vsub.f32 %v5577_v38, %v3226_v55  ;;  %v5582_v49 = vpop.f32.mrb[31].mxu0  ;;  %v2963_v16 = vrot.slane %v2962_v26, 1 }
 0x65f   : > { %v3227_v39 = vmul.f32 %v3211_v51, %v5487_v12  ;;  %v3240_v5 = vsub.f32 %v5577_v38, %v3224_v41  ;;  %v3271_v55 = vrot.slane %v3211_v51, %v5554_v44  ;;  %4041 = vrsqrt.f32 %v3182_v28 }
 0x660   : > { %v3225_v43 = vmul.f32 %v3209_v3, %v5495_v46  ;;  %v3347_v11 = vrot.slane %v3242_v27, %v5554_v44  ;;  %4043 = vrsqrt.f32 %v3180_v2  ;;  %v2968_v34 = vrot.slane %v2967_v17, 2 }
 0x661   : > { %v3243_v36 = vsub.f32 %v5577_v38, %v3227_v39  ;;  %v3339_v59 = vrot.slane %v3240_v5, %v5554_v44  ;;  %v3322_v41 = vmul.f32 %v5463_v56, %v3267_v52  ;;  %v3103_v4 = vadd.f32 %v3102_v42, %v3101_v58 }
 0x662   : > { %v3241_v12 = vsub.f32 %v5577_v38, %v3225_v43  ;;  %v3087_v46 = vadd.f32 %v3086_v40, %v3085_v9  ;;  %v3320_v24 = vmul.f32 %v3259_v13, %v5467_v0  ;;  %v3263_v27 = vrot.slane %v3209_v3, %v5554_v44 }
 0x663   : > { %v3351_v15 = vrot.slane %v3243_v36, %v5554_v44  ;;  %v2964_v39 = vadd.f32 %v2963_v16, %v2962_v26  ;;  %v2949_v32 = vrot.slane %v2948_v25, 1  ;;  %v5596_v51 = vadd.f32 %v3347_v11, %v3322_v41 }
 0x664   : > { %v3323_v28 = vmul.f32 %v5471_v62, %v3271_v55  ;;  %v3167_v5 = vmul.f32 0.125, %v3103_v4  ;;  %v3088_v43 = vrot.slane %v3087_v46, 1  ;;  %v5599_v2 = vadd.f32 %v3339_v59, %v3320_v24 }
 0x665   : > { %v3343_v56 = vrot.slane %v3241_v12, %v5554_v44  ;;  %v5602_v52 = vmul.f32 0.125, %v2964_v39  ;;  %v2950_v42 = vadd.f32 %v2949_v32, %v2948_v25  ;;  %v2969_v3 = vadd.f32 %v2968_v34, %v2967_v17 }
 0x666   : > { %v5604_v58 = vadd.f32 %v3351_v15, %v3323_v28  ;;  %v3183_v0 = vadd.f32 1e-05, %v3167_v5  ;;  %v3089_v9 = vadd.f32 %v3088_v43, %v3087_v46  ;;  %v3321_v26 = vmul.f32 %v3263_v27, %v5475_v35 }
 0x667   : > { %v3026_v40 = vsub.f32 %v5515_v54, %v5602_v52  ;;  %v5609_v62 = vmul.f32 0.125, %v2950_v42  ;;  %v2953_v24 = vadd.f32 %v2952_v14, %v5551_v8  ;;  %v5613_v4 = vmul.f32 0.5, %v5596_v51 }
 0x668   : > { %4045 = vrsqrt.f32 %v3183_v0  ;;  %v3165_v13 = vmul.f32 0.125, %v3089_v9  ;;  %v2970_v32 = vrot.slane %v2969_v3, 1  ;;  %v5616_v25 = vmul.f32 0.5, %v5599_v2 }
 0x669   : > { %v3042_v16 = vmul.f32 %v3026_v40, %v3026_v40  ;;  %v3024_v34 = vsub.f32 %v5517_v18, %v5609_v62  ;;  %v2954_v35 = vrot.slane %v2953_v24, 2  ;;  %v4042_v17 = vpop.eup %4041  ;;  %v5621_v11 = vmul.f32 0.5, %v5604_v58 }
 0x66a   : > { %v5623_v36 = vadd.f32 %v3343_v56, %v3321_v26  ;;  %v3181_v8 = vadd.f32 1e-05, %v3165_v13  ;;  %v2971_v14 = vadd.f32 %v2970_v32, %v2969_v3  ;;  %v4044_v55 = vpop.eup %4043  ;;  %v3214_v59 = vmul.f32 %v5559_v61, %v4042_v17 }
 0x66b   : > { %v3118_v12 = vsel %vm271_vm0, %v3042_v16, 0.0  ;;  %v3040_v41 = vmul.f32 %v3024_v34, %v3024_v34  ;;  %v2955_v15 = vadd.f32 %v2954_v35, %v2953_v24  ;;  %v3212_v46 = vmul.f32 %v5559_v61, %v4044_v55 }
 0x66c   : > { %4047 = vrsqrt.f32 %v3181_v8  ;;  %v3119_v27 = vrot.slane %v3118_v12, 4  ;;  %v5628_v39 = vmul.f32 0.125, %v2971_v14  ;;  %v3230_v28 = vmul.f32 %v3214_v59, %v5523_v21 }
 0x66d   : > { %v3104_v5 = vsel %vm271_vm0, %v3040_v41, 0.0  ;;  %v2956_v43 = vrot.slane %v2955_v15, 1  ;;  %v2986_v56 = vsel %vm271_vm0, %v5564_v23, 0.0  ;;  %v3283_v42 = vrot.slane %v3214_v59, %v5554_v44 }
 0x66e   : > { %v3228_v0 = vmul.f32 %v3212_v46, %v5525_v33  ;;  %v3120_v9 = vadd.f32 %v3119_v27, %v3118_v12  ;;  %v3105_v3 = vrot.slane %v3104_v5, 4  ;;  %v5637_v26 = vmul.f32 0.5, %v5623_v36 }
 0x66f   : > { %v3246_v40 = vsub.f32 %v5577_v38, %v3230_v28  ;;  %v3027_v21 = vsub.f32 %v5519_v60, %v5628_v39  ;;  %v2957_v24 = vadd.f32 %v2956_v43, %v2955_v15  ;;  %v3275_v32 = vrot.slane %v3212_v46, %v5554_v44 }
 0x670   : > { %v3244_v13 = vsub.f32 %v5577_v38, %v3228_v0  ;;  %v3121_v16 = vrot.slane %v3120_v9, 2  ;;  %v3106_v34 = vadd.f32 %v3105_v3, %v3104_v5  ;;  %v2987_v8 = vrot.slane %v2986_v56, 4 }
 0x671   : > { %v3363_v35 = vrot.slane %v3246_v40, %v5554_v44  ;;  %v3043_v33 = vmul.f32 %v3027_v21, %v3027_v21  ;;  %v5645_v17 = vmul.f32 0.125, %v2957_v24  ;;  %v3326_v55 = vmul.f32 %v5483_v31, %v3283_v42 }
 0x672   : > { %v4046_v14 = vpop.eup %4045  ;;  %v3122_v59 = vadd.f32 %v3121_v16, %v3120_v9  ;;  %v3107_v12 = vrot.slane %v3106_v34, 2  ;;  %v2972_v41 = vsel %vm271_vm0, %v5568_v48, 0.0  ;;  %v3355_v15 = vrot.slane %v3244_v13, %v5554_v44 }
 0x673   : > { %v3215_v46 = vmul.f32 %v5559_v61, %v4046_v14  ;;  %v3125_v27 = vsel %vm271_vm0, %v3043_v33, 0.0  ;;  %v3025_v28 = vsub.f32 %v5521_v7, %v5645_v17  ;;  %v3324_v5 = vmul.f32 %v3275_v32, %v5491_v57 }
 0x674   : > { %v3123_v43 = vrot.slane %v3122_v59, 1  ;;  %v3108_v0 = vadd.f32 %v3107_v12, %v3106_v34  ;;  %v3126_v3 = vrot.slane %v3125_v27, 4  ;;  %v5656_v31 = vadd.f32 %v3363_v35, %v3326_v55 }
 0x675   : > { %v3231_v42 = vmul.f32 %v3215_v46, %v5531_v22  ;;  %v3041_v9 = vmul.f32 %v3025_v28, %v3025_v28  ;;  %v2988_v40 = vadd.f32 %v2987_v8, %v2986_v56  ;;  %v2993_v33 = vsel %vm271_vm0, %v5572_v20, 0.0 }
 0x676   : > { %v4048_v21 = vpop.eup %4047  ;;  %v3124_v24 = vadd.f32 %v3123_v43, %v3122_v59  ;;  %v3109_v13 = vrot.slane %v3108_v0, 1  ;;  %v3127_v16 = vadd.f32 %v3126_v3, %v3125_v27  ;;  %v5661_v14 = vadd.f32 %v3355_v15, %v3324_v5 }
 0x677   : > { %v3247_v57 = vsub.f32 %v5577_v38, %v3231_v42  ;;  %v3287_v32 = vrot.slane %v3215_v46, %v5554_v44  ;;  %v3111_v34 = vsel %vm271_vm0, %v3041_v9, 0.0  ;;  %v5667_v56 = vmul.f32 0.5, %v5656_v31 }
 0x678   : > { %v3170_v35 = vmul.f32 0.125, %v3124_v24  ;;  %v3110_v55 = vadd.f32 %v3109_v13, %v3108_v0  ;;  %v3128_v22 = vrot.slane %v3127_v16, 2  ;;  %v3112_v12 = vrot.slane %v3111_v34, 4 }
 0x679   : > { %v3213_v8 = vmul.f32 %v5559_v61, %v4048_v21  ;;  %v2989_v59 = vrot.slane %v2988_v40, 2  ;;  %v2973_v27 = vrot.slane %v2972_v41, 4  ;;  %v5671_v3 = vmul.f32 0.5, %v5661_v14 }
 0x67a   : > { %v3186_v28 = vadd.f32 1e-05, %v3170_v35  ;;  %v3168_v15 = vmul.f32 0.125, %v3110_v55  ;;  %v3129_v5 = vadd.f32 %v3128_v22, %v3127_v16  ;;  %v3113_v43 = vadd.f32 %v3112_v12, %v3111_v34 }
 0x67b   : > { %v3327_v46 = vmul.f32 %v5499_v63, %v3287_v32  ;;  %v3367_v0 = vrot.slane %v3247_v57, %v5554_v44  ;;  %v2990_v42 = vadd.f32 %v2989_v59, %v2988_v40  ;;  %v3229_v21 = vmul.f32 %v3213_v8, %v5537_v37 }
 0x67c   : > { %4049 = vrsqrt.f32 %v3186_v28  ;;  %v3184_v9 = vadd.f32 1e-05, %v3168_v15  ;;  %v3130_v24 = vrot.slane %v3129_v5, 1  ;;  %v3114_v13 = vrot.slane %v3113_v43, 2 }
 0x67d   : > { %v3279_v6 = vrot.slane %v3213_v8, %v5554_v44  ;;  %v2991_v35 = vrot.slane %v2990_v42, 1  ;;  %v2974_v55 = vadd.f32 %v2973_v27, %v2972_v41  ;;  %v2994_v22 = vrot.slane %v2993_v33, 4 }
 0x67e   : > { %4051 = vrsqrt.f32 %v3184_v9  ;;  %v3131_v16 = vadd.f32 %v3130_v24, %v3129_v5  ;;  %v3115_v34 = vadd.f32 %v3114_v13, %v3113_v43  ;;  %v5677_v12 = vadd.f32 %v3367_v0, %v3327_v46 }
 0x67f   : > { %v2992_v63 = vadd.f32 %v2991_v35, %v2990_v42  ;;  %v2975_v32 = vrot.slane %v2974_v55, 2  ;;  %v2979_v40 = vsel %vm271_vm0, %v5582_v49, 0.0  ;;  %v2995_v28 = vadd.f32 %v2994_v22, %v2993_v33 }
 0x680   : > { %v3171_v57 = vmul.f32 0.125, %v3131_v16  ;;  %v3116_v59 = vrot.slane %v3115_v34, 1  ;;  %v2980_v15 = vrot.slane %v2979_v40, 4  ;;  %v3245_v37 = vsub.f32 %v5577_v38, %v3229_v21 }
 0x681   : > { %v5682_v8 = vmul.f32 0.125, %v2992_v63  ;;  %v2976_v41 = vadd.f32 %v2975_v32, %v2974_v55  ;;  %4053 = vtanh.f32 %v5613_v4  ;;  %v2996_v43 = vrot.slane %v2995_v28, 2 }
 0x682   : > { %v3187_v27 = vadd.f32 1e-05, %v3171_v57  ;;  %v3117_v5 = vadd.f32 %v3116_v59, %v3115_v34  ;;  %v2981_v46 = vadd.f32 %v2980_v15, %v2979_v40  ;;  %v3423_v0 = vmul.f32 0.5, %v5677_v12 }
 0x683   : > { %v3325_v42 = vmul.f32 %v3279_v6, %v5505_v1  ;;  %v3030_v9 = vsub.f32 %v5564_v23, %v5682_v8  ;;  %v2977_v33 = vrot.slane %v2976_v41, 1  ;;  %v2997_v13 = vadd.f32 %v2996_v43, %v2995_v28 }
 0x684   : > { %4055 = vrsqrt.f32 %v3187_v27  ;;  %v3169_v24 = vmul.f32 0.125, %v3117_v5  ;;  %v2982_v21 = vrot.slane %v2981_v46, 2  ;;  %v3359_v35 = vrot.slane %v3245_v37, %v5554_v44 }
 0x685   : > { %v3046_v55 = vmul.f32 %v3030_v9, %v3030_v9  ;;  %v2978_v4 = vadd.f32 %v2977_v33, %v2976_v41  ;;  %4057 = vtanh.f32 %v5621_v11  ;;  %v2998_v22 = vrot.slane %v2997_v13, 1 }
 0x686   : > { %v4050_v16 = vpop.eup %4049  ;;  %v3185_v34 = vadd.f32 1e-05, %v3169_v24  ;;  %v2983_v63 = vadd.f32 %v2982_v21, %v2981_v46  ;;  %4059 = vtanh.f32 %v5616_v25  ;;  %v5705_v43 = vadd.f32 %v3359_v35, %v3325_v42 }
 0x687   : > { %v3218_v6 = vmul.f32 %v5559_v61, %v4050_v16  ;;  %v3146_v1 = vsel %vm271_vm0, %v3046_v55, 0.0  ;;  %v5694_v32 = vmul.f32 0.125, %v2978_v4  ;;  %4061 = vtanh.f32 %v5637_v26 }
 0x688   : > { %v4052_v40 = vpop.eup %4051  ;;  %4063 = vrsqrt.f32 %v3185_v34  ;;  %v3147_v57 = vrot.slane %v3146_v1, 4  ;;  %v2999_v59 = vadd.f32 %v2998_v22, %v2997_v13  ;;  %v2984_v28 = vrot.slane %v2983_v63, 1 }
 0x689   : > { %v3234_v11 = vmul.f32 %v3218_v6, %v5602_v52  ;;  %v3299_v15 = vrot.slane %v3218_v6, %v5554_v44  ;;  %v3216_v37 = vmul.f32 %v5559_v61, %v4052_v40  ;;  %v3028_v25 = vsub.f32 %v5568_v48, %v5694_v32 }
 0x68a   : > { %v3148_v41 = vadd.f32 %v3147_v57, %v3146_v1  ;;  %v5702_v27 = vmul.f32 0.125, %v2999_v59  ;;  %v2985_v5 = vadd.f32 %v2984_v28, %v2983_v63  ;;  %4065 = vtanh.f32 %v5667_v56 }
 0x68b   : > { %v4054_v26 = vpop.eup %4053  ;;  %v3250_v46 = vsub.f32 %v5577_v38, %v3234_v11  ;;  %v3232_v52 = vmul.f32 %v3216_v37, %v5609_v62  ;;  %4067 = vtanh.f32 %v3423_v0  ;;  %v3044_v33 = vmul.f32 %v3028_v25, %v3028_v25 }
 0x68c   : > { %v3149_v9 = vrot.slane %v3148_v41, 2  ;;  %v3031_v24 = vsub.f32 %v5572_v20, %v5702_v27  ;;  %v5711_v13 = vmul.f32 0.125, %v2985_v5  ;;  %v3330_v21 = vmul.f32 %v5515_v54, %v3299_v15 }
 0x68d   : > { %v3379_v55 = vrot.slane %v3250_v46, %v5554_v44  ;;  %v3291_v56 = vrot.slane %v3216_v37, %v5554_v44  ;;  %v3450_v42 = vadd.f32 1.0, %v4054_v26  ;;  %v3132_v16 = vsel %vm271_vm0, %v3044_v33, 0.0 }
 0x68e   : > { %v4056_v35 = vpop.eup %4055  ;;  %v3150_v4 = vadd.f32 %v3149_v9, %v3148_v41  ;;  %v3047_v62 = vmul.f32 %v3031_v24, %v3031_v24  ;;  %v3029_v0 = vsub.f32 %v5582_v49, %v5711_v13  ;;  %v3248_v63 = vsub.f32 %v5577_v38, %v3232_v52 }
 0x68f   : > { %v4058_v34 = vpop.eup %4057  ;;  %v5719_v22 = vadd.f32 %v3379_v55, %v3330_v21  ;;  %v3219_v54 = vmul.f32 %v5559_v61, %v4056_v35  ;;  %v3133_v6 = vrot.slane %v3132_v16, 4  ;;  %v3466_v28 = vmul.f32 0.5, %v3450_v42 }
 0x690   : > { %v4060_v1 = vpop.eup %4059  ;;  %v3151_v40 = vrot.slane %v3150_v4, 1  ;;  %v3153_v57 = vsel %vm271_vm0, %v3047_v62, 0.0  ;;  %v3045_v59 = vmul.f32 %v3029_v0, %v3029_v0  ;;  %v3421_v15 = vmul.f32 0.5, %v5705_v43 }
 0x691   : > { %v4062_v11 = vpop.eup %4061  ;;  %v3328_v37 = vmul.f32 %v3291_v56, %v5517_v18  ;;  %v3235_v25 = vmul.f32 %v3219_v54, %v5628_v39  ;;  %v3303_v41 = vrot.slane %v3219_v54, %v5554_v44  ;;  %v3134_v46 = vadd.f32 %v3133_v6, %v3132_v16  ;;  %3500 = vrot.lane.b32.xlu0 %v3466_v28, %s4111_s8 }
 0x692   : > { %v4064_v5 = vpop.eup %4063  ;;  %v3152_v26 = vadd.f32 %v3151_v40, %v3150_v4  ;;  %v3154_v52 = vrot.slane %v3153_v57, 4  ;;  %v3139_v9 = vsel %vm271_vm0, %v3045_v59, 0.0  ;;  %v3426_v33 = vmul.f32 0.5, %v5719_v22 }
 0x693   : > { %v3371_v24 = vrot.slane %v3248_v63, %v5554_v44  ;;  %v3251_v21 = vsub.f32 %v5577_v38, %v3235_v25  ;;  %v3217_v18 = vmul.f32 %v5559_v61, %v4064_v5  ;;  %v3135_v56 = vrot.slane %v3134_v46, 2 }
 0x694   : > { %v4066_v55 = vpop.eup %4065  ;;  %v3174_v39 = vmul.f32 0.125, %v3152_v26  ;;  %v3155_v42 = vadd.f32 %v3154_v52, %v3153_v57  ;;  %v3140_v35 = vrot.slane %v3139_v9, 4  ;;  %v3331_v16 = vmul.f32 %v5519_v60, %v3303_v41 }
 0x695   : > { %v4068_v4 = vpop.eup %4067  ;;  %v3383_v62 = vrot.slane %v3251_v21, %v5554_v44  ;;  %v3233_v0 = vmul.f32 %v3217_v18, %v5645_v17  ;;  %v3451_v54 = vadd.f32 1.0, %v4058_v34  ;;  %v3136_v40 = vadd.f32 %v3135_v56, %v3134_v46 }
 0x696   : > { %v3190_v6 = vadd.f32 1e-05, %v3174_v39  ;;  %v3156_v63 = vrot.slane %v3155_v42, 2  ;;  %v3141_v59 = vadd.f32 %v3140_v35, %v3139_v9  ;;  %v3295_v5 = vrot.slane %v3217_v18, %v5554_v44 }
 0x697   : > { %v5737_v28 = vadd.f32 %v3383_v62, %v3331_v16  ;;  %v3249_v25 = vsub.f32 %v5577_v38, %v3233_v0  ;;  %v3467_v57 = vmul.f32 0.5, %v3451_v54  ;;  %v3137_v26 = vrot.slane %v3136_v40, 1 }
 0x698   : > { %4069 = vrsqrt.f32 %v3190_v6  ;;  %v3157_v52 = vadd.f32 %v3156_v63, %v3155_v42  ;;  %v3142_v60 = vrot.slane %v3141_v59, 2  ;;  %v5741_v41 = vadd.f32 %v3371_v24, %v3328_v37 }
 0x699   : > { %v3375_v17 = vrot.slane %v3249_v25, %v5554_v44  ;;  %3502 = vrot.lane.b32.xlu1 %v3467_v57, %s4111_s8  ;;  %v3448_v34 = vadd.f32 1.0, %v4060_v1  ;;  %v3449_v46 = vadd.f32 1.0, %v4062_v11  ;;  %v3138_v9 = vadd.f32 %v3137_v26, %v3136_v40 }
 0x69a   : > { %v3158_v21 = vrot.slane %v3157_v52, 1  ;;  %v3143_v39 = vadd.f32 %v3142_v60, %v3141_v59  ;;  %v3454_v56 = vadd.f32 1.0, %v4066_v55  ;;  %v3329_v35 = vmul.f32 %v3295_v5, %v5521_v7 }
 0x69b   : > { %v3464_v18 = vmul.f32 0.5, %v3448_v34  ;;  %v3465_v16 = vmul.f32 0.5, %v3449_v46  ;;  %v3455_v62 = vadd.f32 1.0, %v4068_v4  ;;  %v3427_v42 = vmul.f32 0.5, %v5737_v28 }
 0x69c   : > { %v3172_v0 = vmul.f32 0.125, %v3138_v9  ;;  %v3159_v37 = vadd.f32 %v3158_v21, %v3157_v52  ;;  %v3144_v24 = vrot.slane %v3143_v39, 1  ;;  %v5747_v54 = vadd.f32 %v3375_v17, %v3329_v35 }
 0x69d   : > { %3496 = vrot.lane.b32.xlu0 %v3464_v18, %s4111_s8  ;;  %3498 = vrot.lane.b32.xlu1 %v3465_v16, %s4111_s8  ;;  %v3470_v1 = vmul.f32 0.5, %v3454_v56  ;;  %v3471_v11 = vmul.f32 0.5, %v3455_v62  ;;  %4071 = vtanh.f32 %v5671_v3  ;;  %v3424_v4 = vmul.f32 0.5, %v5741_v41 }
 0x69e   : > { %v3188_v55 = vadd.f32 1e-05, %v3172_v0  ;;  %v3175_v7 = vmul.f32 0.125, %v3159_v37  ;;  %v3145_v6 = vadd.f32 %v3144_v24, %v3143_v39  ;;  %4073 = vtanh.f32 %v3421_v15 }
 0x69f   : > { %4075 = vtanh.f32 %v3426_v33  ;;  %v3425_v59 = vmul.f32 0.5, %v5747_v54 }
 0x6a0   : > { %4077 = vrsqrt.f32 %v3188_v55  ;;  %v3191_v40 = vadd.f32 1e-05, %v3175_v7  ;;  %v3173_v63 = vmul.f32 0.125, %v3145_v6 }
 0x6a1   : > { %3508 = vrot.lane.b32.xlu0 %v3470_v1, %s4111_s8  ;;  %3510 = vrot.lane.b32.xlu1 %v3471_v11, %s4111_s8  ;;  %4079 = vtanh.f32 %v3427_v42 }
 0x6a2   : > { %v4070_v25 = vpop.eup %4069  ;;  %4081 = vrsqrt.f32 %v3191_v40  ;;  %v3189_v3 = vadd.f32 1e-05, %v3173_v63 }
 0x6a3   : > { %v3222_v5 = vmul.f32 %v5559_v61, %v4070_v25  ;;  %4083 = vtanh.f32 %v3424_v4 }
 0x6a4   : > { %4085 = vrsqrt.f32 %v3189_v3 }
 0x6a5   : > { %v3238_v15 = vmul.f32 %v3222_v5, %v5682_v8  ;;  %4087 = vtanh.f32 %v3425_v59  ;;  %v3315_v52 = vrot.slane %v3222_v5, %v5554_v44 }
 0x6a7   : > { %v4072_v33 = vpop.eup %4071  ;;  %v3254_v57 = vsub.f32 %v5577_v38, %v3238_v15  ;;  %v3334_v16 = vmul.f32 %v5564_v23, %v3315_v52 }
 0x6a8   : > { %v4074_v26 = vpop.eup %4073  ;;  %v3452_v60 = vadd.f32 1.0, %v4072_v33 }
 0x6a9   : > { %v4076_v17 = vpop.eup %4075  ;;  %v3453_v34 = vadd.f32 1.0, %v4074_v26  ;;  %v3395_v9 = vrot.slane %v3254_v57, %v5554_v44 }
 0x6aa   : > { %v4078_v46 = vpop.eup %4077  ;;  %v3468_v21 = vmul.f32 0.5, %v3452_v60  ;;  %v3458_v39 = vadd.f32 1.0, %v4076_v17 }
 0x6ab   : > { %v4080_v56 = vpop.eup %4079  ;;  %v3220_v35 = vmul.f32 %v5559_v61, %v4078_v46  ;;  %v3469_v18 = vmul.f32 0.5, %v3453_v34  ;;  %v5768_v55 = vadd.f32 %v3395_v9, %v3334_v16 }
 0x6ac   : > { %v4082_v8 = vpop.eup %4081  ;;  %3504 = vrot.lane.b32.xlu0 %v3468_v21, %s4111_s8  ;;  %v3474_v62 = vmul.f32 0.5, %v3458_v39  ;;  %v3459_v42 = vadd.f32 1.0, %v4080_v56 }
 0x6ad   : > { %v4084_v0 = vpop.eup %4083  ;;  %v3236_v37 = vmul.f32 %v3220_v35, %v5694_v32  ;;  %v3307_v24 = vrot.slane %v3220_v35, %v5554_v44  ;;  %v3223_v1 = vmul.f32 %v5559_v61, %v4082_v8  ;;  %3506 = vrot.lane.b32.xlu1 %v3469_v18, %s4111_s8  ;;  %v3430_v15 = vmul.f32 0.5, %v5768_v55 }
 0x6ae   : > { %v4086_v11 = vpop.eup %4085  ;;  %v3475_v7 = vmul.f32 0.5, %v3459_v42  ;;  %v3456_v6 = vadd.f32 1.0, %v4084_v0 }
 0x6af   : > { %v4088_v4 = vpop.eup %4087  ;;  %v3252_v23 = vsub.f32 %v5577_v38, %v3236_v37  ;;  %v3239_v40 = vmul.f32 %v3223_v1, %v5702_v27  ;;  %v3319_v63 = vrot.slane %v3223_v1, %v5554_v44  ;;  %v3221_v32 = vmul.f32 %v5559_v61, %v4086_v11 }
 0x6b0   : > { %3516 = vrot.lane.b32.xlu0 %v3474_v62, %s4111_s8  ;;  %v3457_v59 = vadd.f32 1.0, %v4088_v4  ;;  %v3332_v25 = vmul.f32 %v3307_v24, %v5568_v48  ;;  %v3472_v57 = vmul.f32 0.5, %v3456_v6  ;;  %4089 = vtanh.f32 %v3430_v15 }
 0x6b1   : > { %v3387_v3 = vrot.slane %v3252_v23, %v5554_v44  ;;  %v3255_v5 = vsub.f32 %v5577_v38, %v3239_v40  ;;  %3518 = vrot.lane.b32.xlu1 %v3475_v7, %s4111_s8  ;;  %v3237_v33 = vmul.f32 %v3221_v32, %v5711_v13  ;;  %v3311_v27 = vrot.slane %v3221_v32, %v5554_v44 }
 0x6b2   : > { %v3335_v61 = vmul.f32 %v5572_v20, %v3319_v63  ;;  %v3473_v48 = vmul.f32 0.5, %v3457_v59 }
 0x6b3   : > { %v5782_v26 = vadd.f32 %v3387_v3, %v3332_v25  ;;  %v3399_v52 = vrot.slane %v3255_v5, %v5554_v44  ;;  %v3253_v60 = vsub.f32 %v5577_v38, %v3237_v33  ;;  %v3333_v13 = vmul.f32 %v3311_v27, %v5582_v49 }
 0x6b4   : > { %3512 = vrot.lane.b32.xlu0 %v3472_v57, %s4111_s8 }
 0x6b5   : > { %v3428_v17 = vmul.f32 0.5, %v5782_v26  ;;  %v5789_v34 = vadd.f32 %v3399_v52, %v3335_v61  ;;  %3514 = vrot.lane.b32.xlu1 %v3473_v48, %s4111_s8  ;;  %v3391_v46 = vrot.slane %v3253_v60, %v5554_v44 }
 0x6b7   : > { %v3431_v20 = vmul.f32 0.5, %v5789_v34  ;;  %4091 = vtanh.f32 %v3428_v17  ;;  %v5795_v9 = vadd.f32 %v3391_v46, %v3333_v13 }
 0x6b9   : > { %v3429_v38 = vmul.f32 0.5, %v5795_v9  ;;  %4093 = vtanh.f32 %v3431_v20 }
 0x6ba   : > { %v4090_v21 = vpop.eup %4089 }
 0x6bb   : > { %4095 = vtanh.f32 %v3429_v38  ;;  %v3462_v18 = vadd.f32 1.0, %v4090_v21 }
 0x6bd   : > { %v3478_v16 = vmul.f32 0.5, %v3462_v18 }
 0x6c1   : > { %v4092_v39 = vpop.eup %4091 }
 0x6c2   : > { %v3460_v56 = vadd.f32 1.0, %v4092_v39 }
 0x6c3   : > { %v4094_v8 = vpop.eup %4093 }
 0x6c4   : > { %v3476_v35 = vmul.f32 0.5, %v3460_v56  ;;  %v3463_v42 = vadd.f32 1.0, %v4094_v8  ;;  %v5957_v56 = vld [vmem:[#allocation3_spill] sm:$0xff] }
 0x6c5   : > { %v4096_v49 = vpop.eup %4095 }
 0x6c6   : > { %3520 = vrot.lane.b32.xlu0 %v3476_v35, %s4111_s8  ;;  %v3461_v44 = vadd.f32 1.0, %v4096_v49  ;;  %v3479_v0 = vmul.f32 0.5, %v3463_v42  ;;  %v5958_v49 = vld [vmem:[#allocation6_spill] sm:$0xff] }
 0x6c8   : > { %v3477_v62 = vmul.f32 0.5, %v3461_v44 }
 0x6ca   : > { %3524 = vrot.lane.b32.xlu0 %v3478_v16, %s4111_s8  ;;  %3522 = vrot.lane.b32.xlu1 %v3477_v62, %s4111_s8 }
 0x6ce   : > { %3526 = vrot.lane.b32.xlu1 %v3479_v0, %s4111_s8 }
 0x703   : > { %v3501_v37 = vpop.permute.xlu0 %3500 }
 0x704   : > { %v3546_v24 = vmul.f32 %v3501_v37, %v5596_v51 }
 0x706   : > { %v3562_v1 = vadd.f32 %v3546_v24, %v5390_v30  ;;  %v5959_v24 = vld [vmem:[#allocation8_spill] sm:$0xff] }
 0x708   : > { %v3578_v11 = vmul.f32 0.70710677, %v3562_v1 }
 0x70a   : > { %3594 = vst.msk [vmem:[%s5809_s7 + $0x10] sm:$0xff] %vm1082_vm1, %v3578_v11  ;;  %v5960_v11 = vld [vmem:[#allocation7_spill] sm:$0xff] }
 0x70b   : > { %v3503_v7 = vpop.permute.xlu1 %3502 }
 0x70c   : > { %v3547_v6 = vmul.f32 %v3503_v7, %v5604_v58 }
 0x70e   : > { %v3563_v4 = vadd.f32 %v3547_v6, %v5392_v45 }
 0x70f   : > { %v3497_v51 = vpop.permute.xlu0 %3496  ;;  %v3499_v30 = vpop.permute.xlu1 %3498 }
 0x710   : > { %v3579_v23 = vmul.f32 0.70710677, %v3563_v4  ;;  %v3544_v40 = vmul.f32 %v3497_v51, %v5599_v2  ;;  %v3545_v63 = vmul.f32 %v3499_v30, %v5623_v36  ;;  %v5961_v30 = vld [vmem:[#allocation9_spill] sm:$0xff] }
 0x712   : > { %3595 = vst.msk [vmem:[%s5809_s7 + $0x18] sm:$0xff] %vm1082_vm1, %v3579_v23  ;;  %v3560_v32 = vadd.f32 %v3544_v40, %v5380_v50  ;;  %v3561_v59 = vadd.f32 %v3545_v63, %v5382_v19 }
 0x713   : > { %v3509_v58 = vpop.permute.xlu0 %3508  ;;  %v3511_v25 = vpop.permute.xlu1 %3510 }
 0x714   : > { %v3576_v3 = vmul.f32 0.70710677, %v3560_v32  ;;  %v3577_v45 = vmul.f32 0.70710677, %v3561_v59  ;;  %v3550_v5 = vmul.f32 %v3509_v58, %v5656_v31  ;;  %v3551_v15 = vmul.f32 %v3511_v25, %v5677_v12 }
 0x716   : > { %3592 = vst.msk [vmem:[%s5809_s7] sm:$0xff] %vm1082_vm1, %v3576_v3  ;;  %3593 = vst.msk [vmem:[%s5809_s7 + $0x8] sm:$0xff] %vm1082_vm1, %v3577_v45  ;;  %v3566_v2 = vadd.f32 %v3550_v5, %v5413_v47  ;;  %v3567_v36 = vadd.f32 %v3551_v15, %v5415_v10 }
 0x718   : > { %v3582_v33 = vmul.f32 0.70710677, %v3566_v2  ;;  %v3583_v50 = vmul.f32 0.70710677, %v3567_v36 }
 0x71a   : > { %3598 = vst.msk [vmem:[%s5809_s7 + $0x30] sm:$0xff] %vm1082_vm1, %v3582_v33  ;;  %3599 = vst.msk [vmem:[%s5809_s7 + $0x38] sm:$0xff] %vm1082_vm1, %v3583_v50 }
 0x71e   : > { %v3505_v19 = vpop.permute.xlu0 %3504 }
 0x71f   : > { %v3548_v31 = vmul.f32 %v3505_v19, %v5661_v14  ;;  %v3507_v12 = vpop.permute.xlu1 %3506  ;;  %v5954_v14 = vld [vmem:[#allocation4_spill] sm:$0xff] }
 0x720   : > { %v3549_v27 = vmul.f32 %v3507_v12, %v5705_v43 }
 0x721   : > { %v3564_v57 = vadd.f32 %v3548_v31, %v5400_v29  ;;  %v5955_v29 = vld [vmem:[#allocation5_spill] sm:$0xff] }
 0x722   : > { %v3565_v47 = vadd.f32 %v3549_v27, %v5402_v53  ;;  %v3517_v61 = vpop.permute.xlu0 %3516 }
 0x723   : > { %v3580_v10 = vmul.f32 0.70710677, %v3564_v57  ;;  %v3554_v52 = vmul.f32 %v3517_v61, %v5719_v22  ;;  %v3519_v48 = vpop.permute.xlu1 %3518 }
 0x724   : > { %v3581_v60 = vmul.f32 0.70710677, %v3565_v47  ;;  %v3555_v17 = vmul.f32 %v3519_v48, %v5737_v28  ;;  %v5956_v28 = vld [vmem:[#allocation11_spill] sm:$0xff] }
 0x725   : > { %3596 = vst.msk [vmem:[%s5809_s7 + $0x20] sm:$0xff] %vm1082_vm1, %v3580_v10  ;;  %v3570_v13 = vadd.f32 %v3554_v52, %v5954_v14 }
 0x726   : > { %3597 = vst.msk [vmem:[%s5809_s7 + $0x28] sm:$0xff] %vm1082_vm1, %v3581_v60  ;;  %v3571_v53 = vadd.f32 %v3555_v17, %v5955_v29  ;;  %v3513_v43 = vpop.permute.xlu0 %3512 }
 0x727   : > { %v3586_v46 = vmul.f32 0.70710677, %v3570_v13  ;;  %v3552_v20 = vmul.f32 %v3513_v43, %v5741_v41  ;;  %v3515_v22 = vpop.permute.xlu1 %3514 }
 0x728   : > { %v3587_v38 = vmul.f32 0.70710677, %v3571_v53  ;;  %v3553_v21 = vmul.f32 %v3515_v22, %v5747_v54 }
 0x729   : > { %3602 = vst.msk [vmem:[%s5809_s7 + $0x50] sm:$0xff] %vm1082_vm1, %v3586_v46  ;;  %v3568_v39 = vadd.f32 %v3552_v20, %v5956_v28 }
 0x72a   : > { %3603 = vst.msk [vmem:[%s5809_s7 + $0x58] sm:$0xff] %vm1082_vm1, %v3587_v38  ;;  %v3569_v35 = vadd.f32 %v3553_v21, %v5957_v56 }
 0x72b   : > { %v3584_v18 = vmul.f32 0.70710677, %v3568_v39 }
 0x72c   : > { %v3585_v8 = vmul.f32 0.70710677, %v3569_v35 }
 0x72d   : > { %3600 = vst.msk [vmem:[%s5809_s7 + $0x40] sm:$0xff] %vm1082_vm1, %v3584_v18 }
 0x72e   : > { %3601 = vst.msk [vmem:[%s5809_s7 + $0x48] sm:$0xff] %vm1082_vm1, %v3585_v8 }
 0x738   : > { %v3521_v41 = vpop.permute.xlu0 %3520 }
 0x739   : > { %v3556_v54 = vmul.f32 %v3521_v41, %v5782_v26 }
 0x73b   : > { %v3572_v44 = vadd.f32 %v3556_v54, %v5958_v49 }
 0x73c   : > { %v3525_v16 = vpop.permute.xlu0 %3524  ;;  %v3523_v42 = vpop.permute.xlu1 %3522 }
 0x73d   : > { %v3588_v62 = vmul.f32 0.70710677, %v3572_v44  ;;  %v3558_v0 = vmul.f32 %v3525_v16, %v5768_v55  ;;  %v3557_v37 = vmul.f32 %v3523_v42, %v5795_v9 }
 0x73f   : > { %3604 = vst.msk [vmem:[%s5809_s7 + $0x60] sm:$0xff] %vm1082_vm1, %v3588_v62  ;;  %v3574_v1 = vadd.f32 %v3558_v0, %v5959_v24  ;;  %v3573_v7 = vadd.f32 %v3557_v37, %v5960_v11 }
 0x740   : > { %v3527_v4 = vpop.permute.xlu1 %3526 }
 0x741   : > { %v3590_v6 = vmul.f32 0.70710677, %v3574_v1  ;;  %v3589_v51 = vmul.f32 0.70710677, %v3573_v7  ;;  %v3559_v26 = vmul.f32 %v3527_v4, %v5789_v34 }
 0x743   : > { %3606 = vst.msk [vmem:[%s5809_s7 + $0x70] sm:$0xff] %vm1082_vm1, %v3590_v6  ;;  %3605 = vst.msk [vmem:[%s5809_s7 + $0x68] sm:$0xff] %vm1082_vm1, %v3589_v51  ;;  %v3575_v23 = vadd.f32 %v3559_v26, %v5961_v30 }
 0x745   : > { %v3591_v55 = vmul.f32 0.70710677, %v3575_v23 }
 0x747   : > { %3607 = vst.msk [vmem:[%s5809_s7 + $0x78] sm:$0xff] %vm1082_vm1, %v3591_v55 }
 0x748 PF: > { %s15_s18 = sadd.s32 1, %s4109_s18  }
 0x749   : > { %p12_p4 = scmp.ge.s32.totalorder %s15_s18, 4  }
 0x74b   :  { %14 = sbr.rel (!%p12_p4) target bundleno = 1 (0x1), region = 72 }

</bundles_post_ra>
